<compile_context>
chip_gen: v5e
topology: v5e:2x2
jax: 0.10.0
libtpu: 0.0.40
codegen_flags: <defaults>
</compile_context>

<pallas_src>
import jax
import jax.numpy as jnp
from jax.experimental import pallas as pl
from jax.experimental.pallas import tpu as pltpu

HID = 512                       # fc1 hidden dim padded 500 -> 512
OUT_PAD = 128                   # fc2 output padded 10 -> 128 (lane-dense store)
VMEM_LIMIT = 32 * 1024 * 1024   # fits v7x (64 MiB physical); >> per-step tiles


# ----------------- fused conv3x3(same) + bias + ReLU + maxpool2x2 -----------------
def _conv_pool_kernel(x_ref, w_ref, b_ref, o_ref):
    # x_ref: (bb, 4, hw, K) bf16 im2col patches; axis 1 = 2x2 pool-window slot
    # w_ref: (K, Cout) bf16    b_ref: (1, Cout) f32    o_ref: (bb, hw, Cout) bf16
    bb, nwin, hw, k = x_ref.shape
    co = w_ref.shape[1]
    x = x_ref[...].reshape(bb * nwin * hw, k)
    y = jnp.dot(x, w_ref[...], preferred_element_type=jnp.float32)   # one MXU matmul
    y = y.reshape(bb, nwin, hw, co)
    m = jnp.maximum(jnp.maximum(y[:, 0], y[:, 1]),
                    jnp.maximum(y[:, 2], y[:, 3]))                    # 2x2 max pool
    m = jnp.maximum(m + b_ref[...], 0.0)                              # bias + ReLU in f32
    o_ref[...] = m.astype(o_ref.dtype)


def _conv_batch_block(batch, hw):
    """Batch rows per grid step: target M = bb*4*hw >= ~2048; never split B<=2."""
    if batch <= 2:
        return batch
    cap = max(8, 2048 // (4 * hw))
    bb = min(cap, batch)
    while batch % bb:
        bb -= 1
    return bb


def _im2col_pooled(x_nhwc, k_pad):
    """(B,H,W,C) bf16 -> (B, 4, (H/2)*(W/2), k_pad) patches grouped by pool-window slot."""
    B, H, W, C = x_nhwc.shape
    Hh, Wh = H // 2, W // 2
    xp = jnp.pad(x_nhwc, ((0, 0), (1, 1), (1, 1), (0, 0)))            # "same" padding
    cols = [xp[:, ky:ky + H, kx:kx + W, :] for ky in range(3) for kx in range(3)]
    patches = jnp.stack(cols, axis=3).reshape(B, H, W, 9 * C)         # (ky,kx,cin) minor order
    if k_pad > 9 * C:                                                 # conv1: 27 -> 32
        patches = jnp.pad(patches, ((0, 0), (0, 0), (0, 0), (0, k_pad - 9 * C)))
    p = patches.reshape(B, Hh, 2, Wh, 2, k_pad).transpose(0, 2, 4, 1, 3, 5)
    return p.reshape(B, 4, Hh * Wh, k_pad)


def conv_pool(x_nhwc, w, b):
    """Fused conv3x3(same)+bias+ReLU+maxpool2x2: (B,H,W,Cin) bf16 -> (B,H/2,W/2,Cout) bf16."""
    B, H, W, _ = x_nhwc.shape
    Hh, Wh = H // 2, W // 2
    hw = Hh * Wh
    K, Co = w.shape
    patches = _im2col_pooled(x_nhwc, K)                               # glue im2col, real Cin
    bb = _conv_batch_block(B, hw)
    y = pl.pallas_call(
        _conv_pool_kernel,
        out_shape=jax.ShapeDtypeStruct((B, hw, Co), jnp.bfloat16),
        grid=(B // bb,),
        in_specs=[
            pl.BlockSpec((bb, 4, hw, K), lambda i: (i, 0, 0, 0)),
            pl.BlockSpec((K, Co), lambda i: (0, 0)),
            pl.BlockSpec((1, Co), lambda i: (0, 0)),
        ],
        out_specs=pl.BlockSpec((bb, hw, Co), lambda i: (i, 0, 0)),
        compiler_params=pltpu.CompilerParams(
            dimension_semantics=("parallel",),
            vmem_limit_bytes=VMEM_LIMIT,
        ),
    )(patches, w, b)
    return y.reshape(B, Hh, Wh, Co)


# ------------------------------- fc1 + ReLU + fc2 (one kernel) --------------------------
def _mlp_kernel(x_ref, w1_ref, b1_ref, w2_ref, b2_ref, o_ref):
    h = jnp.dot(x_ref[...], w1_ref[...], preferred_element_type=jnp.float32) + b1_ref[...]
    h = jnp.maximum(h, 0.0).astype(w2_ref.dtype)
    o_ref[...] = jnp.dot(h, w2_ref[...], preferred_element_type=jnp.float32) + b2_ref[...]


def _mlp_batch_block(batch, cap=256):
    if batch <= cap:
        return batch
    for bm in range(cap, 7, -1):          # bm must divide B and be a sublane multiple (8)
        if batch % bm == 0 and bm % 8 == 0:
            return bm
    return batch


def mlp_head(x_flat, w1, b1, w2, b2):
    B, F = x_flat.shape
    H1 = w1.shape[1]
    CO = w2.shape[1]
    bm = _mlp_batch_block(B)
    return pl.pallas_call(
        _mlp_kernel,
        out_shape=jax.ShapeDtypeStruct((B, CO), jnp.float32),
        grid=(B // bm,),
        in_specs=[
            pl.BlockSpec((bm, F), lambda i: (i, 0)),
            pl.BlockSpec((F, H1), lambda i: (0, 0)),
            pl.BlockSpec((1, H1), lambda i: (0, 0)),
            pl.BlockSpec((H1, CO), lambda i: (0, 0)),
            pl.BlockSpec((1, CO), lambda i: (0, 0)),
        ],
        out_specs=pl.BlockSpec((bm, CO), lambda i: (i, 0)),
        compiler_params=pltpu.CompilerParams(
            dimension_semantics=("parallel",),
            vmem_limit_bytes=VMEM_LIMIT,
        ),
    )(x_flat, w1, b1, w2, b2)


# --------------------------------------- forward ----------------------------------------
def net_forward(x_nchw, params):
    x = jnp.transpose(x_nchw, (0, 2, 3, 1)).astype(jnp.bfloat16)      # NCHW->NHWC, bf16 once
    for name in ("conv1", "conv2", "conv3"):
        w, b = params[name]
        x = conv_pool(x, w, b)
    B = x.shape[0]
    # Flatten the real-channel NHWC conv3 output; fc1 rows were permuted at init to
    # consume exactly this order (equivalent to torch's NCHW x.view(-1, 64*4*4)).
    x = x.reshape(B, 4 * 4 * 64)
    # TODO(synk): nn.Dropout(0.2) is identity at inference; training-mode dropout not applied.
    w1, b1 = params["fc1"]
    w2, b2 = params["fc2"]
    out = mlp_head(x, w1, b1, w2, b2)
    return out[:, :10]                                                # strip fc2 lane padding


# --------------------------------- deterministic parameters -----------------------------
def init_params(key):
    def u(k, shape, fan_in):
        bound = 1.0 / (fan_in ** 0.5)                                 # PyTorch default init
        return jax.random.uniform(k, shape, jnp.float32, -bound, bound)

    keys = jax.random.split(key, 10)
    params = {}
    conv_specs = [("conv1", 3, 16), ("conv2", 16, 32), ("conv3", 32, 64)]
    for idx, (name, cin, cout) in enumerate(conv_specs):
        w_oihw = u(keys[2 * idx], (cout, cin, 3, 3), cin * 9)         # torch OIHW
        b = u(keys[2 * idx + 1], (cout,), cin * 9)
        w_hwio = jnp.transpose(w_oihw, (2, 3, 1, 0)).reshape(9 * cin, cout)  # (ky,kx,cin) rows
        k_pad = -(-9 * cin // 16) * 16                                # 27->32; 144/288 unchanged
        wp = jnp.zeros((k_pad, cout), jnp.float32).at[:9 * cin].set(w_hwio)
        params[name] = (wp.astype(jnp.bfloat16), b.reshape(1, cout))  # bf16 weight, f32 bias

    # fc1: torch (500, 64*4*4); torch flatten feature order is c*16 + h*4 + w (NCHW).
    w1 = u(keys[6], (500, 64 * 4 * 4), 64 * 4 * 4)
    b1 = u(keys[7], (500,), 64 * 4 * 4)
    w2 = u(keys[8], (10, 500), 500)
    b2 = u(keys[9], (10,), 500)
    # Permute fc1 rows to consume the NHWC flatten ((h*4+w)*64 + c) directly; pad hidden
    # 500 -> 512 (padded rows/cols are exactly zero, so fc2's zero rows make it a no-op).
    w1_hwc = w1.T.reshape(64, 4, 4, 500).transpose(1, 2, 0, 3).reshape(64 * 4 * 4, 500)
    w1p = jnp.zeros((64 * 4 * 4, HID), jnp.float32).at[:, :500].set(w1_hwc)
    params["fc1"] = (w1p.astype(jnp.bfloat16),
                     jnp.pad(b1, (0, HID - 500)).reshape(1, HID))
    w2p = jnp.zeros((HID, OUT_PAD), jnp.float32).at[:500, :10].set(w2.T)
    params["fc2"] = (w2p.astype(jnp.bfloat16),
                     jnp.pad(b2, (0, OUT_PAD - 10)).reshape(1, OUT_PAD))
    return params


if __name__ == "__main__":
    # fc1 expects 64*4*4 features after three 2x2 pools => spatial must be 32x32.
    x = jax.random.normal(jax.random.PRNGKey(0), (2, 3, 32, 32), jnp.float32)
    params = init_params(jax.random.PRNGKey(1))
    out = jax.jit(net_forward)(x, params)
    out = jax.block_until_ready(out)
    assert out.shape == (2, 10), out.shape
    assert bool(jnp.all(jnp.isfinite(out)))
    print("KERNEL_OK")
</pallas_src>

<mosaic_0001>
module attributes {stable_mosaic.version = 11 : i64} {
  func.func @_conv_pool_kernel(%arg0: i32, %arg1: memref<2x4x256x32xbf16, #tpu.memory_space<vmem>>, %arg2: memref<32x16xbf16, #tpu.memory_space<vmem>>, %arg3: memref<1x16xf32, #tpu.memory_space<vmem>>, %arg4: memref<2x256x16xbf16, #tpu.memory_space<vmem>>) attributes {dimension_semantics = [#tpu.dimension_semantics<parallel>], iteration_bounds = array<i64: 1>, scalar_prefetch = 0 : i64, scratch_operands = 0 : i64, tpu.core_type = #tpu.core_type<tc>, window_params = [{transform_indices = @transform_0, window_bounds = array<i64: 2, 4, 256, 32>}, {pipeline_mode = #tpu.pipeline_mode<synchronous>, transform_indices = @transform_1, window_bounds = array<i64: 32, 16>}, {pipeline_mode = #tpu.pipeline_mode<synchronous>, transform_indices = @transform_2, window_bounds = array<i64: 1, 16>}, {transform_indices = @transform_3, window_bounds = array<i64: 2, 256, 16>}]} {
    %c0 = arith.constant 0 : index
    %c0_0 = arith.constant 0 : index
    %c0_1 = arith.constant 0 : index
    %c0_2 = arith.constant 0 : index
    %0 = vector.load %arg1[%c0, %c0_0, %c0_1, %c0_2] : memref<2x4x256x32xbf16, #tpu.memory_space<vmem>>, vector<2x4x256x32xbf16>
    %1 = vector.shape_cast %0 : vector<2x4x256x32xbf16> to vector<2048x32xbf16>
    %c0_3 = arith.constant 0 : index
    %c0_4 = arith.constant 0 : index
    %2 = vector.load %arg2[%c0_3, %c0_4] : memref<32x16xbf16, #tpu.memory_space<vmem>>, vector<32x16xbf16>
    %cst = arith.constant dense<0.000000e+00> : vector<2048x16xf32>
    %3 = tpu.matmul %1, %2, %cst {dimension_numbers = #tpu.dot_dimension_numbers<[1], [0], [0], [1], [0, 0, 1, 1], [], []>} : vector<2048x32xbf16>, vector<32x16xbf16>, vector<2048x16xf32> -> vector<2048x16xf32>
    %4 = vector.shape_cast %3 : vector<2048x16xf32> to vector<2x4x256x16xf32>
    %5 = vector.extract_strided_slice %4 {offsets = [0, 0, 0, 0], sizes = [2, 1, 256, 16], strides = [1, 1, 1, 1]} : vector<2x4x256x16xf32> to vector<2x1x256x16xf32>
    %6 = vector.shape_cast %5 : vector<2x1x256x16xf32> to vector<2x256x16xf32>
    %7 = vector.extract_strided_slice %4 {offsets = [0, 1, 0, 0], sizes = [2, 1, 256, 16], strides = [1, 1, 1, 1]} : vector<2x4x256x16xf32> to vector<2x1x256x16xf32>
    %8 = vector.shape_cast %7 : vector<2x1x256x16xf32> to vector<2x256x16xf32>
    %9 = arith.maximumf %6, %8 : vector<2x256x16xf32>
    %10 = vector.extract_strided_slice %4 {offsets = [0, 2, 0, 0], sizes = [2, 1, 256, 16], strides = [1, 1, 1, 1]} : vector<2x4x256x16xf32> to vector<2x1x256x16xf32>
    %11 = vector.shape_cast %10 : vector<2x1x256x16xf32> to vector<2x256x16xf32>
    %12 = vector.extract_strided_slice %4 {offsets = [0, 3, 0, 0], sizes = [2, 1, 256, 16], strides = [1, 1, 1, 1]} : vector<2x4x256x16xf32> to vector<2x1x256x16xf32>
    %13 = vector.shape_cast %12 : vector<2x1x256x16xf32> to vector<2x256x16xf32>
    %14 = arith.maximumf %11, %13 : vector<2x256x16xf32>
    %15 = arith.maximumf %9, %14 : vector<2x256x16xf32>
    %c0_5 = arith.constant 0 : index
    %c0_6 = arith.constant 0 : index
    %16 = vector.load %arg3[%c0_5, %c0_6] : memref<1x16xf32, #tpu.memory_space<vmem>>, vector<1x16xf32>
    %17 = vector.shape_cast %16 : vector<1x16xf32> to vector<1x1x16xf32>
    %18 = vector.broadcast %17 : vector<1x1x16xf32> to vector<2x256x16xf32>
    %19 = arith.addf %15, %18 : vector<2x256x16xf32>
    %cst_7 = arith.constant 0.000000e+00 : f32
    %20 = vector.broadcast %cst_7 : f32 to vector<2x256x16xf32>
    %21 = arith.maximumf %19, %20 : vector<2x256x16xf32>
    %22 = arith.truncf %21 : vector<2x256x16xf32> to vector<2x256x16xbf16>
    %c0_8 = arith.constant 0 : index
    %c0_9 = arith.constant 0 : index
    %c0_10 = arith.constant 0 : index
    %23 = vector.load %arg4[%c0_8, %c0_9, %c0_10] : memref<2x256x16xbf16, #tpu.memory_space<vmem>>, vector<2x256x16xbf16>
    tpu.vector_store %arg4[%c0_8, %c0_9, %c0_10], %22 {strides = array<i32>} : memref<2x256x16xbf16, #tpu.memory_space<vmem>>, vector<2x256x16xbf16>,
    return
  }
  func.func @transform_0(%arg0: i32) -> (i32, i32, i32, i32) {
    %c0_i32 = arith.constant 0 : i32
    %c0_i32_0 = arith.constant 0 : i32
    %c0_i32_1 = arith.constant 0 : i32
    %c0_i32_2 = arith.constant 0 : i32
    return %arg0, %c0_i32, %c0_i32_0, %c0_i32_1 : i32, i32, i32, i32
  }
  func.func @transform_1(%arg0: i32) -> (i32, i32) {
    %c0_i32 = arith.constant 0 : i32
    %c0_i32_0 = arith.constant 0 : i32
    %c0_i32_1 = arith.constant 0 : i32
    return %c0_i32, %c0_i32_0 : i32, i32
  }
  func.func @transform_2(%arg0: i32) -> (i32, i32) {
    %c0_i32 = arith.constant 0 : i32
    %c0_i32_0 = arith.constant 0 : i32
    %c0_i32_1 = arith.constant 0 : i32
    return %c0_i32, %c0_i32_0 : i32, i32
  }
  func.func @transform_3(%arg0: i32) -> (i32, i32, i32) {
    %c0_i32 = arith.constant 0 : i32
    %c0_i32_0 = arith.constant 0 : i32
    %c0_i32_1 = arith.constant 0 : i32
    return %arg0, %c0_i32, %c0_i32_0 : i32, i32, i32
  }
}

module attributes {stable_mosaic.version = 11 : i64} {
  func.func @_conv_pool_kernel(%arg0: i32, %arg1: memref<2x4x64x144xbf16, #tpu.memory_space<vmem>>, %arg2: memref<144x32xbf16, #tpu.memory_space<vmem>>, %arg3: memref<1x32xf32, #tpu.memory_space<vmem>>, %arg4: memref<2x64x32xbf16, #tpu.memory_space<vmem>>) attributes {dimension_semantics = [#tpu.dimension_semantics<parallel>], iteration_bounds = array<i64: 1>, scalar_prefetch = 0 : i64, scratch_operands = 0 : i64, tpu.core_type = #tpu.core_type<tc>, window_params = [{transform_indices = @transform_0, window_bounds = array<i64: 2, 4, 64, 144>}, {pipeline_mode = #tpu.pipeline_mode<synchronous>, transform_indices = @transform_1, window_bounds = array<i64: 144, 32>}, {pipeline_mode = #tpu.pipeline_mode<synchronous>, transform_indices = @transform_2, window_bounds = array<i64: 1, 32>}, {transform_indices = @transform_3, window_bounds = array<i64: 2, 64, 32>}]} {
    %c0 = arith.constant 0 : index
    %c0_0 = arith.constant 0 : index
    %c0_1 = arith.constant 0 : index
    %c0_2 = arith.constant 0 : index
    %0 = vector.load %arg1[%c0, %c0_0, %c0_1, %c0_2] : memref<2x4x64x144xbf16, #tpu.memory_space<vmem>>, vector<2x4x64x144xbf16>
    %1 = vector.shape_cast %0 : vector<2x4x64x144xbf16> to vector<512x144xbf16>
    %c0_3 = arith.constant 0 : index
    %c0_4 = arith.constant 0 : index
    %2 = vector.load %arg2[%c0_3, %c0_4] : memref<144x32xbf16, #tpu.memory_space<vmem>>, vector<144x32xbf16>
    %cst = arith.constant dense<0.000000e+00> : vector<512x32xf32>
    %3 = tpu.matmul %1, %2, %cst {dimension_numbers = #tpu.dot_dimension_numbers<[1], [0], [0], [1], [0, 0, 1, 1], [], []>} : vector<512x144xbf16>, vector<144x32xbf16>, vector<512x32xf32> -> vector<512x32xf32>
    %4 = vector.shape_cast %3 : vector<512x32xf32> to vector<2x4x64x32xf32>
    %5 = vector.extract_strided_slice %4 {offsets = [0, 0, 0, 0], sizes = [2, 1, 64, 32], strides = [1, 1, 1, 1]} : vector<2x4x64x32xf32> to vector<2x1x64x32xf32>
    %6 = vector.shape_cast %5 : vector<2x1x64x32xf32> to vector<2x64x32xf32>
    %7 = vector.extract_strided_slice %4 {offsets = [0, 1, 0, 0], sizes = [2, 1, 64, 32], strides = [1, 1, 1, 1]} : vector<2x4x64x32xf32> to vector<2x1x64x32xf32>
    %8 = vector.shape_cast %7 : vector<2x1x64x32xf32> to vector<2x64x32xf32>
    %9 = arith.maximumf %6, %8 : vector<2x64x32xf32>
    %10 = vector.extract_strided_slice %4 {offsets = [0, 2, 0, 0], sizes = [2, 1, 64, 32], strides = [1, 1, 1, 1]} : vector<2x4x64x32xf32> to vector<2x1x64x32xf32>
    %11 = vector.shape_cast %10 : vector<2x1x64x32xf32> to vector<2x64x32xf32>
    %12 = vector.extract_strided_slice %4 {offsets = [0, 3, 0, 0], sizes = [2, 1, 64, 32], strides = [1, 1, 1, 1]} : vector<2x4x64x32xf32> to vector<2x1x64x32xf32>
    %13 = vector.shape_cast %12 : vector<2x1x64x32xf32> to vector<2x64x32xf32>
    %14 = arith.maximumf %11, %13 : vector<2x64x32xf32>
    %15 = arith.maximumf %9, %14 : vector<2x64x32xf32>
    %c0_5 = arith.constant 0 : index
    %c0_6 = arith.constant 0 : index
    %16 = vector.load %arg3[%c0_5, %c0_6] : memref<1x32xf32, #tpu.memory_space<vmem>>, vector<1x32xf32>
    %17 = vector.shape_cast %16 : vector<1x32xf32> to vector<1x1x32xf32>
    %18 = vector.broadcast %17 : vector<1x1x32xf32> to vector<2x64x32xf32>
    %19 = arith.addf %15, %18 : vector<2x64x32xf32>
    %cst_7 = arith.constant 0.000000e+00 : f32
    %20 = vector.broadcast %cst_7 : f32 to vector<2x64x32xf32>
    %21 = arith.maximumf %19, %20 : vector<2x64x32xf32>
    %22 = arith.truncf %21 : vector<2x64x32xf32> to vector<2x64x32xbf16>
    %c0_8 = arith.constant 0 : index
    %c0_9 = arith.constant 0 : index
    %c0_10 = arith.constant 0 : index
    %23 = vector.load %arg4[%c0_8, %c0_9, %c0_10] : memref<2x64x32xbf16, #tpu.memory_space<vmem>>, vector<2x64x32xbf16>
    tpu.vector_store %arg4[%c0_8, %c0_9, %c0_10], %22 {strides = array<i32>} : memref<2x64x32xbf16, #tpu.memory_space<vmem>>, vector<2x64x32xbf16>,
    return
  }
  func.func @transform_0(%arg0: i32) -> (i32, i32, i32, i32) {
    %c0_i32 = arith.constant 0 : i32
    %c0_i32_0 = arith.constant 0 : i32
    %c0_i32_1 = arith.constant 0 : i32
    %c0_i32_2 = arith.constant 0 : i32
    return %arg0, %c0_i32, %c0_i32_0, %c0_i32_1 : i32, i32, i32, i32
  }
  func.func @transform_1(%arg0: i32) -> (i32, i32) {
    %c0_i32 = arith.constant 0 : i32
    %c0_i32_0 = arith.constant 0 : i32
    %c0_i32_1 = arith.constant 0 : i32
    return %c0_i32, %c0_i32_0 : i32, i32
  }
  func.func @transform_2(%arg0: i32) -> (i32, i32) {
    %c0_i32 = arith.constant 0 : i32
    %c0_i32_0 = arith.constant 0 : i32
    %c0_i32_1 = arith.constant 0 : i32
    return %c0_i32, %c0_i32_0 : i32, i32
  }
  func.func @transform_3(%arg0: i32) -> (i32, i32, i32) {
    %c0_i32 = arith.constant 0 : i32
    %c0_i32_0 = arith.constant 0 : i32
    %c0_i32_1 = arith.constant 0 : i32
    return %arg0, %c0_i32, %c0_i32_0 : i32, i32, i32
  }
}

module attributes {stable_mosaic.version = 11 : i64} {
  func.func @_conv_pool_kernel(%arg0: i32, %arg1: memref<2x4x16x288xbf16, #tpu.memory_space<vmem>>, %arg2: memref<288x64xbf16, #tpu.memory_space<vmem>>, %arg3: memref<1x64xf32, #tpu.memory_space<vmem>>, %arg4: memref<2x16x64xbf16, #tpu.memory_space<vmem>>) attributes {dimension_semantics = [#tpu.dimension_semantics<parallel>], iteration_bounds = array<i64: 1>, scalar_prefetch = 0 : i64, scratch_operands = 0 : i64, tpu.core_type = #tpu.core_type<tc>, window_params = [{transform_indices = @transform_0, window_bounds = array<i64: 2, 4, 16, 288>}, {pipeline_mode = #tpu.pipeline_mode<synchronous>, transform_indices = @transform_1, window_bounds = array<i64: 288, 64>}, {pipeline_mode = #tpu.pipeline_mode<synchronous>, transform_indices = @transform_2, window_bounds = array<i64: 1, 64>}, {transform_indices = @transform_3, window_bounds = array<i64: 2, 16, 64>}]} {
    %c0 = arith.constant 0 : index
    %c0_0 = arith.constant 0 : index
    %c0_1 = arith.constant 0 : index
    %c0_2 = arith.constant 0 : index
    %0 = vector.load %arg1[%c0, %c0_0, %c0_1, %c0_2] : memref<2x4x16x288xbf16, #tpu.memory_space<vmem>>, vector<2x4x16x288xbf16>
    %1 = vector.shape_cast %0 : vector<2x4x16x288xbf16> to vector<128x288xbf16>
    %c0_3 = arith.constant 0 : index
    %c0_4 = arith.constant 0 : index
    %2 = vector.load %arg2[%c0_3, %c0_4] : memref<288x64xbf16, #tpu.memory_space<vmem>>, vector<288x64xbf16>
    %cst = arith.constant dense<0.000000e+00> : vector<128x64xf32>
    %3 = tpu.matmul %1, %2, %cst {dimension_numbers = #tpu.dot_dimension_numbers<[1], [0], [0], [1], [0, 0, 1, 1], [], []>} : vector<128x288xbf16>, vector<288x64xbf16>, vector<128x64xf32> -> vector<128x64xf32>
    %4 = vector.shape_cast %3 : vector<128x64xf32> to vector<2x4x16x64xf32>
    %5 = vector.extract_strided_slice %4 {offsets = [0, 0, 0, 0], sizes = [2, 1, 16, 64], strides = [1, 1, 1, 1]} : vector<2x4x16x64xf32> to vector<2x1x16x64xf32>
    %6 = vector.shape_cast %5 : vector<2x1x16x64xf32> to vector<2x16x64xf32>
    %7 = vector.extract_strided_slice %4 {offsets = [0, 1, 0, 0], sizes = [2, 1, 16, 64], strides = [1, 1, 1, 1]} : vector<2x4x16x64xf32> to vector<2x1x16x64xf32>
    %8 = vector.shape_cast %7 : vector<2x1x16x64xf32> to vector<2x16x64xf32>
    %9 = arith.maximumf %6, %8 : vector<2x16x64xf32>
    %10 = vector.extract_strided_slice %4 {offsets = [0, 2, 0, 0], sizes = [2, 1, 16, 64], strides = [1, 1, 1, 1]} : vector<2x4x16x64xf32> to vector<2x1x16x64xf32>
    %11 = vector.shape_cast %10 : vector<2x1x16x64xf32> to vector<2x16x64xf32>
    %12 = vector.extract_strided_slice %4 {offsets = [0, 3, 0, 0], sizes = [2, 1, 16, 64], strides = [1, 1, 1, 1]} : vector<2x4x16x64xf32> to vector<2x1x16x64xf32>
    %13 = vector.shape_cast %12 : vector<2x1x16x64xf32> to vector<2x16x64xf32>
    %14 = arith.maximumf %11, %13 : vector<2x16x64xf32>
    %15 = arith.maximumf %9, %14 : vector<2x16x64xf32>
    %c0_5 = arith.constant 0 : index
    %c0_6 = arith.constant 0 : index
    %16 = vector.load %arg3[%c0_5, %c0_6] : memref<1x64xf32, #tpu.memory_space<vmem>>, vector<1x64xf32>
    %17 = vector.shape_cast %16 : vector<1x64xf32> to vector<1x1x64xf32>
    %18 = vector.broadcast %17 : vector<1x1x64xf32> to vector<2x16x64xf32>
    %19 = arith.addf %15, %18 : vector<2x16x64xf32>
    %cst_7 = arith.constant 0.000000e+00 : f32
    %20 = vector.broadcast %cst_7 : f32 to vector<2x16x64xf32>
    %21 = arith.maximumf %19, %20 : vector<2x16x64xf32>
    %22 = arith.truncf %21 : vector<2x16x64xf32> to vector<2x16x64xbf16>
    %c0_8 = arith.constant 0 : index
    %c0_9 = arith.constant 0 : index
    %c0_10 = arith.constant 0 : index
    %23 = vector.load %arg4[%c0_8, %c0_9, %c0_10] : memref<2x16x64xbf16, #tpu.memory_space<vmem>>, vector<2x16x64xbf16>
    tpu.vector_store %arg4[%c0_8, %c0_9, %c0_10], %22 {strides = array<i32>} : memref<2x16x64xbf16, #tpu.memory_space<vmem>>, vector<2x16x64xbf16>,
    return
  }
  func.func @transform_0(%arg0: i32) -> (i32, i32, i32, i32) {
    %c0_i32 = arith.constant 0 : i32
    %c0_i32_0 = arith.constant 0 : i32
    %c0_i32_1 = arith.constant 0 : i32
    %c0_i32_2 = arith.constant 0 : i32
    return %arg0, %c0_i32, %c0_i32_0, %c0_i32_1 : i32, i32, i32, i32
  }
  func.func @transform_1(%arg0: i32) -> (i32, i32) {
    %c0_i32 = arith.constant 0 : i32
    %c0_i32_0 = arith.constant 0 : i32
    %c0_i32_1 = arith.constant 0 : i32
    return %c0_i32, %c0_i32_0 : i32, i32
  }
  func.func @transform_2(%arg0: i32) -> (i32, i32) {
    %c0_i32 = arith.constant 0 : i32
    %c0_i32_0 = arith.constant 0 : i32
    %c0_i32_1 = arith.constant 0 : i32
    return %c0_i32, %c0_i32_0 : i32, i32
  }
  func.func @transform_3(%arg0: i32) -> (i32, i32, i32) {
    %c0_i32 = arith.constant 0 : i32
    %c0_i32_0 = arith.constant 0 : i32
    %c0_i32_1 = arith.constant 0 : i32
    return %arg0, %c0_i32, %c0_i32_0 : i32, i32, i32
  }
}

module attributes {stable_mosaic.version = 11 : i64} {
  func.func @_mlp_kernel(%arg0: i32, %arg1: memref<2x1024xbf16, #tpu.memory_space<vmem>>, %arg2: memref<1024x512xbf16, #tpu.memory_space<vmem>>, %arg3: memref<1x512xf32, #tpu.memory_space<vmem>>, %arg4: memref<512x128xbf16, #tpu.memory_space<vmem>>, %arg5: memref<1x128xf32, #tpu.memory_space<vmem>>, %arg6: memref<2x128xf32, #tpu.memory_space<vmem>>) attributes {dimension_semantics = [#tpu.dimension_semantics<parallel>], iteration_bounds = array<i64: 1>, scalar_prefetch = 0 : i64, scratch_operands = 0 : i64, tpu.core_type = #tpu.core_type<tc>, window_params = [{transform_indices = @transform_0, window_bounds = array<i64: 2, 1024>}, {pipeline_mode = #tpu.pipeline_mode<synchronous>, transform_indices = @transform_1, window_bounds = array<i64: 1024, 512>}, {pipeline_mode = #tpu.pipeline_mode<synchronous>, transform_indices = @transform_2, window_bounds = array<i64: 1, 512>}, {pipeline_mode = #tpu.pipeline_mode<synchronous>, transform_indices = @transform_3, window_bounds = array<i64: 512, 128>}, {pipeline_mode = #tpu.pipeline_mode<synchronous>, transform_indices = @transform_4, window_bounds = array<i64: 1, 128>}, {transform_indices = @transform_5, window_bounds = array<i64: 2, 128>}]} {
    %c0 = arith.constant 0 : index
    %c0_0 = arith.constant 0 : index
    %0 = vector.load %arg1[%c0, %c0_0] : memref<2x1024xbf16, #tpu.memory_space<vmem>>, vector<2x1024xbf16>
    %c0_1 = arith.constant 0 : index
    %c0_2 = arith.constant 0 : index
    %1 = vector.load %arg2[%c0_1, %c0_2] : memref<1024x512xbf16, #tpu.memory_space<vmem>>, vector<1024x512xbf16>
    %cst = arith.constant dense<0.000000e+00> : vector<2x512xf32>
    %2 = tpu.matmul %0, %1, %cst {dimension_numbers = #tpu.dot_dimension_numbers<[1], [0], [0], [1], [0, 0, 1, 1], [], []>} : vector<2x1024xbf16>, vector<1024x512xbf16>, vector<2x512xf32> -> vector<2x512xf32>
    %c0_3 = arith.constant 0 : index
    %c0_4 = arith.constant 0 : index
    %3 = vector.load %arg3[%c0_3, %c0_4] : memref<1x512xf32, #tpu.memory_space<vmem>>, vector<1x512xf32>
    %4 = vector.broadcast %3 : vector<1x512xf32> to vector<2x512xf32>
    %5 = arith.addf %2, %4 : vector<2x512xf32>
    %cst_5 = arith.constant 0.000000e+00 : f32
    %6 = vector.broadcast %cst_5 : f32 to vector<2x512xf32>
    %7 = arith.maximumf %5, %6 : vector<2x512xf32>
    %8 = arith.truncf %7 : vector<2x512xf32> to vector<2x512xbf16>
    %c0_6 = arith.constant 0 : index
    %c0_7 = arith.constant 0 : index
    %9 = vector.load %arg4[%c0_6, %c0_7] : memref<512x128xbf16, #tpu.memory_space<vmem>>, vector<512x128xbf16>
    %cst_8 = arith.constant dense<0.000000e+00> : vector<2x128xf32>
    %10 = tpu.matmul %8, %9, %cst_8 {dimension_numbers = #tpu.dot_dimension_numbers<[1], [0], [0], [1], [0, 0, 1, 1], [], []>} : vector<2x512xbf16>, vector<512x128xbf16>, vector<2x128xf32> -> vector<2x128xf32>
    %c0_9 = arith.constant 0 : index
    %c0_10 = arith.constant 0 : index
    %11 = vector.load %arg5[%c0_9, %c0_10] : memref<1x128xf32, #tpu.memory_space<vmem>>, vector<1x128xf32>
    %12 = vector.broadcast %11 : vector<1x128xf32> to vector<2x128xf32>
    %13 = arith.addf %10, %12 : vector<2x128xf32>
    %c0_11 = arith.constant 0 : index
    %c0_12 = arith.constant 0 : index
    %14 = vector.load %arg6[%c0_11, %c0_12] : memref<2x128xf32, #tpu.memory_space<vmem>>, vector<2x128xf32>
    tpu.vector_store %arg6[%c0_11, %c0_12], %13 {strides = array<i32>} : memref<2x128xf32, #tpu.memory_space<vmem>>, vector<2x128xf32>,
    return
  }
  func.func @transform_0(%arg0: i32) -> (i32, i32) {
    %c0_i32 = arith.constant 0 : i32
    %c0_i32_0 = arith.constant 0 : i32
    return %arg0, %c0_i32 : i32, i32
  }
  func.func @transform_1(%arg0: i32) -> (i32, i32) {
    %c0_i32 = arith.constant 0 : i32
    %c0_i32_0 = arith.constant 0 : i32
    %c0_i32_1 = arith.constant 0 : i32
    return %c0_i32, %c0_i32_0 : i32, i32
  }
  func.func @transform_2(%arg0: i32) -> (i32, i32) {
    %c0_i32 = arith.constant 0 : i32
    %c0_i32_0 = arith.constant 0 : i32
    %c0_i32_1 = arith.constant 0 : i32
    return %c0_i32, %c0_i32_0 : i32, i32
  }
  func.func @transform_3(%arg0: i32) -> (i32, i32) {
    %c0_i32 = arith.constant 0 : i32
    %c0_i32_0 = arith.constant 0 : i32
    %c0_i32_1 = arith.constant 0 : i32
    return %c0_i32, %c0_i32_0 : i32, i32
  }
  func.func @transform_4(%arg0: i32) -> (i32, i32) {
    %c0_i32 = arith.constant 0 : i32
    %c0_i32_0 = arith.constant 0 : i32
    %c0_i32_1 = arith.constant 0 : i32
    return %c0_i32, %c0_i32_0 : i32, i32
  }
  func.func @transform_5(%arg0: i32) -> (i32, i32) {
    %c0_i32 = arith.constant 0 : i32
    %c0_i32_0 = arith.constant 0 : i32
    return %arg0, %c0_i32 : i32, i32
  }
}

</mosaic_0001>

<bundles_post_ra>
// kernel: net_forward.4
= control target key start
LH: loop header
LB: loop body
LE: loop exit
PB: predicated region body
PF: predicated region fallthrough
CT: control target
= control target key end

     0   :  { %vm927_vm0 = vcmask 261120   ;;  %vm2349_vm1 = vcmask 125952   ;;  %s4456_s1 = inlined_call_operand.vmem [shape: bf16[32,16], index: 1, kind: input, shape index: {}]   ;;  %s4457_s0 = inlined_call_operand.vmem [shape: bf16[2,4,256,32], index: 0, kind: input, shape index: {}]   ;;  %s4458_s2 = inlined_call_operand.vmem [shape: f32[1,16], index: 2, kind: input, shape index: {}]   ;;  %s4459_s3 = inlined_call_operand.vmem [shape: bf16[2,256,16], index: 3, kind: output, shape index: {}]  }
   0x1   :  { %v3195_v0 = vld [vmem:[%s4456_s1 + $0x8] sm:$0xff]  ;;  %v3194_v1 = vld [vmem:[%s4456_s1] sm:$0xff]  ;;  %v3068_v10 = vld [vmem:[%s4457_s0 + $0x10] sm:$0xff] }
   0x2   :  { %1318 = vmatpush.bf16.msra.mxu0 %v3195_v0  ;;  %3196 = vmatpush.bf16.msra.mxu1 %v3195_v0  ;;  %v3066_v2 = vld [vmem:[%s4457_s0] sm:$0xff]  ;;  %v3067_v6 = vld [vmem:[%s4457_s0 + $0x8] sm:$0xff]  ;;  %v3100_v11 = vld [vmem:[%s4457_s0 + $0x110] sm:$0xff] }
   0x3   :  { %3197 = vmatpush.bf16.msra.mxu2 %v3195_v0  ;;  %3198 = vmatpush.bf16.msra.mxu3 %v3195_v0  ;;  %v3098_v3 = vld [vmem:[%s4457_s0 + $0x100] sm:$0xff]  ;;  %v3099_v7 = vld [vmem:[%s4457_s0 + $0x108] sm:$0xff]  ;;  %v3132_v12 = vld [vmem:[%s4457_s0 + $0x210] sm:$0xff] }
   0x4   :  { %v3130_v4 = vld [vmem:[%s4457_s0 + $0x200] sm:$0xff]  ;;  %v3131_v8 = vld [vmem:[%s4457_s0 + $0x208] sm:$0xff]  ;;  %v3164_v13 = vld [vmem:[%s4457_s0 + $0x310] sm:$0xff] }
   0x5   :  { %v3162_v5 = vld [vmem:[%s4457_s0 + $0x300] sm:$0xff]  ;;  %v3163_v9 = vld [vmem:[%s4457_s0 + $0x308] sm:$0xff]  ;;  %v3069_v14 = vld [vmem:[%s4457_s0 + $0x18] sm:$0xff] }
   0x6   :  { %1319 = vmatpush.bf16.msra.mxu0 %v3194_v1  ;;  %3199 = vmatpush.bf16.msra.mxu1 %v3194_v1  ;;  %v3101_v15 = vld [vmem:[%s4457_s0 + $0x118] sm:$0xff]  ;;  %v3070_v18 = vld [vmem:[%s4457_s0 + $0x20] sm:$0xff]  ;;  %v3071_v22 = vld [vmem:[%s4457_s0 + $0x28] sm:$0xff] }
   0x7   :  { %3200 = vmatpush.bf16.msra.mxu2 %v3194_v1  ;;  %3201 = vmatpush.bf16.msra.mxu3 %v3194_v1  ;;  %v3133_v16 = vld [vmem:[%s4457_s0 + $0x218] sm:$0xff]  ;;  %v3102_v19 = vld [vmem:[%s4457_s0 + $0x120] sm:$0xff]  ;;  %v3103_v23 = vld [vmem:[%s4457_s0 + $0x128] sm:$0xff] }
   0x8   :  { %v3165_v17 = vld [vmem:[%s4457_s0 + $0x318] sm:$0xff]  ;;  %v3134_v20 = vld [vmem:[%s4457_s0 + $0x220] sm:$0xff]  ;;  %v3135_v24 = vld [vmem:[%s4457_s0 + $0x228] sm:$0xff] }
   0x9   :  { %2938 = vmatmul.msk.bf16.vlgmr.msra.gmra.mxu0 %vm927_vm0, %v3066_v2  ;;  %2970 = vmatmul.msk.bf16.vlgmr.msra.gmra.mxu1 %vm927_vm0, %v3098_v3  ;;  %v3166_v21 = vld [vmem:[%s4457_s0 + $0x320] sm:$0xff]  ;;  %v3167_v25 = vld [vmem:[%s4457_s0 + $0x328] sm:$0xff]  ;;  %v3072_v26 = vld [vmem:[%s4457_s0 + $0x30] sm:$0xff] }
   0xa   :  { %3002 = vmatmul.msk.bf16.vlgmr.msra.gmra.mxu2 %vm927_vm0, %v3130_v4  ;;  %3034 = vmatmul.msk.bf16.vlgmr.msra.gmra.mxu3 %vm927_vm0, %v3162_v5  ;;  %v3104_v27 = vld [vmem:[%s4457_s0 + $0x130] sm:$0xff]  ;;  %v3073_v30 = vld [vmem:[%s4457_s0 + $0x38] sm:$0xff]  ;;  %v3074_v34 = vld [vmem:[%s4457_s0 + $0x40] sm:$0xff] }
   0xb   :  { %v3136_v28 = vld [vmem:[%s4457_s0 + $0x230] sm:$0xff]  ;;  %v3105_v31 = vld [vmem:[%s4457_s0 + $0x138] sm:$0xff]  ;;  %v3106_v35 = vld [vmem:[%s4457_s0 + $0x140] sm:$0xff] }
   0xc   :  { %v3168_v29 = vld [vmem:[%s4457_s0 + $0x330] sm:$0xff]  ;;  %v3137_v32 = vld [vmem:[%s4457_s0 + $0x238] sm:$0xff]  ;;  %v3138_v38 = vld [vmem:[%s4457_s0 + $0x240] sm:$0xff] }
   0xd   :  { %v3169_v33 = vld [vmem:[%s4457_s0 + $0x338] sm:$0xff]  ;;  %v3170_v39 = vld [vmem:[%s4457_s0 + $0x340] sm:$0xff]  ;;  %v3075_v46 = vld [vmem:[%s4457_s0 + $0x48] sm:$0xff] }
   0xe   :  { %v3107_v47 = vld [vmem:[%s4457_s0 + $0x148] sm:$0xff]  ;;  %v3076_v58 = vld [vmem:[%s4457_s0 + $0x50] sm:$0xff] }
   0xf   :  { %v3139_v50 = vld [vmem:[%s4457_s0 + $0x248] sm:$0xff]  ;;  %v3108_v59 = vld [vmem:[%s4457_s0 + $0x150] sm:$0xff] }
  0x10   :  { %v3171_v51 = vld [vmem:[%s4457_s0 + $0x348] sm:$0xff]  ;;  %v3140_v62 = vld [vmem:[%s4457_s0 + $0x250] sm:$0xff] }
  0x11   :  { %v3172_v63 = vld [vmem:[%s4457_s0 + $0x350] sm:$0xff] }
  0x19   :  { %2939 = vmatmul.msk.bf16.gmra.mxu0 %vm927_vm0, %v3067_v6  ;;  %2971 = vmatmul.msk.bf16.gmra.mxu1 %vm927_vm0, %v3099_v7  ;;  %v3077_v6 = vld [vmem:[%s4457_s0 + $0x58] sm:$0xff] }
  0x1a   :  { %3003 = vmatmul.msk.bf16.gmra.mxu2 %vm927_vm0, %v3131_v8  ;;  %3035 = vmatmul.msk.bf16.gmra.mxu3 %vm927_vm0, %v3163_v9  ;;  %v3109_v7 = vld [vmem:[%s4457_s0 + $0x158] sm:$0xff] }
  0x29   :  { %2940 = vmatmul.msk.bf16.gmra.mxu0 %vm927_vm0, %v3068_v10  ;;  %2972 = vmatmul.msk.bf16.gmra.mxu1 %vm927_vm0, %v3100_v11  ;;  %v3141_v10 = vld [vmem:[%s4457_s0 + $0x258] sm:$0xff] }
  0x2a   :  { %3004 = vmatmul.msk.bf16.gmra.mxu2 %vm927_vm0, %v3132_v12  ;;  %3036 = vmatmul.msk.bf16.gmra.mxu3 %vm927_vm0, %v3164_v13  ;;  %v3173_v11 = vld [vmem:[%s4457_s0 + $0x358] sm:$0xff] }
  0x39   :  { %2941 = vmatmul.msk.bf16.gmra.mxu0 %vm927_vm0, %v3069_v14  ;;  %2973 = vmatmul.msk.bf16.gmra.mxu1 %vm927_vm0, %v3101_v15 }
  0x3a   :  { %3005 = vmatmul.msk.bf16.gmra.mxu2 %vm927_vm0, %v3133_v16  ;;  %3037 = vmatmul.msk.bf16.gmra.mxu3 %vm927_vm0, %v3165_v17 }
  0x49   :  { %2942 = vmatmul.msk.bf16.gmra.mxu0 %vm927_vm0, %v3070_v18  ;;  %2974 = vmatmul.msk.bf16.gmra.mxu1 %vm927_vm0, %v3102_v19  ;;  %v3078_v18 = vld [vmem:[%s4457_s0 + $0x60] sm:$0xff] }
  0x4a   :  { %3006 = vmatmul.msk.bf16.gmra.mxu2 %vm927_vm0, %v3134_v20  ;;  %3038 = vmatmul.msk.bf16.gmra.mxu3 %vm927_vm0, %v3166_v21  ;;  %v3110_v19 = vld [vmem:[%s4457_s0 + $0x160] sm:$0xff] }
  0x59   :  { %2943 = vmatmul.msk.bf16.gmra.mxu0 %vm927_vm0, %v3071_v22  ;;  %2975 = vmatmul.msk.bf16.gmra.mxu1 %vm927_vm0, %v3103_v23  ;;  %v3142_v22 = vld [vmem:[%s4457_s0 + $0x260] sm:$0xff] }
  0x5a   :  { %3007 = vmatmul.msk.bf16.gmra.mxu2 %vm927_vm0, %v3135_v24  ;;  %3039 = vmatmul.msk.bf16.gmra.mxu3 %vm927_vm0, %v3167_v25  ;;  %v3174_v23 = vld [vmem:[%s4457_s0 + $0x360] sm:$0xff] }
  0x69   :  { %2944 = vmatmul.msk.bf16.gmra.mxu0 %vm927_vm0, %v3072_v26  ;;  %2976 = vmatmul.msk.bf16.gmra.mxu1 %vm927_vm0, %v3104_v27 }
  0x6a   :  { %3008 = vmatmul.msk.bf16.gmra.mxu2 %vm927_vm0, %v3136_v28  ;;  %3040 = vmatmul.msk.bf16.gmra.mxu3 %vm927_vm0, %v3168_v29 }
  0x79   :  { %2945 = vmatmul.msk.bf16.gmra.mxu0 %vm927_vm0, %v3073_v30  ;;  %2977 = vmatmul.msk.bf16.gmra.mxu1 %vm927_vm0, %v3105_v31  ;;  %v3079_v30 = vld [vmem:[%s4457_s0 + $0x68] sm:$0xff] }
  0x7a   :  { %3009 = vmatmul.msk.bf16.gmra.mxu2 %vm927_vm0, %v3137_v32  ;;  %3041 = vmatmul.msk.bf16.gmra.mxu3 %vm927_vm0, %v3169_v33  ;;  %v3111_v31 = vld [vmem:[%s4457_s0 + $0x168] sm:$0xff] }
  0x86   :  { %v3364_v36 = vpop.f32.mrf.mxu0  ;;  %v3366_v37 = vpop.f32.mrf.mxu1 }
  0x89   :  { %2946 = vmatmul.msk.bf16.gmra.mxu0 %vm927_vm0, %v3074_v34  ;;  %2978 = vmatmul.msk.bf16.gmra.mxu1 %vm927_vm0, %v3106_v35  ;;  %v3143_v34 = vld [vmem:[%s4457_s0 + $0x268] sm:$0xff] }
  0x8a   :  { %3010 = vmatmul.msk.bf16.gmra.mxu2 %vm927_vm0, %v3138_v38  ;;  %3042 = vmatmul.msk.bf16.gmra.mxu3 %vm927_vm0, %v3170_v39  ;;  %v3175_v35 = vld [vmem:[%s4457_s0 + $0x368] sm:$0xff] }
  0x8d   :  { %v3378_v40 = vpop.f32.mrf.mxu2  ;;  %v3380_v41 = vpop.f32.mrf.mxu3 }
  0x8e   :  { %v3382_v42 = vpop.f32.mrf.mxu0  ;;  %v3384_v43 = vpop.f32.mrf.mxu1 }
  0x95   :  { %v3386_v44 = vpop.f32.mrf.mxu2  ;;  %v3388_v45 = vpop.f32.mrf.mxu3 }
  0x96   :  { %v3396_v48 = vpop.f32.mrf.mxu0  ;;  %v3398_v49 = vpop.f32.mrf.mxu1 }
  0x99   :  { %2947 = vmatmul.msk.bf16.gmra.mxu0 %vm927_vm0, %v3075_v46  ;;  %2979 = vmatmul.msk.bf16.gmra.mxu1 %vm927_vm0, %v3107_v47 }
  0x9a   :  { %3011 = vmatmul.msk.bf16.gmra.mxu2 %vm927_vm0, %v3139_v50  ;;  %3043 = vmatmul.msk.bf16.gmra.mxu3 %vm927_vm0, %v3171_v51 }
  0x9d   :  { %v3410_v52 = vpop.f32.mrf.mxu2  ;;  %v3412_v53 = vpop.f32.mrf.mxu3 }
  0x9e   :  { %v3414_v54 = vpop.f32.mrf.mxu0  ;;  %v3416_v55 = vpop.f32.mrf.mxu1 }
  0xa5   :  { %v3418_v56 = vpop.f32.mrf.mxu2  ;;  %v3420_v57 = vpop.f32.mrf.mxu3 }
  0xa6   :  { %v3428_v60 = vpop.f32.mrf.mxu0  ;;  %v3430_v61 = vpop.f32.mrf.mxu1 }
  0xa9   :  { %2948 = vmatmul.msk.bf16.gmra.mxu0 %vm927_vm0, %v3076_v58  ;;  %2980 = vmatmul.msk.bf16.gmra.mxu1 %vm927_vm0, %v3108_v59  ;;  %v3080_v58 = vld [vmem:[%s4457_s0 + $0x70] sm:$0xff] }
  0xaa   :  { %3012 = vmatmul.msk.bf16.gmra.mxu2 %vm927_vm0, %v3140_v62  ;;  %3044 = vmatmul.msk.bf16.gmra.mxu3 %vm927_vm0, %v3172_v63  ;;  %v3112_v59 = vld [vmem:[%s4457_s0 + $0x170] sm:$0xff] }
  0xad   :  { %v3442_v0 = vpop.f32.mrf.mxu2  ;;  %v3444_v1 = vpop.f32.mrf.mxu3 }
  0xae   :  { %v3446_v2 = vpop.f32.mrf.mxu0  ;;  %v3448_v3 = vpop.f32.mrf.mxu1 }
  0xb5   :  { %v3450_v4 = vpop.f32.mrf.mxu2  ;;  %v3452_v5 = vpop.f32.mrf.mxu3 }
  0xb6   :  { %v3460_v8 = vpop.f32.mrf.mxu0  ;;  %v3462_v9 = vpop.f32.mrf.mxu1 }
  0xb9   :  { %2949 = vmatmul.msk.bf16.gmra.mxu0 %vm927_vm0, %v3077_v6  ;;  %2981 = vmatmul.msk.bf16.gmra.mxu1 %vm927_vm0, %v3109_v7  ;;  %v3144_v6 = vld [vmem:[%s4457_s0 + $0x270] sm:$0xff] }
  0xba   :  { %3013 = vmatmul.msk.bf16.gmra.mxu2 %vm927_vm0, %v3141_v10  ;;  %3045 = vmatmul.msk.bf16.gmra.mxu3 %vm927_vm0, %v3173_v11  ;;  %v3176_v7 = vld [vmem:[%s4457_s0 + $0x370] sm:$0xff] }
  0xbd   :  { %v3474_v12 = vpop.f32.mrf.mxu2  ;;  %v3476_v13 = vpop.f32.mrf.mxu3 }
  0xbe   :  { %v3478_v14 = vpop.f32.mrf.mxu0  ;;  %v3480_v15 = vpop.f32.mrf.mxu1 }
  0xc5   :  { %v3482_v16 = vpop.f32.mrf.mxu2  ;;  %v3484_v17 = vpop.f32.mrf.mxu3 }
  0xc6   :  { %v3492_v20 = vpop.f32.mrf.mxu0  ;;  %v3494_v21 = vpop.f32.mrf.mxu1 }
  0xc9   :  { %2950 = vmatmul.msk.bf16.gmra.mxu0 %vm927_vm0, %v3078_v18  ;;  %2982 = vmatmul.msk.bf16.gmra.mxu1 %vm927_vm0, %v3110_v19 }
  0xca   :  { %3014 = vmatmul.msk.bf16.gmra.mxu2 %vm927_vm0, %v3142_v22  ;;  %3046 = vmatmul.msk.bf16.gmra.mxu3 %vm927_vm0, %v3174_v23 }
  0xcd   :  { %v3506_v24 = vpop.f32.mrf.mxu2  ;;  %v3508_v25 = vpop.f32.mrf.mxu3 }
  0xce   :  { %v3510_v26 = vpop.f32.mrf.mxu0  ;;  %v3512_v27 = vpop.f32.mrf.mxu1 }
  0xd5   :  { %v3514_v28 = vpop.f32.mrf.mxu2  ;;  %v3516_v29 = vpop.f32.mrf.mxu3 }
  0xd6   :  { %v3524_v32 = vpop.f32.mrf.mxu0  ;;  %v3526_v33 = vpop.f32.mrf.mxu1 }
  0xd9   :  { %2951 = vmatmul.msk.bf16.gmra.mxu0 %vm927_vm0, %v3079_v30  ;;  %2983 = vmatmul.msk.bf16.gmra.mxu1 %vm927_vm0, %v3111_v31  ;;  %v3081_v30 = vld [vmem:[%s4457_s0 + $0x78] sm:$0xff] }
  0xda   :  { %3015 = vmatmul.msk.bf16.gmra.mxu2 %vm927_vm0, %v3143_v34  ;;  %3047 = vmatmul.msk.bf16.gmra.mxu3 %vm927_vm0, %v3175_v35  ;;  %v3113_v31 = vld [vmem:[%s4457_s0 + $0x178] sm:$0xff] }
  0xdd   :  { %v3538_v38 = vpop.f32.mrf.mxu2  ;;  %v3540_v39 = vpop.f32.mrf.mxu3 }
  0xde   :  { %v3542_v46 = vpop.f32.mrf.mxu0  ;;  %v3544_v47 = vpop.f32.mrf.mxu1 }
  0xe5   :  { %v3546_v50 = vpop.f32.mrf.mxu2  ;;  %v3548_v51 = vpop.f32.mrf.mxu3 }
  0xe6   :  { %v3556_v62 = vpop.f32.mrf.mxu0  ;;  %v3558_v63 = vpop.f32.mrf.mxu1 }
  0xe9   :  { %2952 = vmatmul.msk.bf16.gmra.mxu0 %vm927_vm0, %v3080_v58  ;;  %2984 = vmatmul.msk.bf16.gmra.mxu1 %vm927_vm0, %v3112_v59  ;;  %v3145_v58 = vld [vmem:[%s4457_s0 + $0x278] sm:$0xff] }
  0xea   :  { %3016 = vmatmul.msk.bf16.gmra.mxu2 %vm927_vm0, %v3144_v6  ;;  %3048 = vmatmul.msk.bf16.gmra.mxu3 %vm927_vm0, %v3176_v7  ;;  %v3177_v59 = vld [vmem:[%s4457_s0 + $0x378] sm:$0xff] }
  0xed   :  { %v3570_v10 = vpop.f32.mrf.mxu2  ;;  %v3572_v11 = vpop.f32.mrf.mxu3 }
  0xee   :  { %4460 = vst [vmem:[#allocation2_spill] sm:$0xff] %v3572_v11  ;;  %v3574_v18 = vpop.f32.mrf.mxu0  ;;  %v3576_v19 = vpop.f32.mrf.mxu1 }
  0xef   :  { %4461 = vst [vmem:[#allocation3_spill] sm:$0xff] %v3574_v18 }
  0xf0   :  { %4462 = vst [vmem:[#allocation4_spill] sm:$0xff] %v3576_v19 }
  0xf5   :  { %v3578_v22 = vpop.f32.mrf.mxu2  ;;  %v3580_v23 = vpop.f32.mrf.mxu3 }
  0xf6   :  { %4463 = vst [vmem:[#allocation5_spill] sm:$0xff] %v3578_v22  ;;  %v3588_v34 = vpop.f32.mrf.mxu0  ;;  %v3590_v35 = vpop.f32.mrf.mxu1 }
  0xf7   :  { %4464 = vst [vmem:[#allocation6_spill] sm:$0xff] %v3580_v23 }
  0xf8   :  { %4465 = vst [vmem:[#allocation7_spill] sm:$0xff] %v3588_v34 }
  0xf9   :  { %4466 = vst [vmem:[#allocation8_spill] sm:$0xff] %v3590_v35  ;;  %2953 = vmatmul.msk.bf16.gmra.mxu0 %vm927_vm0, %v3081_v30  ;;  %2985 = vmatmul.msk.bf16.gmra.mxu1 %vm927_vm0, %v3113_v31  ;;  %v3082_v30 = vld [vmem:[%s4457_s0 + $0x80] sm:$0xff] }
  0xfa   :  { %3017 = vmatmul.msk.bf16.gmra.mxu2 %vm927_vm0, %v3145_v58  ;;  %3049 = vmatmul.msk.bf16.gmra.mxu3 %vm927_vm0, %v3177_v59  ;;  %v3114_v31 = vld [vmem:[%s4457_s0 + $0x180] sm:$0xff] }
  0xfd   :  { %v3602_v6 = vpop.f32.mrf.mxu2  ;;  %v3604_v7 = vpop.f32.mrf.mxu3 }
  0xfe   :  { %4467 = vst [vmem:[#allocation9_spill] sm:$0xff] %v3602_v6  ;;  %v3606_v35 = vpop.f32.mrf.mxu0  ;;  %v3608_v34 = vpop.f32.mrf.mxu1 }
  0xff   :  { %4468 = vst [vmem:[#allocation10_spill] sm:$0xff] %v3604_v7 }
 0x100   :  { %4469 = vst [vmem:[#allocation11_spill] sm:$0xff] %v3606_v35 }
 0x101   :  { %4470 = vst [vmem:[#allocation12_spill] sm:$0xff] %v3608_v34  ;;  %v3146_v34 = vld [vmem:[%s4457_s0 + $0x280] sm:$0xff] }
 0x105   :  { %v3610_v23 = vpop.f32.mrf.mxu2  ;;  %v3612_v22 = vpop.f32.mrf.mxu3 }
 0x106   :  { %4471 = vst [vmem:[#allocation13_spill] sm:$0xff] %v3610_v23  ;;  %v3620_v58 = vpop.f32.mrf.mxu0  ;;  %v3622_v59 = vpop.f32.mrf.mxu1 }
 0x107   :  { %4472 = vst [vmem:[#allocation14_spill] sm:$0xff] %v3612_v22  ;;  %v3178_v22 = vld [vmem:[%s4457_s0 + $0x380] sm:$0xff] }
 0x108   :  { %4473 = vst [vmem:[#allocation15_spill] sm:$0xff] %v3620_v58 }
 0x109   :  { %4474 = vst [vmem:[#allocation16_spill] sm:$0xff] %v3622_v59  ;;  %2954 = vmatmul.msk.bf16.gmra.mxu0 %vm927_vm0, %v3082_v30  ;;  %2986 = vmatmul.msk.bf16.gmra.mxu1 %vm927_vm0, %v3114_v31  ;;  %v3083_v30 = vld [vmem:[%s4457_s0 + $0x88] sm:$0xff] }
 0x10a   :  { %3018 = vmatmul.msk.bf16.gmra.mxu2 %vm927_vm0, %v3146_v34  ;;  %3050 = vmatmul.msk.bf16.gmra.mxu3 %vm927_vm0, %v3178_v22  ;;  %v3115_v22 = vld [vmem:[%s4457_s0 + $0x188] sm:$0xff] }
 0x10d   :  { %v3634_v23 = vpop.f32.mrf.mxu2  ;;  %v3636_v58 = vpop.f32.mrf.mxu3 }
 0x10e   :  { %4475 = vst [vmem:[#allocation17_spill] sm:$0xff] %v3634_v23  ;;  %v3638_v59 = vpop.f32.mrf.mxu0  ;;  %v3640_v35 = vpop.f32.mrf.mxu1 }
 0x10f   :  { %4476 = vst [vmem:[#allocation18_spill] sm:$0xff] %v3636_v58 }
 0x110   :  { %4477 = vst [vmem:[#allocation19_spill] sm:$0xff] %v3638_v59 }
 0x111   :  { %4478 = vst [vmem:[#allocation20_spill] sm:$0xff] %v3640_v35  ;;  %v3147_v35 = vld [vmem:[%s4457_s0 + $0x288] sm:$0xff] }
 0x115   :  { %v3642_v7 = vpop.f32.mrf.mxu2  ;;  %v3644_v6 = vpop.f32.mrf.mxu3 }
 0x116   :  { %4479 = vst [vmem:[#allocation21_spill] sm:$0xff] %v3642_v7  ;;  %v3652_v34 = vpop.f32.mrf.mxu0  ;;  %v3654_v31 = vpop.f32.mrf.mxu1 }
 0x117   :  { %4480 = vst [vmem:[#allocation22_spill] sm:$0xff] %v3644_v6  ;;  %v3179_v6 = vld [vmem:[%s4457_s0 + $0x388] sm:$0xff] }
 0x118   :  { %4481 = vst [vmem:[#allocation23_spill] sm:$0xff] %v3652_v34 }
 0x119   :  { %4482 = vst [vmem:[#allocation24_spill] sm:$0xff] %v3654_v31  ;;  %2955 = vmatmul.msk.bf16.gmra.mxu0 %vm927_vm0, %v3083_v30  ;;  %2987 = vmatmul.msk.bf16.gmra.mxu1 %vm927_vm0, %v3115_v22  ;;  %v3084_v30 = vld [vmem:[%s4457_s0 + $0x90] sm:$0xff] }
 0x11a   :  { %3019 = vmatmul.msk.bf16.gmra.mxu2 %vm927_vm0, %v3147_v35  ;;  %3051 = vmatmul.msk.bf16.gmra.mxu3 %vm927_vm0, %v3179_v6  ;;  %v3116_v35 = vld [vmem:[%s4457_s0 + $0x190] sm:$0xff] }
 0x11d   :  { %v3666_v7 = vpop.f32.mrf.mxu2  ;;  %v3668_v34 = vpop.f32.mrf.mxu3 }
 0x11e   :  { %4483 = vst [vmem:[#allocation25_spill] sm:$0xff] %v3666_v7  ;;  %v3670_v31 = vpop.f32.mrf.mxu0  ;;  %v3672_v59 = vpop.f32.mrf.mxu1 }
 0x11f   :  { %4484 = vst [vmem:[#allocation26_spill] sm:$0xff] %v3668_v34 }
 0x120   :  { %4485 = vst [vmem:[#allocation27_spill] sm:$0xff] %v3670_v31 }
 0x121   :  { %4486 = vst [vmem:[#allocation28_spill] sm:$0xff] %v3672_v59  ;;  %v3148_v59 = vld [vmem:[%s4457_s0 + $0x290] sm:$0xff] }
 0x125   :  { %v3674_v58 = vpop.f32.mrf.mxu2  ;;  %v3676_v23 = vpop.f32.mrf.mxu3 }
 0x126   :  { %4487 = vst [vmem:[#allocation29_spill] sm:$0xff] %v3674_v58  ;;  %v3684_v6 = vpop.f32.mrf.mxu0  ;;  %v3686_v22 = vpop.f32.mrf.mxu1 }
 0x127   :  { %4488 = vst [vmem:[#allocation30_spill] sm:$0xff] %v3676_v23  ;;  %v3180_v23 = vld [vmem:[%s4457_s0 + $0x390] sm:$0xff] }
 0x128   :  { %4489 = vst [vmem:[#allocation31_spill] sm:$0xff] %v3684_v6 }
 0x129   :  { %4490 = vst [vmem:[#allocation32_spill] sm:$0xff] %v3686_v22  ;;  %2956 = vmatmul.msk.bf16.gmra.mxu0 %vm927_vm0, %v3084_v30  ;;  %2988 = vmatmul.msk.bf16.gmra.mxu1 %vm927_vm0, %v3116_v35  ;;  %v3085_v30 = vld [vmem:[%s4457_s0 + $0x98] sm:$0xff] }
 0x12a   :  { %3020 = vmatmul.msk.bf16.gmra.mxu2 %vm927_vm0, %v3148_v59  ;;  %3052 = vmatmul.msk.bf16.gmra.mxu3 %vm927_vm0, %v3180_v23  ;;  %v3117_v23 = vld [vmem:[%s4457_s0 + $0x198] sm:$0xff] }
 0x12d   :  { %v3698_v58 = vpop.f32.mrf.mxu2  ;;  %v3700_v6 = vpop.f32.mrf.mxu3 }
 0x12e   :  { %4491 = vst [vmem:[#allocation33_spill] sm:$0xff] %v3698_v58  ;;  %v3702_v22 = vpop.f32.mrf.mxu0  ;;  %v3704_v31 = vpop.f32.mrf.mxu1 }
 0x12f   :  { %4492 = vst [vmem:[#allocation34_spill] sm:$0xff] %v3700_v6 }
 0x130   :  { %4493 = vst [vmem:[#allocation35_spill] sm:$0xff] %v3702_v22 }
 0x131   :  { %4494 = vst [vmem:[#allocation36_spill] sm:$0xff] %v3704_v31  ;;  %v3149_v31 = vld [vmem:[%s4457_s0 + $0x298] sm:$0xff] }
 0x135   :  { %v3706_v34 = vpop.f32.mrf.mxu2  ;;  %v3708_v7 = vpop.f32.mrf.mxu3 }
 0x136   :  { %4495 = vst [vmem:[#allocation37_spill] sm:$0xff] %v3706_v34  ;;  %v3716_v59 = vpop.f32.mrf.mxu0  ;;  %v3718_v35 = vpop.f32.mrf.mxu1 }
 0x137   :  { %4496 = vst [vmem:[#allocation38_spill] sm:$0xff] %v3708_v7  ;;  %v3181_v7 = vld [vmem:[%s4457_s0 + $0x398] sm:$0xff] }
 0x138   :  { %4497 = vst [vmem:[#allocation39_spill] sm:$0xff] %v3716_v59 }
 0x139   :  { %4498 = vst [vmem:[#allocation40_spill] sm:$0xff] %v3718_v35  ;;  %2957 = vmatmul.msk.bf16.gmra.mxu0 %vm927_vm0, %v3085_v30  ;;  %2989 = vmatmul.msk.bf16.gmra.mxu1 %vm927_vm0, %v3117_v23  ;;  %v3086_v30 = vld [vmem:[%s4457_s0 + $0xa0] sm:$0xff] }
 0x13a   :  { %3021 = vmatmul.msk.bf16.gmra.mxu2 %vm927_vm0, %v3149_v31  ;;  %3053 = vmatmul.msk.bf16.gmra.mxu3 %vm927_vm0, %v3181_v7  ;;  %v3118_v7 = vld [vmem:[%s4457_s0 + $0x1a0] sm:$0xff] }
 0x13d   :  { %v3730_v34 = vpop.f32.mrf.mxu2  ;;  %v3732_v59 = vpop.f32.mrf.mxu3 }
 0x13e   :  { %4499 = vst [vmem:[#allocation41_spill] sm:$0xff] %v3730_v34  ;;  %v3734_v35 = vpop.f32.mrf.mxu0  ;;  %v3736_v22 = vpop.f32.mrf.mxu1 }
 0x13f   :  { %4500 = vst [vmem:[#allocation42_spill] sm:$0xff] %v3732_v59 }
 0x140   :  { %4501 = vst [vmem:[#allocation43_spill] sm:$0xff] %v3734_v35 }
 0x141   :  { %4502 = vst [vmem:[#allocation44_spill] sm:$0xff] %v3736_v22  ;;  %v3150_v22 = vld [vmem:[%s4457_s0 + $0x2a0] sm:$0xff] }
 0x145   :  { %v3738_v6 = vpop.f32.mrf.mxu2  ;;  %v3740_v58 = vpop.f32.mrf.mxu3 }
 0x146   :  { %4503 = vst [vmem:[#allocation45_spill] sm:$0xff] %v3738_v6  ;;  %v3748_v31 = vpop.f32.mrf.mxu0  ;;  %v3750_v23 = vpop.f32.mrf.mxu1 }
 0x147   :  { %4504 = vst [vmem:[#allocation46_spill] sm:$0xff] %v3740_v58  ;;  %v3182_v58 = vld [vmem:[%s4457_s0 + $0x3a0] sm:$0xff] }
 0x148   :  { %4505 = vst [vmem:[#allocation47_spill] sm:$0xff] %v3748_v31 }
 0x149   :  { %4506 = vst [vmem:[#allocation48_spill] sm:$0xff] %v3750_v23  ;;  %2958 = vmatmul.msk.bf16.gmra.mxu0 %vm927_vm0, %v3086_v30  ;;  %2990 = vmatmul.msk.bf16.gmra.mxu1 %vm927_vm0, %v3118_v7  ;;  %v3087_v30 = vld [vmem:[%s4457_s0 + $0xa8] sm:$0xff] }
 0x14a   :  { %3022 = vmatmul.msk.bf16.gmra.mxu2 %vm927_vm0, %v3150_v22  ;;  %3054 = vmatmul.msk.bf16.gmra.mxu3 %vm927_vm0, %v3182_v58  ;;  %v3119_v58 = vld [vmem:[%s4457_s0 + $0x1a8] sm:$0xff] }
 0x14d   :  { %v3762_v6 = vpop.f32.mrf.mxu2  ;;  %v3764_v31 = vpop.f32.mrf.mxu3 }
 0x14e   :  { %4507 = vst [vmem:[#allocation49_spill] sm:$0xff] %v3762_v6  ;;  %v3766_v23 = vpop.f32.mrf.mxu0  ;;  %v3768_v35 = vpop.f32.mrf.mxu1 }
 0x14f   :  { %4508 = vst [vmem:[#allocation50_spill] sm:$0xff] %v3764_v31 }
 0x150   :  { %4509 = vst [vmem:[#allocation51_spill] sm:$0xff] %v3766_v23 }
 0x151   :  { %4510 = vst [vmem:[#allocation52_spill] sm:$0xff] %v3768_v35  ;;  %v3151_v35 = vld [vmem:[%s4457_s0 + $0x2a8] sm:$0xff] }
 0x155   :  { %v3770_v59 = vpop.f32.mrf.mxu2  ;;  %v3772_v34 = vpop.f32.mrf.mxu3 }
 0x156   :  { %4511 = vst [vmem:[#allocation53_spill] sm:$0xff] %v3770_v59  ;;  %v3780_v22 = vpop.f32.mrf.mxu0  ;;  %v3782_v7 = vpop.f32.mrf.mxu1 }
 0x157   :  { %4512 = vst [vmem:[#allocation54_spill] sm:$0xff] %v3772_v34  ;;  %v3183_v34 = vld [vmem:[%s4457_s0 + $0x3a8] sm:$0xff] }
 0x158   :  { %4513 = vst [vmem:[#allocation55_spill] sm:$0xff] %v3780_v22 }
 0x159   :  { %4514 = vst [vmem:[#allocation56_spill] sm:$0xff] %v3782_v7  ;;  %2959 = vmatmul.msk.bf16.gmra.mxu0 %vm927_vm0, %v3087_v30  ;;  %2991 = vmatmul.msk.bf16.gmra.mxu1 %vm927_vm0, %v3119_v58  ;;  %v3088_v30 = vld [vmem:[%s4457_s0 + $0xb0] sm:$0xff] }
 0x15a   :  { %3023 = vmatmul.msk.bf16.gmra.mxu2 %vm927_vm0, %v3151_v35  ;;  %3055 = vmatmul.msk.bf16.gmra.mxu3 %vm927_vm0, %v3183_v34  ;;  %v3120_v34 = vld [vmem:[%s4457_s0 + $0x1b0] sm:$0xff] }
 0x15d   :  { %v3794_v59 = vpop.f32.mrf.mxu2  ;;  %v3796_v22 = vpop.f32.mrf.mxu3 }
 0x15e   :  { %4515 = vst [vmem:[#allocation57_spill] sm:$0xff] %v3794_v59  ;;  %v3798_v7 = vpop.f32.mrf.mxu0  ;;  %v3800_v23 = vpop.f32.mrf.mxu1 }
 0x15f   :  { %4516 = vst [vmem:[#allocation58_spill] sm:$0xff] %v3796_v22 }
 0x160   :  { %4517 = vst [vmem:[#allocation59_spill] sm:$0xff] %v3798_v7 }
 0x161   :  { %4518 = vst [vmem:[#allocation60_spill] sm:$0xff] %v3800_v23  ;;  %v3152_v23 = vld [vmem:[%s4457_s0 + $0x2b0] sm:$0xff] }
 0x165   :  { %v3802_v31 = vpop.f32.mrf.mxu2  ;;  %v3804_v6 = vpop.f32.mrf.mxu3 }
 0x166   :  { %4519 = vst [vmem:[#allocation61_spill] sm:$0xff] %v3802_v31  ;;  %v3812_v35 = vpop.f32.mrf.mxu0  ;;  %v3814_v58 = vpop.f32.mrf.mxu1 }
 0x167   :  { %4520 = vst [vmem:[#allocation62_spill] sm:$0xff] %v3804_v6  ;;  %v3184_v6 = vld [vmem:[%s4457_s0 + $0x3b0] sm:$0xff] }
 0x168   :  { %4521 = vst [vmem:[#allocation63_spill] sm:$0xff] %v3812_v35 }
 0x169   :  { %4522 = vst [vmem:[#allocation64_spill] sm:$0xff] %v3814_v58  ;;  %2960 = vmatmul.msk.bf16.gmra.mxu0 %vm927_vm0, %v3088_v30  ;;  %2992 = vmatmul.msk.bf16.gmra.mxu1 %vm927_vm0, %v3120_v34  ;;  %v3089_v30 = vld [vmem:[%s4457_s0 + $0xb8] sm:$0xff] }
 0x16a   :  { %3024 = vmatmul.msk.bf16.gmra.mxu2 %vm927_vm0, %v3152_v23  ;;  %3056 = vmatmul.msk.bf16.gmra.mxu3 %vm927_vm0, %v3184_v6  ;;  %v3121_v6 = vld [vmem:[%s4457_s0 + $0x1b8] sm:$0xff] }
 0x16d   :  { %v3826_v31 = vpop.f32.mrf.mxu2  ;;  %v3828_v35 = vpop.f32.mrf.mxu3 }
 0x16e   :  { %4523 = vst [vmem:[#allocation65_spill] sm:$0xff] %v3826_v31  ;;  %v3830_v58 = vpop.f32.mrf.mxu0  ;;  %v3832_v7 = vpop.f32.mrf.mxu1 }
 0x16f   :  { %4524 = vst [vmem:[#allocation66_spill] sm:$0xff] %v3828_v35 }
 0x170   :  { %4525 = vst [vmem:[#allocation67_spill] sm:$0xff] %v3830_v58 }
 0x171   :  { %4526 = vst [vmem:[#allocation68_spill] sm:$0xff] %v3832_v7  ;;  %v3153_v7 = vld [vmem:[%s4457_s0 + $0x2b8] sm:$0xff] }
 0x175   :  { %v3834_v22 = vpop.f32.mrf.mxu2  ;;  %v3836_v59 = vpop.f32.mrf.mxu3 }
 0x176   :  { %4527 = vst [vmem:[#allocation69_spill] sm:$0xff] %v3834_v22  ;;  %v3844_v23 = vpop.f32.mrf.mxu0  ;;  %v3846_v34 = vpop.f32.mrf.mxu1 }
 0x177   :  { %4528 = vst [vmem:[#allocation70_spill] sm:$0xff] %v3836_v59  ;;  %v3185_v59 = vld [vmem:[%s4457_s0 + $0x3b8] sm:$0xff] }
 0x178   :  { %4529 = vst [vmem:[#allocation71_spill] sm:$0xff] %v3844_v23 }
 0x179   :  { %4530 = vst [vmem:[#allocation72_spill] sm:$0xff] %v3846_v34  ;;  %2961 = vmatmul.msk.bf16.gmra.mxu0 %vm927_vm0, %v3089_v30  ;;  %2993 = vmatmul.msk.bf16.gmra.mxu1 %vm927_vm0, %v3121_v6  ;;  %v3090_v30 = vld [vmem:[%s4457_s0 + $0xc0] sm:$0xff] }
 0x17a   :  { %3025 = vmatmul.msk.bf16.gmra.mxu2 %vm927_vm0, %v3153_v7  ;;  %3057 = vmatmul.msk.bf16.gmra.mxu3 %vm927_vm0, %v3185_v59  ;;  %v3122_v59 = vld [vmem:[%s4457_s0 + $0x1c0] sm:$0xff] }
 0x17d   :  { %v3858_v22 = vpop.f32.mrf.mxu2  ;;  %v3860_v23 = vpop.f32.mrf.mxu3 }
 0x17e   :  { %4531 = vst [vmem:[#allocation73_spill] sm:$0xff] %v3858_v22  ;;  %v3862_v34 = vpop.f32.mrf.mxu0  ;;  %v3864_v58 = vpop.f32.mrf.mxu1 }
 0x17f   :  { %4532 = vst [vmem:[#allocation74_spill] sm:$0xff] %v3860_v23  ;;  %v3887_v23 = vld [vmem:[%s4458_s2] ss:$0 sm:$0xff] }
 0x180   :  { %4533 = vst [vmem:[#allocation75_spill] sm:$0xff] %v3862_v34  ;;  %v3154_v34 = vld [vmem:[%s4457_s0 + $0x2c0] sm:$0xff] }
 0x181   :  { %4534 = vst [vmem:[#allocation76_spill] sm:$0xff] %v3864_v58 }
 0x185   :  { %v3866_v35 = vpop.f32.mrf.mxu2  ;;  %v3868_v31 = vpop.f32.mrf.mxu3 }
 0x186   :  { %4535 = vst [vmem:[#allocation77_spill] sm:$0xff] %v3866_v35  ;;  %v1401_v7 = vpop.f32.mrf.mxu0  ;;  %v1561_v6 = vpop.f32.mrf.mxu1  ;;  %v3186_v35 = vld [vmem:[%s4457_s0 + $0x3c0] sm:$0xff] }
 0x187   :  { %4536 = vst [vmem:[#allocation78_spill] sm:$0xff] %v3868_v31  ;;  %v1961_v31 = vmax.f32 %v3364_v36, %v1401_v7  ;;  %v2025_v58 = vmax.f32 %v3366_v37, %v1561_v6 }
 0x189   :  { %v2089_v22 = vmax.f32 %v1961_v31, %v2025_v58  ;;  %2962 = vmatmul.msk.bf16.gmra.mxu0 %vm927_vm0, %v3090_v30  ;;  %2994 = vmatmul.msk.bf16.gmra.mxu1 %vm927_vm0, %v3122_v59 }
 0x18a   :  { %3026 = vmatmul.msk.bf16.gmra.mxu2 %vm927_vm0, %v3154_v34  ;;  %3058 = vmatmul.msk.bf16.gmra.mxu3 %vm927_vm0, %v3186_v35 }
 0x18b   :  { %v2157_v19 = vadd.f32 %v3887_v23, %v2089_v22 }
 0x18d   :  { %v2221_v18 = vmax.f32 %v2157_v19, 0.0  ;;  %v1721_v36 = vpop.f32.mrf.mxu2  ;;  %v1881_v7 = vpop.f32.mrf.mxu3 }
 0x18e   :  { %v1993_v37 = vmax.f32 %v3378_v40, %v1721_v36  ;;  %v2057_v6 = vmax.f32 %v3380_v41, %v1881_v7  ;;  %v1403_v11 = vpop.f32.mrf.mxu0  ;;  %v1563_v31 = vpop.f32.mrf.mxu1 }
 0x18f   :  { %v2285_v58 = vpack.c.bf16 %v2221_v18, %v2221_v18  ;;  %v1962_v30 = vmax.f32 %v3382_v42, %v1403_v11  ;;  %v2026_v59 = vmax.f32 %v3384_v43, %v1563_v31  ;;  %v3091_v42 = vld [vmem:[%s4457_s0 + $0xc8] sm:$0xff] }
 0x190   :  { %v2121_v34 = vmax.f32 %v1993_v37, %v2057_v6  ;;  %v3123_v43 = vld [vmem:[%s4457_s0 + $0x1c8] sm:$0xff] }
 0x191   :  { %2350 = vst.msk [vmem:[%s4459_s3] sm:$0xf] %vm2349_vm1, %v2285_v58  ;;  %v2090_v19 = vmax.f32 %v1962_v30, %v2026_v59  ;;  %v3155_v58 = vld [vmem:[%s4457_s0 + $0x2c8] sm:$0xff] }
 0x192   :  { %v2189_v22 = vadd.f32 %v3887_v23, %v2121_v34  ;;  %v3187_v30 = vld [vmem:[%s4457_s0 + $0x3c8] sm:$0xff] }
 0x193   :  { %v2158_v40 = vadd.f32 %v3887_v23, %v2090_v19 }
 0x194   :  { %v2253_v35 = vmax.f32 %v2189_v22, 0.0 }
 0x195   :  { %v2222_v41 = vmax.f32 %v2158_v40, 0.0  ;;  %v1723_v36 = vpop.f32.mrf.mxu2  ;;  %v1883_v7 = vpop.f32.mrf.mxu3 }
 0x196   :  { %v2317_v11 = vpack.c.bf16 %v2253_v35, %v2253_v35  ;;  %v1994_v18 = vmax.f32 %v3386_v44, %v1723_v36  ;;  %v2058_v37 = vmax.f32 %v3388_v45, %v1883_v7  ;;  %v1406_v6 = vpop.f32.mrf.mxu0  ;;  %v1566_v31 = vpop.f32.mrf.mxu1 }
 0x197   :  { %v2286_v59 = vpack.c.bf16 %v2222_v41, %v2222_v41  ;;  %v1963_v34 = vmax.f32 %v3396_v48, %v1406_v6  ;;  %v2027_v19 = vmax.f32 %v3398_v49, %v1566_v31 }
 0x198   :  { %2382 = vst.msk [vmem:[%s4459_s3 + $0x80] sm:$0xf] %vm2349_vm1, %v2317_v11  ;;  %v2122_v44 = vmax.f32 %v1994_v18, %v2058_v37 }
 0x199   :  { %2351 = vst.msk [vmem:[%s4459_s3 + $0x4] sm:$0xf] %vm2349_vm1, %v2286_v59  ;;  %v2091_v45 = vmax.f32 %v1963_v34, %v2027_v19  ;;  %2963 = vmatmul.msk.bf16.gmra.mxu0 %vm927_vm0, %v3091_v42  ;;  %2995 = vmatmul.msk.bf16.gmra.mxu1 %vm927_vm0, %v3123_v43  ;;  %v3092_v34 = vld [vmem:[%s4457_s0 + $0xd0] sm:$0xff] }
 0x19a   :  { %v2190_v48 = vadd.f32 %v3887_v23, %v2122_v44  ;;  %3027 = vmatmul.msk.bf16.gmra.mxu2 %vm927_vm0, %v3155_v58  ;;  %3059 = vmatmul.msk.bf16.gmra.mxu3 %vm927_vm0, %v3187_v30  ;;  %v3124_v19 = vld [vmem:[%s4457_s0 + $0x1d0] sm:$0xff] }
 0x19b   :  { %v2159_v49 = vadd.f32 %v3887_v23, %v2091_v45 }
 0x19c   :  { %v2254_v22 = vmax.f32 %v2190_v48, 0.0 }
 0x19d   :  { %v2223_v40 = vmax.f32 %v2159_v49, 0.0  ;;  %v1726_v35 = vpop.f32.mrf.mxu2  ;;  %v1886_v41 = vpop.f32.mrf.mxu3 }
 0x19e   :  { %v2318_v36 = vpack.c.bf16 %v2254_v22, %v2254_v22  ;;  %v1995_v7 = vmax.f32 %v3410_v52, %v1726_v35  ;;  %v2059_v11 = vmax.f32 %v3412_v53, %v1886_v41  ;;  %v1408_v42 = vpop.f32.mrf.mxu0  ;;  %v1568_v18 = vpop.f32.mrf.mxu1  ;;  %v3188_v35 = vld [vmem:[%s4457_s0 + $0x3d0] sm:$0xff] }
 0x19f   :  { %v2287_v43 = vpack.c.bf16 %v2223_v40, %v2223_v40  ;;  %v1964_v37 = vmax.f32 %v3414_v54, %v1408_v42  ;;  %v2028_v6 = vmax.f32 %v3416_v55, %v1568_v18  ;;  %v3156_v40 = vld [vmem:[%s4457_s0 + $0x2d0] sm:$0xff] }
 0x1a0   :  { %2383 = vst.msk [vmem:[%s4459_s3 + $0x84] sm:$0xf] %vm2349_vm1, %v2318_v36  ;;  %v2123_v31 = vmax.f32 %v1995_v7, %v2059_v11 }
 0x1a1   :  { %2352 = vst.msk [vmem:[%s4459_s3 + $0x8] sm:$0xf] %vm2349_vm1, %v2287_v43  ;;  %v2092_v52 = vmax.f32 %v1964_v37, %v2028_v6 }
 0x1a2   :  { %v2191_v53 = vadd.f32 %v3887_v23, %v2123_v31 }
 0x1a3   :  { %v2160_v58 = vadd.f32 %v3887_v23, %v2092_v52 }
 0x1a4   :  { %v2255_v30 = vmax.f32 %v2191_v53, 0.0 }
 0x1a5   :  { %v2224_v54 = vmax.f32 %v2160_v58, 0.0  ;;  %v1728_v59 = vpop.f32.mrf.mxu2  ;;  %v1888_v55 = vpop.f32.mrf.mxu3 }
 0x1a6   :  { %v2319_v44 = vpack.c.bf16 %v2255_v30, %v2255_v30  ;;  %v1996_v45 = vmax.f32 %v3418_v56, %v1728_v59  ;;  %v2060_v48 = vmax.f32 %v3420_v57, %v1888_v55  ;;  %v1411_v49 = vpop.f32.mrf.mxu0  ;;  %v1571_v22 = vpop.f32.mrf.mxu1 }
 0x1a7   :  { %v2288_v41 = vpack.c.bf16 %v2224_v54, %v2224_v54  ;;  %v1965_v36 = vmax.f32 %v3428_v60, %v1411_v49  ;;  %v2029_v7 = vmax.f32 %v3430_v61, %v1571_v22 }
 0x1a8   :  { %2384 = vst.msk [vmem:[%s4459_s3 + $0x88] sm:$0xf] %vm2349_vm1, %v2319_v44  ;;  %v2124_v56 = vmax.f32 %v1996_v45, %v2060_v48  ;;  %v3093_v44 = vld [vmem:[%s4457_s0 + $0xd8] sm:$0xff] }
 0x1a9   :  { %2353 = vst.msk [vmem:[%s4459_s3 + $0xc] sm:$0xf] %vm2349_vm1, %v2288_v41  ;;  %v2093_v57 = vmax.f32 %v1965_v36, %v2029_v7  ;;  %2964 = vmatmul.msk.bf16.gmra.mxu0 %vm927_vm0, %v3092_v34  ;;  %2996 = vmatmul.msk.bf16.gmra.mxu1 %vm927_vm0, %v3124_v19  ;;  %v3125_v45 = vld [vmem:[%s4457_s0 + $0x1d8] sm:$0xff] }
 0x1aa   :  { %v2192_v60 = vadd.f32 %v3887_v23, %v2124_v56  ;;  %3028 = vmatmul.msk.bf16.gmra.mxu2 %vm927_vm0, %v3156_v40  ;;  %3060 = vmatmul.msk.bf16.gmra.mxu3 %vm927_vm0, %v3188_v35  ;;  %v3157_v41 = vld [vmem:[%s4457_s0 + $0x2d8] sm:$0xff] }
 0x1ab   :  { %v2161_v61 = vadd.f32 %v3887_v23, %v2093_v57  ;;  %v3189_v36 = vld [vmem:[%s4457_s0 + $0x3d8] sm:$0xff] }
 0x1ac   :  { %v2256_v11 = vmax.f32 %v2192_v60, 0.0 }
 0x1ad   :  { %v2225_v42 = vmax.f32 %v2161_v61, 0.0  ;;  %v1731_v18 = vpop.f32.mrf.mxu2  ;;  %v1891_v43 = vpop.f32.mrf.mxu3 }
 0x1ae   :  { %v2320_v37 = vpack.c.bf16 %v2256_v11, %v2256_v11  ;;  %v1997_v6 = vmax.f32 %v3442_v0, %v1731_v18  ;;  %v2061_v31 = vmax.f32 %v3444_v1, %v1891_v43  ;;  %v1413_v52 = vpop.f32.mrf.mxu0  ;;  %v1573_v53 = vpop.f32.mrf.mxu1 }
 0x1af   :  { %v2289_v58 = vpack.c.bf16 %v2225_v42, %v2225_v42  ;;  %v1966_v30 = vmax.f32 %v3446_v2, %v1413_v52  ;;  %v2030_v54 = vmax.f32 %v3448_v3, %v1573_v53 }
 0x1b0   :  { %2385 = vst.msk [vmem:[%s4459_s3 + $0x8c] sm:$0xf] %vm2349_vm1, %v2320_v37  ;;  %v2125_v59 = vmax.f32 %v1997_v6, %v2061_v31 }
 0x1b1   :  { %2354 = vst.msk [vmem:[%s4459_s3 + $0x10] sm:$0xf] %vm2349_vm1, %v2289_v58  ;;  %v2094_v0 = vmax.f32 %v1966_v30, %v2030_v54 }
 0x1b2   :  { %v2193_v1 = vadd.f32 %v3887_v23, %v2125_v59 }
 0x1b3   :  { %v2162_v55 = vadd.f32 %v3887_v23, %v2094_v0 }
 0x1b4   :  { %v2257_v34 = vmax.f32 %v2193_v1, 0.0  ;;  %v3094_v1 = vld [vmem:[%s4457_s0 + $0xe0] sm:$0xff] }
 0x1b5   :  { %v2226_v2 = vmax.f32 %v2162_v55, 0.0  ;;  %v1733_v19 = vpop.f32.mrf.mxu2  ;;  %v1893_v3 = vpop.f32.mrf.mxu3  ;;  %v3126_v55 = vld [vmem:[%s4457_s0 + $0x1e0] sm:$0xff] }
 0x1b6   :  { %v2321_v48 = vpack.c.bf16 %v2257_v34, %v2257_v34  ;;  %v1998_v49 = vmax.f32 %v3450_v4, %v1733_v19  ;;  %v2062_v22 = vmax.f32 %v3452_v5, %v1893_v3  ;;  %v1416_v40 = vpop.f32.mrf.mxu0  ;;  %v1576_v35 = vpop.f32.mrf.mxu1 }
 0x1b7   :  { %v2290_v7 = vpack.c.bf16 %v2226_v2, %v2226_v2  ;;  %v1967_v56 = vmax.f32 %v3460_v8, %v1416_v40  ;;  %v2031_v57 = vmax.f32 %v3462_v9, %v1576_v35 }
 0x1b8   :  { %2386 = vst.msk [vmem:[%s4459_s3 + $0x90] sm:$0xf] %vm2349_vm1, %v2321_v48  ;;  %v2126_v4 = vmax.f32 %v1998_v49, %v2062_v22  ;;  %v3190_v48 = vld [vmem:[%s4457_s0 + $0x3e0] sm:$0xff] }
 0x1b9   :  { %2355 = vst.msk [vmem:[%s4459_s3 + $0x14] sm:$0xf] %vm2349_vm1, %v2290_v7  ;;  %v2095_v5 = vmax.f32 %v1967_v56, %v2031_v57  ;;  %2965 = vmatmul.msk.bf16.gmra.mxu0 %vm927_vm0, %v3093_v44  ;;  %2997 = vmatmul.msk.bf16.gmra.mxu1 %vm927_vm0, %v3125_v45  ;;  %v3158_v45 = vld [vmem:[%s4457_s0 + $0x2e0] sm:$0xff] }
 0x1ba   :  { %v2194_v8 = vadd.f32 %v3887_v23, %v2126_v4  ;;  %3029 = vmatmul.msk.bf16.gmra.mxu2 %vm927_vm0, %v3157_v41  ;;  %3061 = vmatmul.msk.bf16.gmra.mxu3 %vm927_vm0, %v3189_v36 }
 0x1bb   :  { %v2163_v9 = vadd.f32 %v3887_v23, %v2095_v5 }
 0x1bc   :  { %v2258_v60 = vmax.f32 %v2194_v8, 0.0 }
 0x1bd   :  { %v2227_v61 = vmax.f32 %v2163_v9, 0.0  ;;  %v1736_v11 = vpop.f32.mrf.mxu2  ;;  %v1896_v42 = vpop.f32.mrf.mxu3 }
 0x1be   :  { %v2322_v18 = vpack.c.bf16 %v2258_v60, %v2258_v60  ;;  %v1999_v43 = vmax.f32 %v3474_v12, %v1736_v11  ;;  %v2063_v37 = vmax.f32 %v3476_v13, %v1896_v42  ;;  %v1418_v6 = vpop.f32.mrf.mxu0  ;;  %v1578_v31 = vpop.f32.mrf.mxu1 }
 0x1bf   :  { %v2291_v52 = vpack.c.bf16 %v2227_v61, %v2227_v61  ;;  %v1968_v53 = vmax.f32 %v3478_v14, %v1418_v6  ;;  %v2032_v58 = vmax.f32 %v3480_v15, %v1578_v31  ;;  %v3127_v6 = vld [vmem:[%s4457_s0 + $0x1e8] sm:$0xff] }
 0x1c0   :  { %2387 = vst.msk [vmem:[%s4459_s3 + $0x94] sm:$0xf] %vm2349_vm1, %v2322_v18  ;;  %v2127_v30 = vmax.f32 %v1999_v43, %v2063_v37  ;;  %v3095_v37 = vld [vmem:[%s4457_s0 + $0xe8] sm:$0xff] }
 0x1c1   :  { %2356 = vst.msk [vmem:[%s4459_s3 + $0x18] sm:$0xf] %vm2349_vm1, %v2291_v52  ;;  %v2096_v12 = vmax.f32 %v1968_v53, %v2032_v58 }
 0x1c2   :  { %v2195_v13 = vadd.f32 %v3887_v23, %v2127_v30 }
 0x1c3   :  { %v2164_v54 = vadd.f32 %v3887_v23, %v2096_v12  ;;  %v3159_v12 = vld [vmem:[%s4457_s0 + $0x2e8] sm:$0xff] }
 0x1c4   :  { %v2259_v59 = vmax.f32 %v2195_v13, 0.0  ;;  %v3191_v13 = vld [vmem:[%s4457_s0 + $0x3e8] sm:$0xff] }
 0x1c5   :  { %v2228_v14 = vmax.f32 %v2164_v54, 0.0  ;;  %v1738_v0 = vpop.f32.mrf.mxu2  ;;  %v1898_v15 = vpop.f32.mrf.mxu3 }
 0x1c6   :  { %v2323_v34 = vpack.c.bf16 %v2259_v59, %v2259_v59  ;;  %v2000_v2 = vmax.f32 %v3482_v16, %v1738_v0  ;;  %v2064_v19 = vmax.f32 %v3484_v17, %v1898_v15  ;;  %v1421_v3 = vpop.f32.mrf.mxu0  ;;  %v1581_v44 = vpop.f32.mrf.mxu1 }
 0x1c7   :  { %v2292_v49 = vpack.c.bf16 %v2228_v14, %v2228_v14  ;;  %v1969_v22 = vmax.f32 %v3492_v20, %v1421_v3  ;;  %v2033_v40 = vmax.f32 %v3494_v21, %v1581_v44 }
 0x1c8   :  { %2388 = vst.msk [vmem:[%s4459_s3 + $0x98] sm:$0xf] %vm2349_vm1, %v2323_v34  ;;  %v2128_v16 = vmax.f32 %v2000_v2, %v2064_v19 }
 0x1c9   :  { %2357 = vst.msk [vmem:[%s4459_s3 + $0x1c] sm:$0xf] %vm2349_vm1, %v2292_v49  ;;  %v2097_v17 = vmax.f32 %v1969_v22, %v2033_v40  ;;  %2966 = vmatmul.msk.bf16.gmra.mxu0 %vm927_vm0, %v3094_v1  ;;  %2998 = vmatmul.msk.bf16.gmra.mxu1 %vm927_vm0, %v3126_v55 }
 0x1ca   :  { %v2196_v20 = vadd.f32 %v3887_v23, %v2128_v16  ;;  %3030 = vmatmul.msk.bf16.gmra.mxu2 %vm927_vm0, %v3158_v45  ;;  %3062 = vmatmul.msk.bf16.gmra.mxu3 %vm927_vm0, %v3190_v48 }
 0x1cb   :  { %v2165_v21 = vadd.f32 %v3887_v23, %v2097_v17 }
 0x1cc   :  { %v2260_v35 = vmax.f32 %v2196_v20, 0.0  ;;  %v3096_v20 = vld [vmem:[%s4457_s0 + $0xf0] sm:$0xff] }
 0x1cd   :  { %v2229_v41 = vmax.f32 %v2165_v21, 0.0  ;;  %v1741_v36 = vpop.f32.mrf.mxu2  ;;  %v1901_v7 = vpop.f32.mrf.mxu3  ;;  %v3128_v21 = vld [vmem:[%s4457_s0 + $0x1f0] sm:$0xff] }
 0x1ce   :  { %v2324_v56 = vpack.c.bf16 %v2260_v35, %v2260_v35  ;;  %v2001_v57 = vmax.f32 %v3506_v24, %v1741_v36  ;;  %v2065_v4 = vmax.f32 %v3508_v25, %v1901_v7  ;;  %v1423_v5 = vpop.f32.mrf.mxu0  ;;  %v1583_v8 = vpop.f32.mrf.mxu1 }
 0x1cf   :  { %v2293_v9 = vpack.c.bf16 %v2229_v41, %v2229_v41  ;;  %v1970_v60 = vmax.f32 %v3510_v26, %v1423_v5  ;;  %v2034_v61 = vmax.f32 %v3512_v27, %v1583_v8 }
 0x1d0   :  { %2389 = vst.msk [vmem:[%s4459_s3 + $0x9c] sm:$0xf] %vm2349_vm1, %v2324_v56  ;;  %v2129_v11 = vmax.f32 %v2001_v57, %v2065_v4  ;;  %v3160_v57 = vld [vmem:[%s4457_s0 + $0x2f0] sm:$0xff] }
 0x1d1   :  { %2358 = vst.msk [vmem:[%s4459_s3 + $0x20] sm:$0xf] %vm2349_vm1, %v2293_v9  ;;  %v2098_v24 = vmax.f32 %v1970_v60, %v2034_v61  ;;  %v3192_v4 = vld [vmem:[%s4457_s0 + $0x3f0] sm:$0xff] }
 0x1d2   :  { %v2197_v25 = vadd.f32 %v3887_v23, %v2129_v11 }
 0x1d3   :  { %v2166_v42 = vadd.f32 %v3887_v23, %v2098_v24 }
 0x1d4   :  { %v2261_v18 = vmax.f32 %v2197_v25, 0.0 }
 0x1d5   :  { %v2230_v26 = vmax.f32 %v2166_v42, 0.0  ;;  %v1743_v43 = vpop.f32.mrf.mxu2  ;;  %v1903_v27 = vpop.f32.mrf.mxu3 }
 0x1d6   :  { %v2325_v31 = vpack.c.bf16 %v2261_v18, %v2261_v18  ;;  %v2002_v52 = vmax.f32 %v3514_v28, %v1743_v43  ;;  %v2066_v53 = vmax.f32 %v3516_v29, %v1903_v27  ;;  %v1426_v58 = vpop.f32.mrf.mxu0  ;;  %v1586_v30 = vpop.f32.mrf.mxu1  ;;  %v4537_v18 = vld [vmem:[#allocation2_spill] sm:$0xff] }
 0x1d7   :  { %v2294_v54 = vpack.c.bf16 %v2230_v26, %v2230_v26  ;;  %v1971_v59 = vmax.f32 %v3524_v32, %v1426_v58  ;;  %v2035_v14 = vmax.f32 %v3526_v33, %v1586_v30 }
 0x1d8   :  { %2390 = vst.msk [vmem:[%s4459_s3 + $0xa0] sm:$0xf] %vm2349_vm1, %v2325_v31  ;;  %v2130_v28 = vmax.f32 %v2002_v52, %v2066_v53  ;;  %v4539_v52 = vld [vmem:[#allocation4_spill] sm:$0xff] }
 0x1d9   :  { %2359 = vst.msk [vmem:[%s4459_s3 + $0x24] sm:$0xf] %vm2349_vm1, %v2294_v54  ;;  %v2099_v29 = vmax.f32 %v1971_v59, %v2035_v14  ;;  %2967 = vmatmul.msk.bf16.gmra.mxu0 %vm927_vm0, %v3095_v37  ;;  %2999 = vmatmul.msk.bf16.gmra.mxu1 %vm927_vm0, %v3127_v6  ;;  %v4538_v6 = vld [vmem:[#allocation3_spill] sm:$0xff] }
 0x1da   :  { %v2198_v32 = vadd.f32 %v3887_v23, %v2130_v28  ;;  %3031 = vmatmul.msk.bf16.gmra.mxu2 %vm927_vm0, %v3159_v12  ;;  %3063 = vmatmul.msk.bf16.gmra.mxu3 %vm927_vm0, %v3191_v13  ;;  %v3097_v28 = vld [vmem:[%s4457_s0 + $0xf8] sm:$0xff] }
 0x1db   :  { %v2167_v33 = vadd.f32 %v3887_v23, %v2099_v29  ;;  %v3129_v29 = vld [vmem:[%s4457_s0 + $0x1f8] sm:$0xff] }
 0x1dc   :  { %v2262_v0 = vmax.f32 %v2198_v32, 0.0 }
 0x1dd   :  { %v2231_v15 = vmax.f32 %v2167_v33, 0.0  ;;  %v1746_v1 = vpop.f32.mrf.mxu2  ;;  %v1906_v55 = vpop.f32.mrf.mxu3  ;;  %v4540_v33 = vld [vmem:[#allocation5_spill] sm:$0xff] }
 0x1de   :  { %v2326_v34 = vpack.c.bf16 %v2262_v0, %v2262_v0  ;;  %v2003_v2 = vmax.f32 %v3538_v38, %v1746_v1  ;;  %v2067_v19 = vmax.f32 %v3540_v39, %v1906_v55  ;;  %v1428_v3 = vpop.f32.mrf.mxu0  ;;  %v1588_v44 = vpop.f32.mrf.mxu1 }
 0x1df   :  { %v2295_v45 = vpack.c.bf16 %v2231_v15, %v2231_v15  ;;  %v1972_v48 = vmax.f32 %v3542_v46, %v1428_v3  ;;  %v2036_v49 = vmax.f32 %v3544_v47, %v1588_v44  ;;  %v4541_v15 = vld [vmem:[#allocation6_spill] sm:$0xff]  ;;  %v4542_v44 = vld [vmem:[#allocation7_spill] sm:$0xff] }
 0x1e0   :  { %2391 = vst.msk [vmem:[%s4459_s3 + $0xa4] sm:$0xf] %vm2349_vm1, %v2326_v34  ;;  %v2131_v22 = vmax.f32 %v2003_v2, %v2067_v19  ;;  %v3161_v2 = vld [vmem:[%s4457_s0 + $0x2f8] sm:$0xff] }
 0x1e1   :  { %2360 = vst.msk [vmem:[%s4459_s3 + $0x28] sm:$0xf] %vm2349_vm1, %v2295_v45  ;;  %v2100_v38 = vmax.f32 %v1972_v48, %v2036_v49  ;;  %v3193_v19 = vld [vmem:[%s4457_s0 + $0x3f8] sm:$0xff]  ;;  %v4543_v48 = vld [vmem:[#allocation8_spill] sm:$0xff] }
 0x1e2   :  { %v2199_v39 = vadd.f32 %v3887_v23, %v2131_v22 }
 0x1e3   :  { %v2168_v40 = vadd.f32 %v3887_v23, %v2100_v38 }
 0x1e4   :  { %v2263_v16 = vmax.f32 %v2199_v39, 0.0 }
 0x1e5   :  { %v2232_v46 = vmax.f32 %v2168_v40, 0.0  ;;  %v1748_v17 = vpop.f32.mrf.mxu2  ;;  %v1908_v47 = vpop.f32.mrf.mxu3 }
 0x1e6   :  { %v2327_v35 = vpack.c.bf16 %v2263_v16, %v2263_v16  ;;  %v2004_v41 = vmax.f32 %v3546_v50, %v1748_v17  ;;  %v2068_v36 = vmax.f32 %v3548_v51, %v1908_v47  ;;  %v1431_v7 = vpop.f32.mrf.mxu0  ;;  %v1591_v56 = vpop.f32.mrf.mxu1 }
 0x1e7   :  { %v2296_v5 = vpack.c.bf16 %v2232_v46, %v2232_v46  ;;  %v1973_v8 = vmax.f32 %v3556_v62, %v1431_v7  ;;  %v2037_v9 = vmax.f32 %v3558_v63, %v1591_v56 }
 0x1e8   :  { %2392 = vst.msk [vmem:[%s4459_s3 + $0xa8] sm:$0xf] %vm2349_vm1, %v2327_v35  ;;  %v2132_v50 = vmax.f32 %v2004_v41, %v2068_v36  ;;  %v4545_v41 = vld [vmem:[#allocation10_spill] sm:$0xff] }
 0x1e9   :  { %2361 = vst.msk [vmem:[%s4459_s3 + $0x2c] sm:$0xf] %vm2349_vm1, %v2296_v5  ;;  %v2101_v51 = vmax.f32 %v1973_v8, %v2037_v9  ;;  %2968 = vmatmul.msk.bf16.gmra.mxu0 %vm927_vm0, %v3096_v20  ;;  %3000 = vmatmul.msk.bf16.gmra.mxu1 %vm927_vm0, %v3128_v21  ;;  %v4544_v21 = vld [vmem:[#allocation9_spill] sm:$0xff]  ;;  %v4547_v8 = vld [vmem:[#allocation12_spill] sm:$0xff] }
 0x1ea   :  { %v2200_v62 = vadd.f32 %v3887_v23, %v2132_v50  ;;  %3032 = vmatmul.msk.bf16.gmra.mxu2 %vm927_vm0, %v3160_v57  ;;  %3064 = vmatmul.msk.bf16.gmra.mxu3 %vm927_vm0, %v3192_v4  ;;  %v4546_v4 = vld [vmem:[#allocation11_spill] sm:$0xff] }
 0x1eb   :  { %v2169_v63 = vadd.f32 %v3887_v23, %v2101_v51 }
 0x1ec   :  { %v2264_v60 = vmax.f32 %v2200_v62, 0.0 }
 0x1ed   :  { %v2233_v61 = vmax.f32 %v2169_v63, 0.0  ;;  %v1751_v11 = vpop.f32.mrf.mxu2  ;;  %v1911_v24 = vpop.f32.mrf.mxu3 }
 0x1ee   :  { %v2328_v25 = vpack.c.bf16 %v2264_v60, %v2264_v60  ;;  %v2005_v42 = vmax.f32 %v3570_v10, %v1751_v11  ;;  %v2069_v26 = vmax.f32 %v4537_v18, %v1911_v24  ;;  %v1433_v43 = vpop.f32.mrf.mxu0  ;;  %v1593_v27 = vpop.f32.mrf.mxu1 }
 0x1ef   :  { %v2297_v37 = vpack.c.bf16 %v2233_v61, %v2233_v61  ;;  %v1974_v31 = vmax.f32 %v4538_v6, %v1433_v43  ;;  %v2038_v53 = vmax.f32 %v4539_v52, %v1593_v27 }
 0x1f0   :  { %2393 = vst.msk [vmem:[%s4459_s3 + $0xac] sm:$0xf] %vm2349_vm1, %v2328_v25  ;;  %v2133_v58 = vmax.f32 %v2005_v42, %v2069_v26  ;;  %v4548_v42 = vld [vmem:[#allocation13_spill] sm:$0xff]  ;;  %v4549_v26 = vld [vmem:[#allocation14_spill] sm:$0xff] }
 0x1f1   :  { %2362 = vst.msk [vmem:[%s4459_s3 + $0x30] sm:$0xf] %vm2349_vm1, %v2297_v37  ;;  %v2102_v10 = vmax.f32 %v1974_v31, %v2038_v53  ;;  %v4550_v31 = vld [vmem:[#allocation15_spill] sm:$0xff]  ;;  %v4551_v53 = vld [vmem:[#allocation16_spill] sm:$0xff] }
 0x1f2   :  { %v2201_v30 = vadd.f32 %v3887_v23, %v2133_v58 }
 0x1f3   :  { %v2170_v12 = vadd.f32 %v3887_v23, %v2102_v10 }
 0x1f4   :  { %v2265_v13 = vmax.f32 %v2201_v30, 0.0 }
 0x1f5   :  { %v2234_v54 = vmax.f32 %v2170_v12, 0.0  ;;  %v1753_v59 = vpop.f32.mrf.mxu2  ;;  %v1913_v14 = vpop.f32.mrf.mxu3 }
 0x1f6   :  { %v2329_v32 = vpack.c.bf16 %v2265_v13, %v2265_v13  ;;  %v2006_v0 = vmax.f32 %v4540_v33, %v1753_v59  ;;  %v2070_v1 = vmax.f32 %v4541_v15, %v1913_v14  ;;  %v1436_v55 = vpop.f32.mrf.mxu0  ;;  %v1596_v34 = vpop.f32.mrf.mxu1 }
 0x1f7   :  { %v2298_v3 = vpack.c.bf16 %v2234_v54, %v2234_v54  ;;  %v1975_v45 = vmax.f32 %v4542_v44, %v1436_v55  ;;  %v2039_v49 = vmax.f32 %v4543_v48, %v1596_v34 }
 0x1f8   :  { %2394 = vst.msk [vmem:[%s4459_s3 + $0xb0] sm:$0xf] %vm2349_vm1, %v2329_v32  ;;  %v2134_v22 = vmax.f32 %v2006_v0, %v2070_v1  ;;  %v4552_v32 = vld [vmem:[#allocation17_spill] sm:$0xff]  ;;  %v4553_v0 = vld [vmem:[#allocation18_spill] sm:$0xff] }
 0x1f9   :  { %2363 = vst.msk [vmem:[%s4459_s3 + $0x34] sm:$0xf] %vm2349_vm1, %v2298_v3  ;;  %v2103_v38 = vmax.f32 %v1975_v45, %v2039_v49  ;;  %2969 = vmatmul.msk.bf16.gmra.mxu0 %vm927_vm0, %v3097_v28  ;;  %3001 = vmatmul.msk.bf16.gmra.mxu1 %vm927_vm0, %v3129_v29  ;;  %v4555_v3 = vld [vmem:[#allocation20_spill] sm:$0xff] }
 0x1fa   :  { %v2202_v39 = vadd.f32 %v3887_v23, %v2134_v22  ;;  %3033 = vmatmul.msk.bf16.gmra.mxu2 %vm927_vm0, %v3161_v2  ;;  %3065 = vmatmul.msk.bf16.gmra.mxu3 %vm927_vm0, %v3193_v19  ;;  %v4554_v2 = vld [vmem:[#allocation19_spill] sm:$0xff] }
 0x1fb   :  { %v2171_v40 = vadd.f32 %v3887_v23, %v2103_v38 }
 0x1fc   :  { %v2266_v16 = vmax.f32 %v2202_v39, 0.0 }
 0x1fd   :  { %v2235_v46 = vmax.f32 %v2171_v40, 0.0  ;;  %v1756_v17 = vpop.f32.mrf.mxu2  ;;  %v1916_v47 = vpop.f32.mrf.mxu3 }
 0x1fe   :  { %v2330_v20 = vpack.c.bf16 %v2266_v16, %v2266_v16  ;;  %v2007_v35 = vmax.f32 %v4544_v21, %v1756_v17  ;;  %v2071_v36 = vmax.f32 %v4545_v41, %v1916_v47  ;;  %v1438_v7 = vpop.f32.mrf.mxu0  ;;  %v1598_v56 = vpop.f32.mrf.mxu1  ;;  %v4556_v17 = vld [vmem:[#allocation21_spill] sm:$0xff] }
 0x1ff   :  { %v2299_v57 = vpack.c.bf16 %v2235_v46, %v2235_v46  ;;  %v1976_v5 = vmax.f32 %v4546_v4, %v1438_v7  ;;  %v2040_v9 = vmax.f32 %v4547_v8, %v1598_v56  ;;  %v4558_v7 = vld [vmem:[#allocation23_spill] sm:$0xff] }
 0x200   :  { %2395 = vst.msk [vmem:[%s4459_s3 + $0xb4] sm:$0xf] %vm2349_vm1, %v2330_v20  ;;  %v2135_v50 = vmax.f32 %v2007_v35, %v2071_v36  ;;  %v4557_v20 = vld [vmem:[#allocation22_spill] sm:$0xff] }
 0x201   :  { %2364 = vst.msk [vmem:[%s4459_s3 + $0x38] sm:$0xf] %vm2349_vm1, %v2299_v57  ;;  %v2104_v51 = vmax.f32 %v1976_v5, %v2040_v9  ;;  %v4559_v57 = vld [vmem:[#allocation24_spill] sm:$0xff] }
 0x202   :  { %v2203_v62 = vadd.f32 %v3887_v23, %v2135_v50 }
 0x203   :  { %v2172_v63 = vadd.f32 %v3887_v23, %v2104_v51 }
 0x204   :  { %v2267_v60 = vmax.f32 %v2203_v62, 0.0 }
 0x205   :  { %v2236_v61 = vmax.f32 %v2172_v63, 0.0  ;;  %v1758_v11 = vpop.f32.mrf.mxu2  ;;  %v1918_v24 = vpop.f32.mrf.mxu3 }
 0x206   :  { %v2331_v25 = vpack.c.bf16 %v2267_v60, %v2267_v60  ;;  %v2008_v18 = vmax.f32 %v4548_v42, %v1758_v11  ;;  %v2072_v43 = vmax.f32 %v4549_v26, %v1918_v24  ;;  %v1441_v27 = vpop.f32.mrf.mxu0  ;;  %v1601_v37 = vpop.f32.mrf.mxu1  ;;  %v4560_v11 = vld [vmem:[#allocation25_spill] sm:$0xff] }
 0x207   :  { %v2300_v6 = vpack.c.bf16 %v2236_v61, %v2236_v61  ;;  %v1977_v52 = vmax.f32 %v4550_v31, %v1441_v27  ;;  %v2041_v58 = vmax.f32 %v4551_v53, %v1601_v37  ;;  %v4562_v27 = vld [vmem:[#allocation27_spill] sm:$0xff] }
 0x208   :  { %2396 = vst.msk [vmem:[%s4459_s3 + $0xb8] sm:$0xf] %vm2349_vm1, %v2331_v25  ;;  %v2136_v10 = vmax.f32 %v2008_v18, %v2072_v43  ;;  %v4561_v25 = vld [vmem:[#allocation26_spill] sm:$0xff] }
 0x209   :  { %2365 = vst.msk [vmem:[%s4459_s3 + $0x3c] sm:$0xf] %vm2349_vm1, %v2300_v6  ;;  %v2105_v30 = vmax.f32 %v1977_v52, %v2041_v58  ;;  %v4563_v6 = vld [vmem:[#allocation28_spill] sm:$0xff] }
 0x20a   :  { %v2204_v12 = vadd.f32 %v3887_v23, %v2136_v10 }
 0x20b   :  { %v2173_v13 = vadd.f32 %v3887_v23, %v2105_v30 }
 0x20c   :  { %v2268_v54 = vmax.f32 %v2204_v12, 0.0 }
 0x20d   :  { %v2237_v59 = vmax.f32 %v2173_v13, 0.0  ;;  %v1761_v14 = vpop.f32.mrf.mxu2  ;;  %v1921_v28 = vpop.f32.mrf.mxu3 }
 0x20e   :  { %v2332_v29 = vpack.c.bf16 %v2268_v54, %v2268_v54  ;;  %v2009_v33 = vmax.f32 %v4552_v32, %v1761_v14  ;;  %v2073_v15 = vmax.f32 %v4553_v0, %v1921_v28  ;;  %v1443_v1 = vpop.f32.mrf.mxu0  ;;  %v1603_v55 = vpop.f32.mrf.mxu1  ;;  %v4564_v14 = vld [vmem:[#allocation29_spill] sm:$0xff] }
 0x20f   :  { %v2301_v34 = vpack.c.bf16 %v2237_v59, %v2237_v59  ;;  %v1978_v19 = vmax.f32 %v4554_v2, %v1443_v1  ;;  %v2042_v44 = vmax.f32 %v4555_v3, %v1603_v55  ;;  %v4566_v1 = vld [vmem:[#allocation31_spill] sm:$0xff] }
 0x210   :  { %2397 = vst.msk [vmem:[%s4459_s3 + $0xbc] sm:$0xf] %vm2349_vm1, %v2332_v29  ;;  %v2137_v45 = vmax.f32 %v2009_v33, %v2073_v15  ;;  %v4565_v29 = vld [vmem:[#allocation30_spill] sm:$0xff] }
 0x211   :  { %2366 = vst.msk [vmem:[%s4459_s3 + $0x40] sm:$0xf] %vm2349_vm1, %v2301_v34  ;;  %v2106_v48 = vmax.f32 %v1978_v19, %v2042_v44  ;;  %v4567_v34 = vld [vmem:[#allocation32_spill] sm:$0xff] }
 0x212   :  { %v2205_v49 = vadd.f32 %v3887_v23, %v2137_v45 }
 0x213   :  { %v2174_v22 = vadd.f32 %v3887_v23, %v2106_v48 }
 0x214   :  { %v2269_v38 = vmax.f32 %v2205_v49, 0.0 }
 0x215   :  { %v2238_v39 = vmax.f32 %v2174_v22, 0.0  ;;  %v1763_v40 = vpop.f32.mrf.mxu2  ;;  %v1923_v16 = vpop.f32.mrf.mxu3 }
 0x216   :  { %v2333_v46 = vpack.c.bf16 %v2269_v38, %v2269_v38  ;;  %v2010_v47 = vmax.f32 %v4556_v17, %v1763_v40  ;;  %v2074_v21 = vmax.f32 %v4557_v20, %v1923_v16  ;;  %v1446_v35 = vpop.f32.mrf.mxu0  ;;  %v1606_v41 = vpop.f32.mrf.mxu1  ;;  %v4568_v40 = vld [vmem:[#allocation33_spill] sm:$0xff] }
 0x217   :  { %v2302_v36 = vpack.c.bf16 %v2238_v39, %v2238_v39  ;;  %v1979_v56 = vmax.f32 %v4558_v7, %v1446_v35  ;;  %v2043_v4 = vmax.f32 %v4559_v57, %v1606_v41  ;;  %v4570_v35 = vld [vmem:[#allocation35_spill] sm:$0xff] }
 0x218   :  { %2398 = vst.msk [vmem:[%s4459_s3 + $0xc0] sm:$0xf] %vm2349_vm1, %v2333_v46  ;;  %v2138_v5 = vmax.f32 %v2010_v47, %v2074_v21  ;;  %v4569_v46 = vld [vmem:[#allocation34_spill] sm:$0xff] }
 0x219   :  { %2367 = vst.msk [vmem:[%s4459_s3 + $0x44] sm:$0xf] %vm2349_vm1, %v2302_v36  ;;  %v2107_v8 = vmax.f32 %v1979_v56, %v2043_v4  ;;  %v4571_v36 = vld [vmem:[#allocation36_spill] sm:$0xff] }
 0x21a   :  { %v2206_v9 = vadd.f32 %v3887_v23, %v2138_v5 }
 0x21b   :  { %v2175_v50 = vadd.f32 %v3887_v23, %v2107_v8 }
 0x21c   :  { %v2270_v51 = vmax.f32 %v2206_v9, 0.0 }
 0x21d   :  { %v2239_v62 = vmax.f32 %v2175_v50, 0.0  ;;  %v1766_v63 = vpop.f32.mrf.mxu2  ;;  %v1926_v60 = vpop.f32.mrf.mxu3 }
 0x21e   :  { %v2334_v61 = vpack.c.bf16 %v2270_v51, %v2270_v51  ;;  %v2011_v24 = vmax.f32 %v4560_v11, %v1766_v63  ;;  %v2075_v42 = vmax.f32 %v4561_v25, %v1926_v60  ;;  %v1448_v18 = vpop.f32.mrf.mxu0  ;;  %v1608_v26 = vpop.f32.mrf.mxu1  ;;  %v4572_v63 = vld [vmem:[#allocation37_spill] sm:$0xff] }
 0x21f   :  { %v2303_v43 = vpack.c.bf16 %v2239_v62, %v2239_v62  ;;  %v1980_v37 = vmax.f32 %v4562_v27, %v1448_v18  ;;  %v2044_v31 = vmax.f32 %v4563_v6, %v1608_v26  ;;  %v4574_v18 = vld [vmem:[#allocation39_spill] sm:$0xff] }
 0x220   :  { %2399 = vst.msk [vmem:[%s4459_s3 + $0xc4] sm:$0xf] %vm2349_vm1, %v2334_v61  ;;  %v2139_v52 = vmax.f32 %v2011_v24, %v2075_v42  ;;  %v4573_v61 = vld [vmem:[#allocation38_spill] sm:$0xff] }
 0x221   :  { %2368 = vst.msk [vmem:[%s4459_s3 + $0x48] sm:$0xf] %vm2349_vm1, %v2303_v43  ;;  %v2108_v53 = vmax.f32 %v1980_v37, %v2044_v31  ;;  %v4575_v43 = vld [vmem:[#allocation40_spill] sm:$0xff] }
 0x222   :  { %v2207_v58 = vadd.f32 %v3887_v23, %v2139_v52 }
 0x223   :  { %v2176_v10 = vadd.f32 %v3887_v23, %v2108_v53 }
 0x224   :  { %v2271_v30 = vmax.f32 %v2207_v58, 0.0 }
 0x225   :  { %v2240_v12 = vmax.f32 %v2176_v10, 0.0  ;;  %v1768_v13 = vpop.f32.mrf.mxu2  ;;  %v1928_v54 = vpop.f32.mrf.mxu3 }
 0x226   :  { %v2335_v59 = vpack.c.bf16 %v2271_v30, %v2271_v30  ;;  %v2012_v28 = vmax.f32 %v4564_v14, %v1768_v13  ;;  %v2076_v32 = vmax.f32 %v4565_v29, %v1928_v54  ;;  %v1451_v33 = vpop.f32.mrf.mxu0  ;;  %v1611_v0 = vpop.f32.mrf.mxu1  ;;  %v4576_v13 = vld [vmem:[#allocation41_spill] sm:$0xff] }
 0x227   :  { %v2304_v15 = vpack.c.bf16 %v2240_v12, %v2240_v12  ;;  %v1981_v55 = vmax.f32 %v4566_v1, %v1451_v33  ;;  %v2045_v2 = vmax.f32 %v4567_v34, %v1611_v0  ;;  %v4578_v33 = vld [vmem:[#allocation43_spill] sm:$0xff] }
 0x228   :  { %2400 = vst.msk [vmem:[%s4459_s3 + $0xc8] sm:$0xf] %vm2349_vm1, %v2335_v59  ;;  %v2140_v19 = vmax.f32 %v2012_v28, %v2076_v32  ;;  %v4577_v59 = vld [vmem:[#allocation42_spill] sm:$0xff] }
 0x229   :  { %2369 = vst.msk [vmem:[%s4459_s3 + $0x4c] sm:$0xf] %vm2349_vm1, %v2304_v15  ;;  %v2109_v3 = vmax.f32 %v1981_v55, %v2045_v2  ;;  %v4579_v15 = vld [vmem:[#allocation44_spill] sm:$0xff] }
 0x22a   :  { %v2208_v44 = vadd.f32 %v3887_v23, %v2140_v19 }
 0x22b   :  { %v2177_v45 = vadd.f32 %v3887_v23, %v2109_v3 }
 0x22c   :  { %v2272_v48 = vmax.f32 %v2208_v44, 0.0 }
 0x22d   :  { %v2241_v49 = vmax.f32 %v2177_v45, 0.0  ;;  %v1771_v22 = vpop.f32.mrf.mxu2  ;;  %v1931_v38 = vpop.f32.mrf.mxu3 }
 0x22e   :  { %v2336_v39 = vpack.c.bf16 %v2272_v48, %v2272_v48  ;;  %v2013_v16 = vmax.f32 %v4568_v40, %v1771_v22  ;;  %v2077_v17 = vmax.f32 %v4569_v46, %v1931_v38  ;;  %v1453_v47 = vpop.f32.mrf.mxu0  ;;  %v1613_v20 = vpop.f32.mrf.mxu1  ;;  %v4580_v22 = vld [vmem:[#allocation45_spill] sm:$0xff] }
 0x22f   :  { %v2305_v21 = vpack.c.bf16 %v2241_v49, %v2241_v49  ;;  %v1982_v41 = vmax.f32 %v4570_v35, %v1453_v47  ;;  %v2046_v7 = vmax.f32 %v4571_v36, %v1613_v20  ;;  %v4582_v47 = vld [vmem:[#allocation47_spill] sm:$0xff] }
 0x230   :  { %2401 = vst.msk [vmem:[%s4459_s3 + $0xcc] sm:$0xf] %vm2349_vm1, %v2336_v39  ;;  %v2141_v56 = vmax.f32 %v2013_v16, %v2077_v17  ;;  %v4581_v39 = vld [vmem:[#allocation46_spill] sm:$0xff] }
 0x231   :  { %2370 = vst.msk [vmem:[%s4459_s3 + $0x50] sm:$0xf] %vm2349_vm1, %v2305_v21  ;;  %v2110_v57 = vmax.f32 %v1982_v41, %v2046_v7  ;;  %v4583_v21 = vld [vmem:[#allocation48_spill] sm:$0xff] }
 0x232   :  { %v2209_v4 = vadd.f32 %v3887_v23, %v2141_v56 }
 0x233   :  { %v2178_v5 = vadd.f32 %v3887_v23, %v2110_v57 }
 0x234   :  { %v2273_v8 = vmax.f32 %v2209_v4, 0.0 }
 0x235   :  { %v2242_v9 = vmax.f32 %v2178_v5, 0.0  ;;  %v1773_v50 = vpop.f32.mrf.mxu2  ;;  %v1933_v51 = vpop.f32.mrf.mxu3 }
 0x236   :  { %v2337_v62 = vpack.c.bf16 %v2273_v8, %v2273_v8  ;;  %v2014_v60 = vmax.f32 %v4572_v63, %v1773_v50  ;;  %v2078_v11 = vmax.f32 %v4573_v61, %v1933_v51  ;;  %v1456_v24 = vpop.f32.mrf.mxu0  ;;  %v1616_v25 = vpop.f32.mrf.mxu1  ;;  %v4584_v50 = vld [vmem:[#allocation49_spill] sm:$0xff] }
 0x237   :  { %v2306_v42 = vpack.c.bf16 %v2242_v9, %v2242_v9  ;;  %v1983_v26 = vmax.f32 %v4574_v18, %v1456_v24  ;;  %v2047_v27 = vmax.f32 %v4575_v43, %v1616_v25  ;;  %v4586_v24 = vld [vmem:[#allocation51_spill] sm:$0xff] }
 0x238   :  { %2402 = vst.msk [vmem:[%s4459_s3 + $0xd0] sm:$0xf] %vm2349_vm1, %v2337_v62  ;;  %v2142_v37 = vmax.f32 %v2014_v60, %v2078_v11  ;;  %v4585_v62 = vld [vmem:[#allocation50_spill] sm:$0xff] }
 0x239   :  { %2371 = vst.msk [vmem:[%s4459_s3 + $0x54] sm:$0xf] %vm2349_vm1, %v2306_v42  ;;  %v2111_v6 = vmax.f32 %v1983_v26, %v2047_v27  ;;  %v4587_v42 = vld [vmem:[#allocation52_spill] sm:$0xff] }
 0x23a   :  { %v2210_v31 = vadd.f32 %v3887_v23, %v2142_v37 }
 0x23b   :  { %v2179_v52 = vadd.f32 %v3887_v23, %v2111_v6 }
 0x23c   :  { %v2274_v53 = vmax.f32 %v2210_v31, 0.0 }
 0x23d   :  { %v2243_v58 = vmax.f32 %v2179_v52, 0.0  ;;  %v1776_v10 = vpop.f32.mrf.mxu2  ;;  %v1936_v30 = vpop.f32.mrf.mxu3 }
 0x23e   :  { %v2338_v12 = vpack.c.bf16 %v2274_v53, %v2274_v53  ;;  %v2015_v54 = vmax.f32 %v4576_v13, %v1776_v10  ;;  %v2079_v14 = vmax.f32 %v4577_v59, %v1936_v30  ;;  %v1458_v28 = vpop.f32.mrf.mxu0  ;;  %v1618_v29 = vpop.f32.mrf.mxu1  ;;  %v4588_v10 = vld [vmem:[#allocation53_spill] sm:$0xff] }
 0x23f   :  { %v2307_v32 = vpack.c.bf16 %v2243_v58, %v2243_v58  ;;  %v1984_v0 = vmax.f32 %v4578_v33, %v1458_v28  ;;  %v2048_v1 = vmax.f32 %v4579_v15, %v1618_v29  ;;  %v4590_v28 = vld [vmem:[#allocation55_spill] sm:$0xff]  ;;  %v4367_v15 = vld [vmem:[%s4458_s2] ss:$0 sm:$0xff] }
 0x240   :  { %2403 = vst.msk [vmem:[%s4459_s3 + $0xd4] sm:$0xf] %vm2349_vm1, %v2338_v12  ;;  %v2143_v55 = vmax.f32 %v2015_v54, %v2079_v14  ;;  %v4589_v12 = vld [vmem:[#allocation54_spill] sm:$0xff] }
 0x241   :  { %2372 = vst.msk [vmem:[%s4459_s3 + $0x58] sm:$0xf] %vm2349_vm1, %v2307_v32  ;;  %v2112_v34 = vmax.f32 %v1984_v0, %v2048_v1  ;;  %v4591_v32 = vld [vmem:[#allocation56_spill] sm:$0xff] }
 0x242   :  { %v2211_v2 = vadd.f32 %v3887_v23, %v2143_v55 }
 0x243   :  { %v2180_v19 = vadd.f32 %v3887_v23, %v2112_v34 }
 0x244   :  { %v2275_v3 = vmax.f32 %v2211_v2, 0.0 }
 0x245   :  { %v2244_v44 = vmax.f32 %v2180_v19, 0.0  ;;  %v1778_v45 = vpop.f32.mrf.mxu2  ;;  %v1938_v48 = vpop.f32.mrf.mxu3 }
 0x246   :  { %v2339_v49 = vpack.c.bf16 %v2275_v3, %v2275_v3  ;;  %v2016_v38 = vmax.f32 %v4580_v22, %v1778_v45  ;;  %v2080_v40 = vmax.f32 %v4581_v39, %v1938_v48  ;;  %v1461_v16 = vpop.f32.mrf.mxu0  ;;  %v1621_v46 = vpop.f32.mrf.mxu1  ;;  %v4592_v45 = vld [vmem:[#allocation57_spill] sm:$0xff] }
 0x247   :  { %v2308_v17 = vpack.c.bf16 %v2244_v44, %v2244_v44  ;;  %v1985_v20 = vmax.f32 %v4582_v47, %v1461_v16  ;;  %v2049_v35 = vmax.f32 %v4583_v21, %v1621_v46  ;;  %v4594_v16 = vld [vmem:[#allocation59_spill] sm:$0xff] }
 0x248   :  { %2404 = vst.msk [vmem:[%s4459_s3 + $0xd8] sm:$0xf] %vm2349_vm1, %v2339_v49  ;;  %v2144_v41 = vmax.f32 %v2016_v38, %v2080_v40  ;;  %v4593_v49 = vld [vmem:[#allocation58_spill] sm:$0xff] }
 0x249   :  { %2373 = vst.msk [vmem:[%s4459_s3 + $0x5c] sm:$0xf] %vm2349_vm1, %v2308_v17  ;;  %v2113_v36 = vmax.f32 %v1985_v20, %v2049_v35  ;;  %v4595_v17 = vld [vmem:[#allocation60_spill] sm:$0xff] }
 0x24a   :  { %v2212_v7 = vadd.f32 %v3887_v23, %v2144_v41 }
 0x24b   :  { %v2181_v56 = vadd.f32 %v3887_v23, %v2113_v36 }
 0x24c   :  { %v2276_v57 = vmax.f32 %v2212_v7, 0.0 }
 0x24d   :  { %v2245_v4 = vmax.f32 %v2181_v56, 0.0  ;;  %v1781_v5 = vpop.f32.mrf.mxu2  ;;  %v1941_v8 = vpop.f32.mrf.mxu3 }
 0x24e   :  { %v2340_v9 = vpack.c.bf16 %v2276_v57, %v2276_v57  ;;  %v2017_v51 = vmax.f32 %v4584_v50, %v1781_v5  ;;  %v2081_v63 = vmax.f32 %v4585_v62, %v1941_v8  ;;  %v1463_v60 = vpop.f32.mrf.mxu0  ;;  %v1623_v61 = vpop.f32.mrf.mxu1  ;;  %v4596_v5 = vld [vmem:[#allocation61_spill] sm:$0xff] }
 0x24f   :  { %v2309_v11 = vpack.c.bf16 %v2245_v4, %v2245_v4  ;;  %v1986_v25 = vmax.f32 %v4586_v24, %v1463_v60  ;;  %v2050_v18 = vmax.f32 %v4587_v42, %v1623_v61  ;;  %v4598_v60 = vld [vmem:[#allocation63_spill] sm:$0xff] }
 0x250   :  { %2405 = vst.msk [vmem:[%s4459_s3 + $0xdc] sm:$0xf] %vm2349_vm1, %v2340_v9  ;;  %v2145_v26 = vmax.f32 %v2017_v51, %v2081_v63  ;;  %v4597_v9 = vld [vmem:[#allocation62_spill] sm:$0xff] }
 0x251   :  { %2374 = vst.msk [vmem:[%s4459_s3 + $0x60] sm:$0xf] %vm2349_vm1, %v2309_v11  ;;  %v2114_v43 = vmax.f32 %v1986_v25, %v2050_v18  ;;  %v4599_v11 = vld [vmem:[#allocation64_spill] sm:$0xff] }
 0x252   :  { %v2213_v27 = vadd.f32 %v3887_v23, %v2145_v26 }
 0x253   :  { %v2182_v37 = vadd.f32 %v3887_v23, %v2114_v43 }
 0x254   :  { %v2277_v6 = vmax.f32 %v2213_v27, 0.0 }
 0x255   :  { %v2246_v31 = vmax.f32 %v2182_v37, 0.0  ;;  %v1783_v52 = vpop.f32.mrf.mxu2  ;;  %v1943_v53 = vpop.f32.mrf.mxu3 }
 0x256   :  { %v2341_v58 = vpack.c.bf16 %v2277_v6, %v2277_v6  ;;  %v2018_v30 = vmax.f32 %v4588_v10, %v1783_v52  ;;  %v2082_v13 = vmax.f32 %v4589_v12, %v1943_v53  ;;  %v1466_v54 = vpop.f32.mrf.mxu0  ;;  %v1626_v59 = vpop.f32.mrf.mxu1  ;;  %v4600_v52 = vld [vmem:[#allocation65_spill] sm:$0xff] }
 0x257   :  { %v2310_v14 = vpack.c.bf16 %v2246_v31, %v2246_v31  ;;  %v1987_v29 = vmax.f32 %v4590_v28, %v1466_v54  ;;  %v2051_v33 = vmax.f32 %v4591_v32, %v1626_v59  ;;  %v4602_v54 = vld [vmem:[#allocation67_spill] sm:$0xff] }
 0x258   :  { %2406 = vst.msk [vmem:[%s4459_s3 + $0xe0] sm:$0xf] %vm2349_vm1, %v2341_v58  ;;  %v2146_v23 = vmax.f32 %v2018_v30, %v2082_v13  ;;  %v4601_v58 = vld [vmem:[#allocation66_spill] sm:$0xff] }
 0x259   :  { %2375 = vst.msk [vmem:[%s4459_s3 + $0x64] sm:$0xf] %vm2349_vm1, %v2310_v14  ;;  %v2115_v0 = vmax.f32 %v1987_v29, %v2051_v33  ;;  %v4603_v14 = vld [vmem:[#allocation68_spill] sm:$0xff] }
 0x25a   :  { %v2214_v1 = vadd.f32 %v4367_v15, %v2146_v23 }
 0x25b   :  { %v2183_v55 = vadd.f32 %v4367_v15, %v2115_v0 }
 0x25c   :  { %v2278_v34 = vmax.f32 %v2214_v1, 0.0 }
 0x25d   :  { %v2247_v2 = vmax.f32 %v2183_v55, 0.0  ;;  %v1786_v19 = vpop.f32.mrf.mxu2  ;;  %v1946_v3 = vpop.f32.mrf.mxu3 }
 0x25e   :  { %v2342_v44 = vpack.c.bf16 %v2278_v34, %v2278_v34  ;;  %v2019_v48 = vmax.f32 %v4592_v45, %v1786_v19  ;;  %v2083_v22 = vmax.f32 %v4593_v49, %v1946_v3  ;;  %v1468_v38 = vpop.f32.mrf.mxu0  ;;  %v1628_v39 = vpop.f32.mrf.mxu1  ;;  %v4604_v19 = vld [vmem:[#allocation69_spill] sm:$0xff] }
 0x25f   :  { %v2311_v40 = vpack.c.bf16 %v2247_v2, %v2247_v2  ;;  %v1988_v46 = vmax.f32 %v4594_v16, %v1468_v38  ;;  %v2052_v47 = vmax.f32 %v4595_v17, %v1628_v39  ;;  %v4606_v38 = vld [vmem:[#allocation71_spill] sm:$0xff] }
 0x260   :  { %2407 = vst.msk [vmem:[%s4459_s3 + $0xe4] sm:$0xf] %vm2349_vm1, %v2342_v44  ;;  %v2147_v20 = vmax.f32 %v2019_v48, %v2083_v22  ;;  %v4605_v44 = vld [vmem:[#allocation70_spill] sm:$0xff] }
 0x261   :  { %2376 = vst.msk [vmem:[%s4459_s3 + $0x68] sm:$0xf] %vm2349_vm1, %v2311_v40  ;;  %v2116_v21 = vmax.f32 %v1988_v46, %v2052_v47  ;;  %v4607_v40 = vld [vmem:[#allocation72_spill] sm:$0xff] }
 0x262   :  { %v2215_v35 = vadd.f32 %v4367_v15, %v2147_v20 }
 0x263   :  { %v2184_v41 = vadd.f32 %v4367_v15, %v2116_v21 }
 0x264   :  { %v2279_v36 = vmax.f32 %v2215_v35, 0.0 }
 0x265   :  { %v2248_v7 = vmax.f32 %v2184_v41, 0.0  ;;  %v1788_v56 = vpop.f32.mrf.mxu2  ;;  %v1948_v57 = vpop.f32.mrf.mxu3 }
 0x266   :  { %v2343_v4 = vpack.c.bf16 %v2279_v36, %v2279_v36  ;;  %v2020_v8 = vmax.f32 %v4596_v5, %v1788_v56  ;;  %v2084_v50 = vmax.f32 %v4597_v9, %v1948_v57  ;;  %v1471_v51 = vpop.f32.mrf.mxu0  ;;  %v1631_v62 = vpop.f32.mrf.mxu1  ;;  %v4608_v56 = vld [vmem:[#allocation73_spill] sm:$0xff] }
 0x267   :  { %v2312_v63 = vpack.c.bf16 %v2248_v7, %v2248_v7  ;;  %v1989_v61 = vmax.f32 %v4598_v60, %v1471_v51  ;;  %v2053_v24 = vmax.f32 %v4599_v11, %v1631_v62  ;;  %v4610_v51 = vld [vmem:[#allocation75_spill] sm:$0xff] }
 0x268   :  { %2408 = vst.msk [vmem:[%s4459_s3 + $0xe8] sm:$0xf] %vm2349_vm1, %v2343_v4  ;;  %v2148_v25 = vmax.f32 %v2020_v8, %v2084_v50  ;;  %v4609_v4 = vld [vmem:[#allocation74_spill] sm:$0xff] }
 0x269   :  { %2377 = vst.msk [vmem:[%s4459_s3 + $0x6c] sm:$0xf] %vm2349_vm1, %v2312_v63  ;;  %v2117_v42 = vmax.f32 %v1989_v61, %v2053_v24  ;;  %v4611_v63 = vld [vmem:[#allocation76_spill] sm:$0xff] }
 0x26a   :  { %v2216_v18 = vadd.f32 %v4367_v15, %v2148_v25 }
 0x26b   :  { %v2185_v26 = vadd.f32 %v4367_v15, %v2117_v42 }
 0x26c   :  { %v2280_v43 = vmax.f32 %v2216_v18, 0.0 }
 0x26d   :  { %v2249_v27 = vmax.f32 %v2185_v26, 0.0  ;;  %v1791_v37 = vpop.f32.mrf.mxu2  ;;  %v1951_v6 = vpop.f32.mrf.mxu3 }
 0x26e   :  { %v2344_v31 = vpack.c.bf16 %v2280_v43, %v2280_v43  ;;  %v2021_v53 = vmax.f32 %v4600_v52, %v1791_v37  ;;  %v2085_v10 = vmax.f32 %v4601_v58, %v1951_v6  ;;  %v1473_v30 = vpop.f32.mrf.mxu0  ;;  %v1633_v12 = vpop.f32.mrf.mxu1  ;;  %v4612_v37 = vld [vmem:[#allocation77_spill] sm:$0xff] }
 0x26f   :  { %v2313_v13 = vpack.c.bf16 %v2249_v27, %v2249_v27  ;;  %v1990_v59 = vmax.f32 %v4602_v54, %v1473_v30  ;;  %v2054_v28 = vmax.f32 %v4603_v14, %v1633_v12 }
 0x270   :  { %2409 = vst.msk [vmem:[%s4459_s3 + $0xec] sm:$0xf] %vm2349_vm1, %v2344_v31  ;;  %v2149_v29 = vmax.f32 %v2021_v53, %v2085_v10  ;;  %v4613_v31 = vld [vmem:[#allocation78_spill] sm:$0xff] }
 0x271   :  { %2378 = vst.msk [vmem:[%s4459_s3 + $0x70] sm:$0xf] %vm2349_vm1, %v2313_v13  ;;  %v2118_v32 = vmax.f32 %v1990_v59, %v2054_v28 }
 0x272   :  { %v2217_v33 = vadd.f32 %v4367_v15, %v2149_v29 }
 0x273   :  { %v2186_v23 = vadd.f32 %v4367_v15, %v2118_v32 }
 0x274   :  { %v2281_v0 = vmax.f32 %v2217_v33, 0.0 }
 0x275   :  { %v2250_v1 = vmax.f32 %v2186_v23, 0.0  ;;  %v1793_v55 = vpop.f32.mrf.mxu2  ;;  %v1953_v34 = vpop.f32.mrf.mxu3 }
 0x276   :  { %v2345_v2 = vpack.c.bf16 %v2281_v0, %v2281_v0  ;;  %v2022_v3 = vmax.f32 %v4604_v19, %v1793_v55  ;;  %v2086_v45 = vmax.f32 %v4605_v44, %v1953_v34  ;;  %v1476_v48 = vpop.f32.mrf.mxu0  ;;  %v1636_v49 = vpop.f32.mrf.mxu1 }
 0x277   :  { %v2314_v22 = vpack.c.bf16 %v2250_v1, %v2250_v1  ;;  %v1991_v39 = vmax.f32 %v4606_v38, %v1476_v48  ;;  %v2055_v16 = vmax.f32 %v4607_v40, %v1636_v49 }
 0x278   :  { %2410 = vst.msk [vmem:[%s4459_s3 + $0xf0] sm:$0xf] %vm2349_vm1, %v2345_v2  ;;  %v2150_v46 = vmax.f32 %v2022_v3, %v2086_v45 }
 0x279   :  { %2379 = vst.msk [vmem:[%s4459_s3 + $0x74] sm:$0xf] %vm2349_vm1, %v2314_v22  ;;  %v2119_v17 = vmax.f32 %v1991_v39, %v2055_v16 }
 0x27a   :  { %v2218_v47 = vadd.f32 %v4367_v15, %v2150_v46 }
 0x27b   :  { %v2187_v20 = vadd.f32 %v4367_v15, %v2119_v17 }
 0x27c   :  { %v2282_v21 = vmax.f32 %v2218_v47, 0.0 }
 0x27d   :  { %v2251_v35 = vmax.f32 %v2187_v20, 0.0  ;;  %v1796_v41 = vpop.f32.mrf.mxu2  ;;  %v1956_v36 = vpop.f32.mrf.mxu3 }
 0x27e   :  { %v2346_v7 = vpack.c.bf16 %v2282_v21, %v2282_v21  ;;  %v2023_v57 = vmax.f32 %v4608_v56, %v1796_v41  ;;  %v2087_v5 = vmax.f32 %v4609_v4, %v1956_v36  ;;  %v1478_v8 = vpop.f32.mrf.mxu0  ;;  %v1638_v9 = vpop.f32.mrf.mxu1 }
 0x27f   :  { %v2315_v50 = vpack.c.bf16 %v2251_v35, %v2251_v35  ;;  %v1992_v62 = vmax.f32 %v4610_v51, %v1478_v8  ;;  %v2056_v60 = vmax.f32 %v4611_v63, %v1638_v9 }
 0x280   :  { %2411 = vst.msk [vmem:[%s4459_s3 + $0xf4] sm:$0xf] %vm2349_vm1, %v2346_v7  ;;  %v2151_v61 = vmax.f32 %v2023_v57, %v2087_v5 }
 0x281   :  { %2380 = vst.msk [vmem:[%s4459_s3 + $0x78] sm:$0xf] %vm2349_vm1, %v2315_v50  ;;  %v2120_v11 = vmax.f32 %v1992_v62, %v2056_v60 }
 0x282   :  { %v2219_v24 = vadd.f32 %v4367_v15, %v2151_v61 }
 0x283   :  { %v2188_v25 = vadd.f32 %v4367_v15, %v2120_v11 }
 0x284   :  { %v2283_v42 = vmax.f32 %v2219_v24, 0.0 }
 0x285   :  { %v2252_v18 = vmax.f32 %v2188_v25, 0.0  ;;  %v1798_v26 = vpop.f32.mrf.mxu2  ;;  %v1958_v43 = vpop.f32.mrf.mxu3 }
 0x286   :  { %v2347_v27 = vpack.c.bf16 %v2283_v42, %v2283_v42  ;;  %v2024_v6 = vmax.f32 %v4612_v37, %v1798_v26  ;;  %v2088_v52 = vmax.f32 %v4613_v31, %v1958_v43 }
 0x287   :  { %v2316_v53 = vpack.c.bf16 %v2252_v18, %v2252_v18 }
 0x288   :  { %2412 = vst.msk [vmem:[%s4459_s3 + $0xf8] sm:$0xf] %vm2349_vm1, %v2347_v27  ;;  %v2152_v58 = vmax.f32 %v2024_v6, %v2088_v52 }
 0x289   :  { %2381 = vst.msk [vmem:[%s4459_s3 + $0x7c] sm:$0xf] %vm2349_vm1, %v2316_v53 }
 0x28a   :  { %v2220_v10 = vadd.f32 %v4367_v15, %v2152_v58 }
 0x28c   :  { %v2284_v30 = vmax.f32 %v2220_v10, 0.0 }
 0x28e   :  { %v2348_v12 = vpack.c.bf16 %v2284_v30, %v2284_v30 }
 0x290   :  { %2413 = vst.msk [vmem:[%s4459_s3 + $0xfc] sm:$0xf] %vm2349_vm1, %v2348_v12 }

// kernel: net_forward.5
= control target key start
LH: loop header
LB: loop body
LE: loop exit
PB: predicated region body
PF: predicated region fallthrough
CT: control target
= control target key end

     0   :  { %vm439_vm0 = vcmask 130048   ;;  %vm974_vm1 = vcmask 257024   ;;  %s2172_s1 = inlined_call_operand.vmem [shape: bf16[144,32], index: 1, kind: input, shape index: {}]   ;;  %s2173_s0 = inlined_call_operand.vmem [shape: bf16[2,4,64,144], index: 0, kind: input, shape index: {}]   ;;  %s2174_s2 = inlined_call_operand.vmem [shape: f32[1,32], index: 2, kind: input, shape index: {}]   ;;  %s2175_s3 = inlined_call_operand.vmem [shape: bf16[2,64,32], index: 3, kind: output, shape index: {}]  }
   0x1   :  { %v1390_v0 = vld [vmem:[%s2172_s1 + $0x38] sm:$0xff]  ;;  %v1391_v1 = vld [vmem:[%s2172_s1 + $0x40] sm:$0xff]  ;;  %v999_v3 = vld [vmem:[%s2173_s0 + $0x8] sm:$0xf0] }
   0x2   :  { %v1319_v2 = vld [vmem:[%s2173_s0 + $0x4] sm:$0xf]  ;;  %536 = vmatpush.bf16.msra.mxu0 %v1390_v0  ;;  %1392 = vmatpush.bf16.msra.mxu2 %v1390_v0  ;;  %v1389_v5 = vld [vmem:[%s2172_s1 + $0x30] sm:$0xff]  ;;  %v1388_v6 = vld [vmem:[%s2172_s1 + $0x28] sm:$0xff] }
   0x3   :  { %v1002_v4 = vor.u32 %v1319_v2, %v999_v3  ;;  %712 = vmatpush.bf16.msra.mxu1 %v1391_v1  ;;  %1400 = vmatpush.bf16.msra.mxu3 %v1391_v1  ;;  %v1353_v7 = vld [vmem:[%s2173_s0 + $0x114] sm:$0xf]  ;;  %v1135_v8 = vld [vmem:[%s2173_s0 + $0x118] sm:$0xf0]  ;;  %v1387_v10 = vld [vmem:[%s2172_s1 + $0x20] sm:$0xff] }
   0x4   :  { %v1138_v9 = vor.u32 %v1353_v7, %v1135_v8  ;;  %v1386_v11 = vld [vmem:[%s2172_s1 + $0x18] sm:$0xff]  ;;  %v1321_v12 = vld [vmem:[%s2173_s0 + $0x14] sm:$0xf]  ;;  %v1384_v16 = vld [vmem:[%s2172_s1 + $0x8] sm:$0xff] }
   0x5   :  { %v1007_v13 = vld [vmem:[%s2173_s0 + $0x18] sm:$0xf0]  ;;  %v1385_v15 = vld [vmem:[%s2172_s1 + $0x10] sm:$0xff]  ;;  %v1355_v17 = vld [vmem:[%s2173_s0 + $0x124] sm:$0xf] }
   0x6   :  { %1287 = vmatmul.msk.bf16.vlgmr.msra.gmra.mxu1 %vm439_vm0, %v1002_v4  ;;  %537 = vmatpush.bf16.msra.mxu0 %v1389_v5  ;;  %v1010_v14 = vor.u32 %v1321_v12, %v1007_v13  ;;  %v1143_v18 = vld [vmem:[%s2173_s0 + $0x128] sm:$0xf0]  ;;  %v1383_v20 = vld [vmem:[%s2172_s1] sm:$0xff]  ;;  %v1320_v22 = vld [vmem:[%s2173_s0 + $0x4] sm:$0xf0] }
   0x7   :  { %1393 = vmatpush.bf16.msra.mxu2 %v1389_v5  ;;  %1304 = vmatmul.msk.bf16.vlgmr.msra.gmra.mxu3 %vm439_vm0, %v1138_v9  ;;  %v1146_v19 = vor.u32 %v1355_v17, %v1143_v18  ;;  %v997_v21 = vld [vmem:[%s2173_s0] sm:$0xf]  ;;  %v1352_v24 = vld [vmem:[%s2173_s0 + $0x104] sm:$0xf0]  ;;  %v1323_v27 = vld [vmem:[%s2173_s0 + $0x24] sm:$0xf] }
   0x8   :  { %v1125_v23 = vld [vmem:[%s2173_s0 + $0x100] sm:$0xf]  ;;  %v998_v25 = vor.u32 %v1320_v22, %v997_v21  ;;  %v1015_v28 = vld [vmem:[%s2173_s0 + $0x28] sm:$0xf0]  ;;  %v1357_v30 = vld [vmem:[%s2173_s0 + $0x134] sm:$0xf] }
   0x9   :  { %v1126_v26 = vor.u32 %v1352_v24, %v1125_v23  ;;  %v1018_v29 = vor.u32 %v1323_v27, %v1015_v28  ;;  %v1151_v31 = vld [vmem:[%s2173_s0 + $0x138] sm:$0xf0]  ;;  %v1005_v33 = vld [vmem:[%s2173_s0 + $0x10] sm:$0xf]  ;;  %v1322_v34 = vld [vmem:[%s2173_s0 + $0x14] sm:$0xf0] }
   0xa   :  { %538 = vmatpush.bf16.msra.mxu0 %v1388_v6  ;;  %v1154_v32 = vor.u32 %v1357_v30, %v1151_v31  ;;  %v1133_v35 = vld [vmem:[%s2173_s0 + $0x110] sm:$0xf]  ;;  %v1354_v36 = vld [vmem:[%s2173_s0 + $0x114] sm:$0xf0]  ;;  %v1006_v37 = vor.u32 %v1322_v34, %v1005_v33  ;;  %v1325_v39 = vld [vmem:[%s2173_s0 + $0x34] sm:$0xf] }
   0xb   :  { %1394 = vmatpush.bf16.msra.mxu2 %v1388_v6  ;;  %v1134_v38 = vor.u32 %v1354_v36, %v1133_v35  ;;  %v1023_v40 = vld [vmem:[%s2173_s0 + $0x38] sm:$0xf0]  ;;  %v1359_v42 = vld [vmem:[%s2173_s0 + $0x144] sm:$0xf]  ;;  %v1159_v43 = vld [vmem:[%s2173_s0 + $0x148] sm:$0xf0] }
   0xc   :  { %v1026_v41 = vor.u32 %v1325_v39, %v1023_v40  ;;  %v1162_v44 = vor.u32 %v1359_v42, %v1159_v43  ;;  %v1013_v45 = vld [vmem:[%s2173_s0 + $0x20] sm:$0xf]  ;;  %v1324_v46 = vld [vmem:[%s2173_s0 + $0x24] sm:$0xf0]  ;;  %v1327_v51 = vld [vmem:[%s2173_s0 + $0x44] sm:$0xf] }
   0xd   :  { %v1141_v47 = vld [vmem:[%s2173_s0 + $0x120] sm:$0xf]  ;;  %v1356_v48 = vld [vmem:[%s2173_s0 + $0x124] sm:$0xf0]  ;;  %v1014_v49 = vor.u32 %v1324_v46, %v1013_v45  ;;  %v1031_v52 = vld [vmem:[%s2173_s0 + $0x48] sm:$0xf0] }
   0xe   :  { %539 = vmatpush.bf16.msra.mxu0 %v1387_v10  ;;  %v1142_v50 = vor.u32 %v1356_v48, %v1141_v47  ;;  %v1034_v53 = vor.u32 %v1327_v51, %v1031_v52  ;;  %v1361_v54 = vld [vmem:[%s2173_s0 + $0x154] sm:$0xf]  ;;  %v1167_v55 = vld [vmem:[%s2173_s0 + $0x158] sm:$0xf0]  ;;  %v1021_v57 = vld [vmem:[%s2173_s0 + $0x30] sm:$0xf] }
   0xf   :  { %1395 = vmatpush.bf16.msra.mxu2 %v1387_v10  ;;  %v1170_v56 = vor.u32 %v1361_v54, %v1167_v55  ;;  %v1326_v58 = vld [vmem:[%s2173_s0 + $0x34] sm:$0xf0]  ;;  %v1149_v59 = vld [vmem:[%s2173_s0 + $0x130] sm:$0xf]  ;;  %v1329_v63 = vld [vmem:[%s2173_s0 + $0x54] sm:$0xf] }
  0x10   :  { %v1358_v60 = vld [vmem:[%s2173_s0 + $0x134] sm:$0xf0]  ;;  %v1022_v61 = vor.u32 %v1326_v58, %v1021_v57  ;;  %v1039_v0 = vld [vmem:[%s2173_s0 + $0x58] sm:$0xf0]  ;;  %v1363_v2 = vld [vmem:[%s2173_s0 + $0x164] sm:$0xf] }
  0x11   :  { %v1150_v62 = vor.u32 %v1358_v60, %v1149_v59  ;;  %v1042_v1 = vor.u32 %v1329_v63, %v1039_v0  ;;  %v1175_v3 = vld [vmem:[%s2173_s0 + $0x168] sm:$0xf0]  ;;  %v1029_v5 = vld [vmem:[%s2173_s0 + $0x40] sm:$0xf]  ;;  %v1328_v6 = vld [vmem:[%s2173_s0 + $0x44] sm:$0xf0] }
  0x12   :  { %540 = vmatpush.bf16.msra.mxu0 %v1386_v11  ;;  %v1178_v4 = vor.u32 %v1363_v2, %v1175_v3  ;;  %v1157_v7 = vld [vmem:[%s2173_s0 + $0x140] sm:$0xf]  ;;  %v1360_v8 = vld [vmem:[%s2173_s0 + $0x144] sm:$0xf0]  ;;  %v1030_v9 = vor.u32 %v1328_v6, %v1029_v5  ;;  %v1047_v12 = vld [vmem:[%s2173_s0 + $0x68] sm:$0xf0] }
  0x13   :  { %1396 = vmatpush.bf16.msra.mxu2 %v1386_v11  ;;  %v1158_v10 = vor.u32 %v1360_v8, %v1157_v7  ;;  %v1331_v11 = vld [vmem:[%s2173_s0 + $0x64] sm:$0xf]  ;;  %v1037_v17 = vld [vmem:[%s2173_s0 + $0x50] sm:$0xf]  ;;  %v1330_v18 = vld [vmem:[%s2173_s0 + $0x54] sm:$0xf0] }
  0x14   :  { %v1050_v13 = vor.u32 %v1331_v11, %v1047_v12  ;;  %v1038_v21 = vor.u32 %v1330_v18, %v1037_v17  ;;  %v1333_v23 = vld [vmem:[%s2173_s0 + $0x74] sm:$0xf]  ;;  %v1055_v24 = vld [vmem:[%s2173_s0 + $0x78] sm:$0xf0]  ;;  %v1191_v27 = vld [vmem:[%s2173_s0 + $0x188] sm:$0xf0] }
  0x15   :  { %v1332_v30 = vld [vmem:[%s2173_s0 + $0x64] sm:$0xf0]  ;;  %v1173_v31 = vld [vmem:[%s2173_s0 + $0x160] sm:$0xf]  ;;  %v1335_v35 = vld [vmem:[%s2173_s0 + $0x84] sm:$0xf] }
  0x16   :  { %1288 = vmatmul.msk.bf16.gmra.mxu1 %vm439_vm0, %v1010_v14  ;;  %541 = vmatpush.bf16.msra.mxu0 %v1385_v15  ;;  %v1365_v14 = vld [vmem:[%s2173_s0 + $0x174] sm:$0xf]  ;;  %v1063_v36 = vld [vmem:[%s2173_s0 + $0x88] sm:$0xf0]  ;;  %v1199_v40 = vld [vmem:[%s2173_s0 + $0x198] sm:$0xf0] }
  0x17   :  { %1397 = vmatpush.bf16.msra.mxu2 %v1385_v15  ;;  %1305 = vmatmul.msk.bf16.gmra.mxu3 %vm439_vm0, %v1146_v19  ;;  %v1183_v15 = vld [vmem:[%s2173_s0 + $0x178] sm:$0xf0]  ;;  %v1165_v19 = vld [vmem:[%s2173_s0 + $0x150] sm:$0xf]  ;;  %v1369_v39 = vld [vmem:[%s2173_s0 + $0x194] sm:$0xf] }
  0x18   :  { %v1053_v42 = vld [vmem:[%s2173_s0 + $0x70] sm:$0xf]  ;;  %v1334_v43 = vld [vmem:[%s2173_s0 + $0x74] sm:$0xf0]  ;;  %v1071_v51 = vld [vmem:[%s2173_s0 + $0x98] sm:$0xf0] }
  0x19   :  { %v1181_v45 = vld [vmem:[%s2173_s0 + $0x170] sm:$0xf]  ;;  %v1366_v46 = vld [vmem:[%s2173_s0 + $0x174] sm:$0xf0]  ;;  %v1054_v47 = vor.u32 %v1334_v43, %v1053_v42  ;;  %v1371_v55 = vld [vmem:[%s2173_s0 + $0x1a4] sm:$0xf] }
  0x1a   :  { %542 = vmatpush.bf16.msra.mxu0 %v1384_v16  ;;  %v1061_v58 = vld [vmem:[%s2173_s0 + $0x80] sm:$0xf]  ;;  %v1336_v59 = vld [vmem:[%s2173_s0 + $0x84] sm:$0xf0]  ;;  %v1079_v5 = vld [vmem:[%s2173_s0 + $0xa8] sm:$0xf0] }
  0x1b   :  { %1398 = vmatpush.bf16.msra.mxu2 %v1384_v16  ;;  %v1186_v16 = vor.u32 %v1365_v14, %v1183_v15  ;;  %v1062_v63 = vor.u32 %v1336_v59, %v1061_v58  ;;  %v1373_v12 = vld [vmem:[%s2173_s0 + $0x1b4] sm:$0xf]  ;;  %v1069_v15 = vld [vmem:[%s2173_s0 + $0x90] sm:$0xf]  ;;  %v1372_v42 = vld [vmem:[%s2173_s0 + $0x1a4] sm:$0xf0] }
  0x1c   :  { %v1197_v18 = vld [vmem:[%s2173_s0 + $0x190] sm:$0xf]  ;;  %v1377_v59 = vld [vmem:[%s2173_s0 + $0x1d4] sm:$0xf] }
  0x1e   :  { %543 = vmatpush.bf16.msra.mxu0 %v1383_v20 }
  0x1f   :  { %1399 = vmatpush.bf16.msra.mxu2 %v1383_v20  ;;  %v1362_v20 = vld [vmem:[%s2173_s0 + $0x154] sm:$0xf0] }
  0x20   :  { %v1166_v22 = vor.u32 %v1362_v20, %v1165_v19  ;;  %v1370_v19 = vld [vmem:[%s2173_s0 + $0x194] sm:$0xf0] }
  0x21   :  { %544 = vmatmul.bf16.vlgmr.msra.gmra.mxu0 %v998_v25  ;;  %v1058_v25 = vor.u32 %v1333_v23, %v1055_v24  ;;  %v1198_v24 = vor.u32 %v1370_v19, %v1197_v18 }
  0x22   :  { %624 = vmatmul.bf16.vlgmr.msra.gmra.mxu2 %v1126_v26  ;;  %v1367_v26 = vld [vmem:[%s2173_s0 + $0x184] sm:$0xf] }
  0x23   :  { %v1194_v28 = vor.u32 %v1367_v26, %v1191_v27  ;;  %v1341_v26 = vld [vmem:[%s2173_s0 + $0xb4] sm:$0xf]  ;;  %v1087_v27 = vld [vmem:[%s2173_s0 + $0xb8] sm:$0xf0] }
  0x26   :  { %1289 = vmatmul.msk.bf16.gmra.mxu1 %vm439_vm0, %v1018_v29  ;;  %v1045_v29 = vld [vmem:[%s2173_s0 + $0x60] sm:$0xf] }
  0x27   :  { %1306 = vmatmul.msk.bf16.gmra.mxu3 %vm439_vm0, %v1154_v32  ;;  %v1364_v32 = vld [vmem:[%s2173_s0 + $0x164] sm:$0xf0]  ;;  %v1046_v33 = vor.u32 %v1332_v30, %v1045_v29 }
  0x28   :  { %v1174_v34 = vor.u32 %v1364_v32, %v1173_v31 }
  0x31   :  { %549 = vmatmul.bf16.gmra.mxu0 %v1006_v37  ;;  %v1066_v37 = vor.u32 %v1335_v35, %v1063_v36  ;;  %v1375_v35 = vld [vmem:[%s2173_s0 + $0x1c4] sm:$0xf]  ;;  %v1223_v36 = vld [vmem:[%s2173_s0 + $0x1c8] sm:$0xf0] }
  0x32   :  { %629 = vmatmul.bf16.gmra.mxu2 %v1134_v38 }
  0x36   :  { %1290 = vmatmul.msk.bf16.gmra.mxu1 %vm439_vm0, %v1026_v41  ;;  %v1202_v41 = vor.u32 %v1369_v39, %v1199_v40  ;;  %v1340_v39 = vld [vmem:[%s2173_s0 + $0xa4] sm:$0xf0] }
  0x37   :  { %1307 = vmatmul.msk.bf16.gmra.mxu3 %vm439_vm0, %v1162_v44 }
  0x41   :  { %554 = vmatmul.bf16.gmra.mxu0 %v1014_v49  ;;  %v1182_v49 = vor.u32 %v1366_v46, %v1181_v45 }
  0x42   :  { %634 = vmatmul.bf16.gmra.mxu2 %v1142_v50  ;;  %v1337_v50 = vld [vmem:[%s2173_s0 + $0x94] sm:$0xf] }
  0x43   :  { %v1074_v52 = vor.u32 %v1337_v50, %v1071_v51  ;;  %v1343_v50 = vld [vmem:[%s2173_s0 + $0xc4] sm:$0xf]  ;;  %v1095_v51 = vld [vmem:[%s2173_s0 + $0xc8] sm:$0xf0] }
  0x46   :  { %1291 = vmatmul.msk.bf16.gmra.mxu1 %vm439_vm0, %v1034_v53 }
  0x47   :  { %1308 = vmatmul.msk.bf16.gmra.mxu3 %vm439_vm0, %v1170_v56  ;;  %v1207_v56 = vld [vmem:[%s2173_s0 + $0x1a8] sm:$0xf0] }
  0x48   :  { %v1210_v57 = vor.u32 %v1371_v55, %v1207_v56 }
  0x51   :  { %559 = vmatmul.bf16.gmra.mxu0 %v1022_v61  ;;  %v1189_v61 = vld [vmem:[%s2173_s0 + $0x180] sm:$0xf] }
  0x52   :  { %639 = vmatmul.bf16.gmra.mxu2 %v1150_v62  ;;  %v1368_v62 = vld [vmem:[%s2173_s0 + $0x184] sm:$0xf0] }
  0x53   :  { %v1190_v2 = vor.u32 %v1368_v62, %v1189_v61  ;;  %v1085_v62 = vld [vmem:[%s2173_s0 + $0xb0] sm:$0xf] }
  0x56   :  { %1292 = vmatmul.msk.bf16.gmra.mxu1 %vm439_vm0, %v1042_v1 }
  0x57   :  { %1309 = vmatmul.msk.bf16.gmra.mxu3 %vm439_vm0, %v1178_v4  ;;  %v1339_v4 = vld [vmem:[%s2173_s0 + $0xa4] sm:$0xf] }
  0x58   :  { %v1082_v6 = vor.u32 %v1339_v4, %v1079_v5 }
  0x61   :  { %564 = vmatmul.bf16.gmra.mxu0 %v1030_v9 }
  0x62   :  { %644 = vmatmul.bf16.gmra.mxu2 %v1158_v10 }
  0x66   :  { %1293 = vmatmul.msk.bf16.gmra.mxu1 %vm439_vm0, %v1050_v13  ;;  %v1215_v13 = vld [vmem:[%s2173_s0 + $0x1b8] sm:$0xf0] }
  0x67   :  { %1310 = vmatmul.msk.bf16.gmra.mxu3 %vm439_vm0, %v1186_v16  ;;  %v1218_v14 = vor.u32 %v1373_v12, %v1215_v13  ;;  %v1338_v16 = vld [vmem:[%s2173_s0 + $0x94] sm:$0xf0] }
  0x71   :  { %569 = vmatmul.bf16.gmra.mxu0 %v1038_v21  ;;  %v1070_v21 = vor.u32 %v1338_v16, %v1069_v15  ;;  %v1103_v15 = vld [vmem:[%s2173_s0 + $0xd8] sm:$0xf0] }
  0x72   :  { %649 = vmatmul.bf16.gmra.mxu2 %v1166_v22 }
  0x76   :  { %1294 = vmatmul.msk.bf16.gmra.mxu1 %vm439_vm0, %v1058_v25 }
  0x77   :  { %1311 = vmatmul.msk.bf16.gmra.mxu3 %vm439_vm0, %v1194_v28  ;;  %v1090_v28 = vor.u32 %v1341_v26, %v1087_v27  ;;  %v1239_v26 = vld [vmem:[%s2173_s0 + $0x1e8] sm:$0xf0] }
  0x81   :  { %574 = vmatmul.bf16.gmra.mxu0 %v1046_v33 }
  0x82   :  { %654 = vmatmul.bf16.gmra.mxu2 %v1174_v34 }
  0x83   :  { %v714_v38 = vpop.f32.mrf.mxu1 }
  0x86   :  { %1295 = vmatmul.msk.bf16.gmra.mxu1 %vm439_vm0, %v1066_v37  ;;  %v1226_v37 = vor.u32 %v1375_v35, %v1223_v36 }
  0x87   :  { %1312 = vmatmul.msk.bf16.gmra.mxu3 %vm439_vm0, %v1202_v41  ;;  %v1205_v41 = vld [vmem:[%s2173_s0 + $0x1a0] sm:$0xf] }
  0x8a   :  { %v799_v48 = vpop.f32.mrf.mxu3 }
  0x8b   :  { %v716_v44 = vpop.f32.mrf.mxu1 }
  0x91   :  { %579 = vmatmul.bf16.gmra.mxu0 %v1054_v47 }
  0x92   :  { %659 = vmatmul.bf16.gmra.mxu2 %v1182_v49  ;;  %v1677_v54 = vpop.f32.mrf.mxu3 }
  0x93   :  { %v719_v53 = vpop.f32.mrf.mxu1 }
  0x96   :  { %1296 = vmatmul.msk.bf16.gmra.mxu1 %vm439_vm0, %v1074_v52  ;;  %v1098_v52 = vor.u32 %v1343_v50, %v1095_v51 }
  0x97   :  { %1313 = vmatmul.msk.bf16.gmra.mxu3 %vm439_vm0, %v1210_v57 }
  0x9a   :  { %v1699_v0 = vpop.f32.mrf.mxu3 }
  0x9b   :  { %v721_v60 = vpop.f32.mrf.mxu1 }
  0x9e   :  { %v545_v1 = vpop.f32.mrf.mxu0 }
  0x9f   :  { %v1701_v3 = vadd.f32 %v714_v38, %v545_v1  ;;  %v1077_v38 = vld [vmem:[%s2173_s0 + $0xa0] sm:$0xf]  ;;  %v1213_v1 = vld [vmem:[%s2173_s0 + $0x1b0] sm:$0xf] }
  0xa1   :  { %584 = vmatmul.bf16.gmra.mxu0 %v1062_v63  ;;  %v1342_v63 = vld [vmem:[%s2173_s0 + $0xb4] sm:$0xf0] }
  0xa2   :  { %664 = vmatmul.bf16.gmra.mxu2 %v1190_v2  ;;  %v1711_v9 = vpop.f32.mrf.mxu3  ;;  %v1374_v2 = vld [vmem:[%s2173_s0 + $0x1b4] sm:$0xf0]  ;;  %v1086_v5 = vor.u32 %v1342_v63, %v1085_v62  ;;  %v1229_v63 = vld [vmem:[%s2173_s0 + $0x1d0] sm:$0xf] }
  0xa3   :  { %v724_v7 = vpop.f32.mrf.mxu1  ;;  %v1214_v12 = vor.u32 %v1374_v2, %v1213_v1 }
  0xa5   :  { %v1709_v8 = vpop.f32.mrf.mxu2 }
  0xa6   :  { %1297 = vmatmul.msk.bf16.gmra.mxu1 %vm439_vm0, %v1082_v6  ;;  %v547_v10 = vpop.f32.mrf.mxu0 }
  0xa7   :  { %v1714_v11 = vadd.f32 %v716_v44, %v547_v10  ;;  %1314 = vmatmul.msk.bf16.gmra.mxu3 %vm439_vm0, %v1218_v14  ;;  %v1078_v44 = vor.u32 %v1340_v39, %v1077_v38  ;;  %v1345_v14 = vld [vmem:[%s2173_s0 + $0xd4] sm:$0xf] }
  0xa8   :  { %v1106_v16 = vor.u32 %v1345_v14, %v1103_v15  ;;  %v1349_v14 = vld [vmem:[%s2173_s0 + $0xf4] sm:$0xf]  ;;  %v1119_v15 = vld [vmem:[%s2173_s0 + $0xf8] sm:$0xf0] }
  0xaa   :  { %v1737_v22 = vpop.f32.mrf.mxu3 }
  0xab   :  { %v726_v17 = vpop.f32.mrf.mxu1 }
  0xad   :  { %v1735_v20 = vpop.f32.mrf.mxu2 }
  0xae   :  { %v550_v23 = vpop.f32.mrf.mxu0 }
  0xaf   :  { %v1739_v25 = vadd.f32 %v719_v53, %v550_v23 }
  0xb1   :  { %589 = vmatmul.bf16.gmra.mxu0 %v1070_v21 }
  0xb2   :  { %669 = vmatmul.bf16.gmra.mxu2 %v1198_v24  ;;  %v1747_v31 = vpop.f32.mrf.mxu3  ;;  %v1379_v24 = vld [vmem:[%s2173_s0 + $0x1e4] sm:$0xf] }
  0xb3   :  { %v729_v29 = vpop.f32.mrf.mxu1  ;;  %v1242_v27 = vor.u32 %v1379_v24, %v1239_v26 }
  0xb5   :  { %v630_v30 = vpop.f32.mrf.mxu2 }
  0xb6   :  { %v1749_v32 = vadd.f32 %v799_v48, %v630_v30  ;;  %1298 = vmatmul.msk.bf16.gmra.mxu1 %vm439_vm0, %v1090_v28  ;;  %v552_v33 = vpop.f32.mrf.mxu0  ;;  %v1206_v48 = vor.u32 %v1372_v42, %v1205_v41  ;;  %v1093_v28 = vld [vmem:[%s2173_s0 + $0xc0] sm:$0xf]  ;;  %v1347_v41 = vld [vmem:[%s2173_s0 + $0xe4] sm:$0xf]  ;;  %v1111_v42 = vld [vmem:[%s2173_s0 + $0xe8] sm:$0xf0] }
  0xb7   :  { %v1752_v34 = vadd.f32 %v721_v60, %v552_v33  ;;  %1315 = vmatmul.msk.bf16.gmra.mxu3 %vm439_vm0, %v1226_v37  ;;  %v1231_v60 = vld [vmem:[%s2173_s0 + $0x1d8] sm:$0xf0]  ;;  %v1221_v30 = vld [vmem:[%s2173_s0 + $0x1c0] sm:$0xf]  ;;  %v1376_v33 = vld [vmem:[%s2173_s0 + $0x1c4] sm:$0xf0] }
  0xb8   :  { %v1234_v61 = vor.u32 %v1377_v59, %v1231_v60  ;;  %v1222_v39 = vor.u32 %v1376_v33, %v1221_v30  ;;  %v1109_v30 = vld [vmem:[%s2173_s0 + $0xe0] sm:$0xf] }
  0xba   :  { %v1773_v45 = vpop.f32.mrf.mxu3 }
  0xbb   :  { %v731_v40 = vpop.f32.mrf.mxu1 }
  0xbd   :  { %v632_v43 = vpop.f32.mrf.mxu2 }
  0xbe   :  { %v1776_v46 = vadd.f32 %v1677_v54, %v632_v43  ;;  %v555_v47 = vpop.f32.mrf.mxu0 }
  0xbf   :  { %v1778_v49 = vadd.f32 %v724_v7, %v555_v47 }
  0xc1   :  { %594 = vmatmul.bf16.gmra.mxu0 %v1078_v44 }
  0xc2   :  { %674 = vmatmul.bf16.gmra.mxu2 %v1206_v48  ;;  %v1786_v56 = vpop.f32.mrf.mxu3 }
  0xc3   :  { %v734_v53 = vpop.f32.mrf.mxu1 }
  0xc5   :  { %v635_v55 = vpop.f32.mrf.mxu2 }
  0xc6   :  { %v1789_v54 = vadd.f32 %v1699_v0, %v635_v55  ;;  %1299 = vmatmul.msk.bf16.gmra.mxu1 %vm439_vm0, %v1098_v52  ;;  %v557_v57 = vpop.f32.mrf.mxu0  ;;  %v1247_v55 = vld [vmem:[%s2173_s0 + $0x1f8] sm:$0xf0] }
  0xc7   :  { %v1792_v58 = vadd.f32 %v726_v17, %v557_v57  ;;  %1316 = vmatmul.msk.bf16.gmra.mxu3 %vm439_vm0, %v1234_v61  ;;  %v1346_v61 = vld [vmem:[%s2173_s0 + $0xd4] sm:$0xf0] }
  0xca   :  { %v1813_v6 = vpop.f32.mrf.mxu3 }
  0xcb   :  { %v736_v0 = vpop.f32.mrf.mxu1 }
  0xcd   :  { %v637_v4 = vpop.f32.mrf.mxu2 }
  0xce   :  { %v1816_v7 = vadd.f32 %v1711_v9, %v637_v4  ;;  %v560_v10 = vpop.f32.mrf.mxu0 }
  0xcf   :  { %v1818_v13 = vadd.f32 %v729_v29, %v560_v10 }
  0xd1   :  { %599 = vmatmul.bf16.gmra.mxu0 %v1086_v5 }
  0xd2   :  { %679 = vmatmul.bf16.gmra.mxu2 %v1214_v12  ;;  %v1826_v19 = vpop.f32.mrf.mxu3 }
  0xd3   :  { %v739_v17 = vpop.f32.mrf.mxu1 }
  0xd5   :  { %v640_v18 = vpop.f32.mrf.mxu2 }
  0xd6   :  { %v1829_v9 = vadd.f32 %v1737_v22, %v640_v18  ;;  %1300 = vmatmul.msk.bf16.gmra.mxu1 %vm439_vm0, %v1106_v16  ;;  %v562_v21 = vpop.f32.mrf.mxu0  ;;  %v1344_v22 = vld [vmem:[%s2173_s0 + $0xc4] sm:$0xf0]  ;;  %v1122_v18 = vor.u32 %v1349_v14, %v1119_v15  ;;  %v1382_v15 = vld [vmem:[%s2173_s0 + $0x1f4] sm:$0xf0] }
  0xd7   :  { %v1832_v23 = vadd.f32 %v731_v40, %v562_v21  ;;  %1317 = vmatmul.msk.bf16.gmra.mxu3 %vm439_vm0, %v1242_v27  ;;  %v1094_v36 = vor.u32 %v1344_v22, %v1093_v28 }
  0xda   :  { %v1864_v43 = vpop.f32.mrf.mxu3 }
  0xdb   :  { %v741_v29 = vpop.f32.mrf.mxu1 }
  0xdd   :  { %v642_v35 = vpop.f32.mrf.mxu2 }
  0xde   :  { %v1854_v37 = vadd.f32 %v1747_v31, %v642_v35  ;;  %v565_v38 = vpop.f32.mrf.mxu0  ;;  %v1114_v31 = vor.u32 %v1347_v41, %v1111_v42  ;;  %v1380_v35 = vld [vmem:[%s2173_s0 + $0x1e4] sm:$0xf0] }
  0xdf   :  { %v1856_v40 = vadd.f32 %v734_v53, %v565_v38  ;;  %v1381_v53 = vld [vmem:[%s2173_s0 + $0x1f4] sm:$0xf] }
  0xe0   :  { %2178 = vst [vmem:[#allocation2_spill] sm:$0xff] %v1854_v37  ;;  %v1250_v57 = vor.u32 %v1381_v53, %v1247_v55  ;;  %v1127_v53 = vld [vmem:[%s2173_s0 + $0x108] sm:$0xf0] }
  0xe1   :  { %604 = vmatmul.bf16.gmra.mxu0 %v1094_v36 }
  0xe2   :  { %684 = vmatmul.bf16.gmra.mxu2 %v1222_v39  ;;  %v1882_v60 = vpop.f32.mrf.mxu3 }
  0xe3   :  { %v744_v47 = vpop.f32.mrf.mxu1 }
  0xe5   :  { %v645_v48 = vpop.f32.mrf.mxu2 }
  0xe6   :  { %v1869_v50 = vadd.f32 %v1773_v45, %v645_v48  ;;  %1301 = vmatmul.msk.bf16.gmra.mxu1 %vm439_vm0, %v1114_v31  ;;  %v567_v51 = vpop.f32.mrf.mxu0  ;;  %v1101_v45 = vld [vmem:[%s2173_s0 + $0xd0] sm:$0xf] }
  0xe7   :  { %v1872_v52 = vadd.f32 %v736_v0, %v567_v51  ;;  %1318 = vmatmul.msk.bf16.gmra.mxu3 %vm439_vm0, %v1250_v57  ;;  %v1378_v0 = vld [vmem:[%s2173_s0 + $0x1d4] sm:$0xf0]  ;;  %v1102_v2 = vor.u32 %v1346_v61, %v1101_v45  ;;  %v1351_v51 = vld [vmem:[%s2173_s0 + $0x104] sm:$0xf] }
  0xe8   :  { %v1230_v10 = vor.u32 %v1378_v0, %v1229_v63 }
  0xea   :  { %v829_v21 = vpop.f32.mrf.mxu3 }
  0xeb   :  { %v746_v62 = vpop.f32.mrf.mxu1 }
  0xed   :  { %v647_v1 = vpop.f32.mrf.mxu2 }
  0xee   :  { %v1898_v4 = vadd.f32 %v1786_v56, %v647_v1  ;;  %v570_v5 = vpop.f32.mrf.mxu0 }
  0xef   :  { %v1900_v12 = vadd.f32 %v739_v17, %v570_v5 }
  0xf1   :  { %609 = vmatmul.bf16.gmra.mxu0 %v1102_v2 }
  0xf2   :  { %689 = vmatmul.bf16.gmra.mxu2 %v1230_v10  ;;  %v831_v39 = vpop.f32.mrf.mxu3  ;;  %v1117_v10 = vld [vmem:[%s2173_s0 + $0xf0] sm:$0xf] }
  0xf3   :  { %v749_v56 = vpop.f32.mrf.mxu1 }
  0xf5   :  { %v650_v24 = vpop.f32.mrf.mxu2 }
  0xf6   :  { %v1911_v17 = vadd.f32 %v1813_v6, %v650_v24  ;;  %1302 = vmatmul.msk.bf16.gmra.mxu1 %vm439_vm0, %v1122_v18  ;;  %v572_v26 = vpop.f32.mrf.mxu0  ;;  %v1348_v6 = vld [vmem:[%s2173_s0 + $0xe4] sm:$0xf0] }
  0xf7   :  { %v1914_v27 = vadd.f32 %v741_v29, %v572_v26  ;;  %v1237_v29 = vld [vmem:[%s2173_s0 + $0x1e0] sm:$0xf]  ;;  %v1110_v38 = vor.u32 %v1348_v6, %v1109_v30 }
  0xf8   :  { %v1238_v31 = vor.u32 %v1380_v35, %v1237_v29 }
  0xfa   :  { %v834_v1 = vpop.f32.mrf.mxu3 }
  0xfb   :  { %v751_v33 = vpop.f32.mrf.mxu1 }
  0xfd   :  { %v652_v36 = vpop.f32.mrf.mxu2 }
  0xfe   :  { %v1933_v41 = vadd.f32 %v1826_v19, %v652_v36  ;;  %v575_v42 = vpop.f32.mrf.mxu0  ;;  %v1130_v19 = vor.u32 %v1351_v51, %v1127_v53 }
  0xff   :  { %v1935_v48 = vadd.f32 %v744_v47, %v575_v42 }
 0x101   :  { %614 = vmatmul.bf16.gmra.mxu0 %v1110_v38 }
 0x102   :  { %694 = vmatmul.bf16.gmra.mxu2 %v1238_v31  ;;  %v836_v38 = vpop.f32.mrf.mxu3 }
 0x103   :  { %v754_v45 = vpop.f32.mrf.mxu1 }
 0x105   :  { %v655_v47 = vpop.f32.mrf.mxu2 }
 0x106   :  { %v1948_v61 = vadd.f32 %v1864_v43, %v655_v47  ;;  %1303 = vmatmul.msk.bf16.gmra.mxu1 %vm439_vm0, %v1130_v19  ;;  %v577_v63 = vpop.f32.mrf.mxu0  ;;  %v1350_v43 = vld [vmem:[%s2173_s0 + $0xf4] sm:$0xf0] }
 0x107   :  { %v1951_v0 = vadd.f32 %v746_v62, %v577_v63  ;;  %v1245_v62 = vld [vmem:[%s2173_s0 + $0x1f0] sm:$0xf]  ;;  %v1118_v24 = vor.u32 %v1350_v43, %v1117_v10 }
 0x108   :  { %v1246_v6 = vor.u32 %v1382_v15, %v1245_v62 }
 0x10a   :  { %v839_v63 = vpop.f32.mrf.mxu3 }
 0x10b   :  { %v756_v14 = vpop.f32.mrf.mxu1 }
 0x10d   :  { %v657_v18 = vpop.f32.mrf.mxu2 }
 0x10e   :  { %v1970_v26 = vadd.f32 %v1882_v60, %v657_v18  ;;  %v580_v30 = vpop.f32.mrf.mxu0 }
 0x10f   :  { %v1972_v29 = vadd.f32 %v749_v56, %v580_v30 }
 0x111   :  { %619 = vmatmul.bf16.gmra.mxu0 %v1118_v24 }
 0x112   :  { %699 = vmatmul.bf16.gmra.mxu2 %v1246_v6 }
 0x113   :  { %v759_v42 = vpop.f32.mrf.mxu1 }
 0x115   :  { %v660_v31 = vpop.f32.mrf.mxu2 }
 0x116   :  { %v1978_v51 = vadd.f32 %v829_v21, %v660_v31  ;;  %v582_v53 = vpop.f32.mrf.mxu0 }
 0x117   :  { %v1980_v60 = vadd.f32 %v751_v33, %v582_v53  ;;  %v841_v33 = vpop.f32.mrf.mxu3 }
 0x11b   :  { %v761_v47 = vpop.f32.mrf.mxu1 }
 0x11d   :  { %v662_v10 = vpop.f32.mrf.mxu2 }
 0x11e   :  { %v1986_v43 = vadd.f32 %v831_v39, %v662_v10  ;;  %v585_v62 = vpop.f32.mrf.mxu0 }
 0x11f   :  { %v755_v15 = vadd.f32 %v754_v45, %v585_v62  ;;  %v844_v39 = vpop.f32.mrf.mxu3 }
 0x120   :  { %2179 = vst [vmem:[#allocation3_spill] sm:$0xff] %v1986_v43 }
 0x123   :  { %v764_v18 = vpop.f32.mrf.mxu1 }
 0x125   :  { %v665_v24 = vpop.f32.mrf.mxu2 }
 0x126   :  { %v1990_v30 = vadd.f32 %v834_v1, %v665_v24  ;;  %v587_v6 = vpop.f32.mrf.mxu0 }
 0x127   :  { %v757_v31 = vadd.f32 %v756_v14, %v587_v6  ;;  %v846_v2 = vpop.f32.mrf.mxu3 }
 0x12b   :  { %v766_v53 = vpop.f32.mrf.mxu1 }
 0x12d   :  { %v667_v56 = vpop.f32.mrf.mxu2 }
 0x12e   :  { %v1992_v19 = vadd.f32 %v836_v38, %v667_v56  ;;  %v590_v36 = vpop.f32.mrf.mxu0 }
 0x12f   :  { %v1994_v35 = vadd.f32 %v759_v42, %v590_v36  ;;  %v849_v56 = vpop.f32.mrf.mxu3 }
 0x133   :  { %v769_v10 = vpop.f32.mrf.mxu1 }
 0x135   :  { %v670_v45 = vpop.f32.mrf.mxu2 }
 0x136   :  { %v1996_v62 = vadd.f32 %v839_v63, %v670_v45  ;;  %v592_v21 = vpop.f32.mrf.mxu0 }
 0x137   :  { %v1998_v5 = vadd.f32 %v761_v47, %v592_v21  ;;  %v851_v47 = vpop.f32.mrf.mxu3 }
 0x13b   :  { %v771_v1 = vpop.f32.mrf.mxu1 }
 0x13d   :  { %v672_v24 = vpop.f32.mrf.mxu2 }
 0x13e   :  { %v2000_v57 = vadd.f32 %v841_v33, %v672_v24  ;;  %v595_v14 = vpop.f32.mrf.mxu0 }
 0x13f   :  { %v2002_v6 = vadd.f32 %v764_v18, %v595_v14 }
 0x143   :  { %v774_v38 = vpop.f32.mrf.mxu1 }
 0x145   :  { %v675_v36 = vpop.f32.mrf.mxu2 }
 0x146   :  { %v2004_v42 = vadd.f32 %v844_v39, %v675_v36  ;;  %v597_v55 = vpop.f32.mrf.mxu0  ;;  %v854_v39 = vpop.f32.mrf.mxu3 }
 0x147   :  { %v2006_v22 = vadd.f32 %v766_v53, %v597_v55 }
 0x14b   :  { %v776_v63 = vpop.f32.mrf.mxu1 }
 0x14d   :  { %v677_v45 = vpop.f32.mrf.mxu2 }
 0x14e   :  { %v2008_v21 = vadd.f32 %v846_v2, %v677_v45  ;;  %v600_v28 = vpop.f32.mrf.mxu0  ;;  %v2023_v2 = vpop.f32.mrf.mxu3 }
 0x14f   :  { %v2010_v16 = vadd.f32 %v769_v10, %v600_v28  ;;  %v2021_v28 = vld [vmem:[%s2174_s2] ss:$0 sm:$0xff]  ;;  %v2180_v10 = vmax.f32 %v1701_v3, %v1856_v40 }
 0x153   :  { %v779_v33 = vpop.f32.mrf.mxu1 }
 0x155   :  { %v680_v24 = vpop.f32.mrf.mxu2 }
 0x156   :  { %v2012_v18 = vadd.f32 %v849_v56, %v680_v24  ;;  %v602_v14 = vpop.f32.mrf.mxu0  ;;  %v859_v40 = vpop.f32.mrf.mxu3 }
 0x157   :  { %v2014_v59 = vadd.f32 %v771_v1, %v602_v14 }
 0x15b   :  { %v781_v36 = vpop.f32.mrf.mxu1 }
 0x15d   :  { %v682_v44 = vpop.f32.mrf.mxu2 }
 0x15e   :  { %v2016_v55 = vadd.f32 %v851_v47, %v682_v44  ;;  %v605_v53 = vpop.f32.mrf.mxu0 }
 0x15f   :  { %v775_v43 = vadd.f32 %v774_v38, %v605_v53  ;;  %v2181_v38 = vmax.f32 %v1714_v11, %v1872_v52  ;;  %v2182_v11 = vmax.f32 %v1739_v25, %v1900_v12  ;;  %v2184_v12 = vmax.f32 %v1752_v34, %v1914_v27 }
 0x161   :  { %v890_v37 = vmax.f32 %v755_v15, %v775_v43 }
 0x163   :  { %v906_v1 = vmax.f32 %v2180_v10, %v890_v37  ;;  %v784_v56 = vpop.f32.mrf.mxu1 }
 0x165   :  { %v926_v45 = vadd.f32 %v2021_v28, %v906_v1  ;;  %v685_v24 = vpop.f32.mrf.mxu2 }
 0x166   :  { %v607_v44 = vpop.f32.mrf.mxu0  ;;  %v855_v27 = vadd.f32 %v854_v39, %v685_v24 }
 0x167   :  { %v942_v47 = vmax.f32 %v926_v45, 0.0  ;;  %v777_v14 = vadd.f32 %v776_v63, %v607_v44 }
 0x169   :  { %v958_v43 = vpack.c.bf16 %v942_v47, %v942_v47  ;;  %v891_v15 = vmax.f32 %v757_v31, %v777_v14 }
 0x16b   :  { %975 = vst.msk [vmem:[%s2175_s3] sm:$0xf] %vm974_vm1, %v958_v43  ;;  %v907_v3 = vmax.f32 %v2181_v38, %v891_v15  ;;  %v786_v37 = vpop.f32.mrf.mxu1  ;;  %v861_v15 = vpop.f32.mrf.mxu3 }
 0x16d   :  { %v927_v53 = vadd.f32 %v2021_v28, %v907_v3  ;;  %v687_v10 = vpop.f32.mrf.mxu2 }
 0x16e   :  { %v610_v1 = vpop.f32.mrf.mxu0 }
 0x16f   :  { %v943_v45 = vmax.f32 %v927_v53, 0.0  ;;  %v780_v63 = vadd.f32 %v779_v33, %v610_v1 }
 0x171   :  { %v959_v44 = vpack.c.bf16 %v943_v45, %v943_v45  ;;  %v892_v31 = vmax.f32 %v1994_v35, %v780_v63  ;;  %v2183_v63 = vmax.f32 %v1749_v32, %v1911_v17 }
 0x173   :  { %976 = vst.msk [vmem:[%s2175_s3 + $0x4] sm:$0xf] %vm974_vm1, %v959_v44  ;;  %v908_v52 = vmax.f32 %v2182_v11, %v892_v31  ;;  %v2045_v47 = vpop.f32.mrf.mxu1 }
 0x175   :  { %v928_v14 = vadd.f32 %v2021_v28, %v908_v52  ;;  %v690_v43 = vpop.f32.mrf.mxu2  ;;  %v864_v52 = vpop.f32.mrf.mxu3 }
 0x176   :  { %v860_v38 = vadd.f32 %v859_v40, %v690_v43  ;;  %v612_v33 = vpop.f32.mrf.mxu0 }
 0x177   :  { %v944_v3 = vmax.f32 %v928_v14, 0.0  ;;  %v782_v53 = vadd.f32 %v781_v36, %v612_v33 }
 0x178   :  { %v900_v35 = vmax.f32 %v1996_v62, %v860_v38 }
 0x179   :  { %v960_v1 = vpack.c.bf16 %v944_v3, %v944_v3  ;;  %v893_v45 = vmax.f32 %v1998_v5, %v782_v53  ;;  %v2185_v3 = vmax.f32 %v1776_v46, %v1933_v41  ;;  %v898_v46 = vmax.f32 %v1990_v30, %v855_v27 }
 0x17a   :  { %v916_v25 = vmax.f32 %v2183_v63, %v900_v35  ;;  %v2187_v30 = vmax.f32 %v1789_v54, %v1948_v61 }
 0x17b   :  { %977 = vst.msk [vmem:[%s2175_s3 + $0x8] sm:$0xf] %vm974_vm1, %v960_v1  ;;  %v909_v40 = vmax.f32 %v2184_v12, %v893_v45  ;;  %v2060_v44 = vpop.f32.mrf.mxu1 }
 0x17c   :  { %v936_v62 = vadd.f32 %v2021_v28, %v916_v25 }
 0x17d   :  { %v929_v36 = vadd.f32 %v2021_v28, %v909_v40  ;;  %v692_v5 = vpop.f32.mrf.mxu2 }
 0x17e   :  { %v952_v31 = vmax.f32 %v936_v62, 0.0  ;;  %v862_v11 = vadd.f32 %v861_v15, %v692_v5  ;;  %v615_v32 = vpop.f32.mrf.mxu0  ;;  %v857_v62 = vadd.f32 %v2023_v2, %v687_v10 }
 0x17f   :  { %v945_v17 = vmax.f32 %v929_v36, 0.0  ;;  %v785_v14 = vadd.f32 %v784_v56, %v615_v32 }
 0x180   :  { %v968_v43 = vpack.c.bf16 %v952_v31, %v952_v31  ;;  %v901_v38 = vmax.f32 %v2000_v57, %v862_v11  ;;  %v2186_v57 = vmax.f32 %v1778_v49, %v1935_v48  ;;  %v899_v32 = vmax.f32 %v1992_v19, %v857_v62 }
 0x181   :  { %v961_v33 = vpack.c.bf16 %v945_v17, %v945_v17  ;;  %v894_v34 = vmax.f32 %v2002_v6, %v785_v14 }
 0x182   :  { %985 = vst.msk [vmem:[%s2175_s3 + $0x28] sm:$0xf] %vm974_vm1, %v968_v43  ;;  %v917_v15 = vmax.f32 %v2185_v3, %v901_v38 }
 0x183   :  { %978 = vst.msk [vmem:[%s2175_s3 + $0xc] sm:$0xf] %vm974_vm1, %v961_v33  ;;  %v910_v56 = vmax.f32 %v2186_v57, %v894_v34  ;;  %v794_v6 = vpop.f32.mrf.mxu1 }
 0x184   :  { %v937_v39 = vadd.f32 %v2021_v28, %v917_v15  ;;  %v795_v24 = vadd.f32 %v794_v6, %v1709_v8  ;;  %v866_v8 = vpop.f32.mrf.mxu3 }
 0x185   :  { %v930_v53 = vadd.f32 %v2021_v28, %v910_v56  ;;  %v695_v35 = vpop.f32.mrf.mxu2 }
 0x186   :  { %v953_v41 = vmax.f32 %v937_v39, 0.0  ;;  %v882_v1 = vmax.f32 %v795_v24, %v1869_v50  ;;  %v865_v45 = vadd.f32 %v864_v52, %v695_v35  ;;  %v617_v63 = vpop.f32.mrf.mxu0 }
 0x187   :  { %v946_v25 = vmax.f32 %v930_v53, 0.0  ;;  %v787_v12 = vadd.f32 %v786_v37, %v617_v63 }
 0x188   :  { %v969_v40 = vpack.c.bf16 %v953_v41, %v953_v41  ;;  %v914_v49 = vmax.f32 %v882_v1, %v898_v46  ;;  %v902_v48 = vmax.f32 %v2004_v42, %v865_v45  ;;  %v2188_v42 = vmax.f32 %v1792_v58, %v1951_v0 }
 0x189   :  { %v962_v36 = vpack.c.bf16 %v946_v25, %v946_v25  ;;  %v895_v5 = vmax.f32 %v2006_v22, %v787_v12  ;;  %v2191_v45 = vmax.f32 %v1829_v9, %v1978_v51 }
 0x18a   :  { %986 = vst.msk [vmem:[%s2175_s3 + $0x2c] sm:$0xf] %vm974_vm1, %v969_v40  ;;  %v934_v50 = vadd.f32 %v2021_v28, %v914_v49  ;;  %v918_v37 = vmax.f32 %v2187_v30, %v902_v48 }
 0x18b   :  { %979 = vst.msk [vmem:[%s2175_s3 + $0x10] sm:$0xf] %vm974_vm1, %v962_v36  ;;  %v911_v22 = vmax.f32 %v2188_v42, %v895_v5  ;;  %v796_v2 = vpop.f32.mrf.mxu1 }
 0x18c   :  { %v950_v10 = vmax.f32 %v934_v50, 0.0  ;;  %v938_v31 = vadd.f32 %v2021_v28, %v918_v37  ;;  %v797_v11 = vadd.f32 %v796_v2, %v1735_v20 }
 0x18d   :  { %v931_v54 = vadd.f32 %v2021_v28, %v911_v22  ;;  %v697_v61 = vpop.f32.mrf.mxu2 }
 0x18e   :  { %v966_v17 = vpack.c.bf16 %v950_v10, %v950_v10  ;;  %v954_v52 = vmax.f32 %v938_v31, 0.0  ;;  %v883_v14 = vmax.f32 %v797_v11, %v1898_v4  ;;  %v867_v43 = vadd.f32 %v866_v8, %v697_v61  ;;  %v620_v38 = vpop.f32.mrf.mxu0 }
 0x18f   :  { %v947_v33 = vmax.f32 %v931_v54, 0.0  ;;  %v790_v58 = vadd.f32 %v2045_v47, %v620_v38  ;;  %v2189_v47 = vmax.f32 %v1816_v7, %v1970_v26 }
 0x190   :  { %983 = vst.msk [vmem:[%s2175_s3 + $0x20] sm:$0xf] %vm974_vm1, %v966_v17  ;;  %v970_v20 = vpack.c.bf16 %v954_v52, %v954_v52  ;;  %v915_v0 = vmax.f32 %v883_v14, %v899_v32  ;;  %v903_v19 = vmax.f32 %v2008_v21, %v867_v43  ;;  %v869_v21 = vpop.f32.mrf.mxu3 }
 0x191   :  { %v963_v34 = vpack.c.bf16 %v947_v33, %v947_v33  ;;  %v896_v27 = vmax.f32 %v2010_v16, %v790_v58  ;;  %v2190_v16 = vmax.f32 %v1818_v13, %v1972_v29 }
 0x192   :  { %987 = vst.msk [vmem:[%s2175_s3 + $0x30] sm:$0xf] %vm974_vm1, %v970_v20  ;;  %v935_v4 = vadd.f32 %v2021_v28, %v915_v0  ;;  %v919_v3 = vmax.f32 %v2189_v47, %v903_v19 }
 0x193   :  { %980 = vst.msk [vmem:[%s2175_s3 + $0x14] sm:$0xf] %vm974_vm1, %v963_v34  ;;  %v912_v15 = vmax.f32 %v2190_v16, %v896_v27 }
 0x194   :  { %v951_v57 = vmax.f32 %v935_v4, 0.0  ;;  %v939_v56 = vadd.f32 %v2021_v28, %v919_v3 }
 0x195   :  { %v932_v6 = vadd.f32 %v2021_v28, %v912_v15  ;;  %v700_v39 = vpop.f32.mrf.mxu2 }
 0x196   :  { %v967_v24 = vpack.c.bf16 %v951_v57, %v951_v57  ;;  %v955_v53 = vmax.f32 %v939_v56, 0.0  ;;  %v870_v7 = vadd.f32 %v869_v21, %v700_v39  ;;  %v622_v26 = vpop.f32.mrf.mxu0 }
 0x197   :  { %v948_v35 = vmax.f32 %v932_v6, 0.0  ;;  %v792_v46 = vadd.f32 %v2060_v44, %v622_v26 }
 0x198   :  { %984 = vst.msk [vmem:[%s2175_s3 + $0x24] sm:$0xf] %vm974_vm1, %v967_v24  ;;  %v971_v13 = vpack.c.bf16 %v955_v53, %v955_v53  ;;  %v904_v29 = vmax.f32 %v2012_v18, %v870_v7  ;;  %v2192_v18 = vmax.f32 %v1832_v23, %v1980_v60  ;;  %v871_v25 = vpop.f32.mrf.mxu3  ;;  %v2193_v23 = vld [vmem:[#allocation2_spill] sm:$0xff]  ;;  %v2194_v60 = vld [vmem:[#allocation3_spill] sm:$0xff] }
 0x199   :  { %v964_v41 = vpack.c.bf16 %v948_v35, %v948_v35  ;;  %v897_v1 = vmax.f32 %v2014_v59, %v792_v46  ;;  %v2195_v8 = vmax.f32 %v2193_v23, %v2194_v60 }
 0x19a   :  { %988 = vst.msk [vmem:[%s2175_s3 + $0x34] sm:$0xf] %vm974_vm1, %v971_v13  ;;  %v920_v44 = vmax.f32 %v2191_v45, %v904_v29 }
 0x19b   :  { %981 = vst.msk [vmem:[%s2175_s3 + $0x18] sm:$0xf] %vm974_vm1, %v964_v41  ;;  %v913_v63 = vmax.f32 %v2192_v18, %v897_v1 }
 0x19c   :  { %v940_v59 = vadd.f32 %v2021_v28, %v920_v44 }
 0x19d   :  { %v933_v12 = vadd.f32 %v2021_v28, %v913_v63  ;;  %v702_v40 = vpop.f32.mrf.mxu2 }
 0x19e   :  { %v956_v49 = vmax.f32 %v940_v59, 0.0  ;;  %v872_v48 = vadd.f32 %v871_v25, %v702_v40 }
 0x19f   :  { %v949_v62 = vmax.f32 %v933_v12, 0.0 }
 0x1a0   :  { %v972_v9 = vpack.c.bf16 %v956_v49, %v956_v49  ;;  %v905_v51 = vmax.f32 %v2016_v55, %v872_v48 }
 0x1a1   :  { %v965_v36 = vpack.c.bf16 %v949_v62, %v949_v62 }
 0x1a2   :  { %989 = vst.msk [vmem:[%s2175_s3 + $0x38] sm:$0xf] %vm974_vm1, %v972_v9  ;;  %v921_v5 = vmax.f32 %v2195_v8, %v905_v51 }
 0x1a3   :  { %982 = vst.msk [vmem:[%s2175_s3 + $0x1c] sm:$0xf] %vm974_vm1, %v965_v36 }
 0x1a4   :  { %v941_v50 = vadd.f32 %v2021_v28, %v921_v5 }
 0x1a6   :  { %v957_v30 = vmax.f32 %v941_v50, 0.0 }
 0x1a8   :  { %v973_v37 = vpack.c.bf16 %v957_v30, %v957_v30 }
 0x1aa   :  { %990 = vst.msk [vmem:[%s2175_s3 + $0x3c] sm:$0xf] %vm974_vm1, %v973_v37 }

// kernel: net_forward.6
= control target key start
LH: loop header
LB: loop body
LE: loop exit
PB: predicated region body
PF: predicated region fallthrough
CT: control target
= control target key end

     0   :  { %vm311_vm0 = vcmask 261120   ;;  %vm511_vm1 = vcmask 519168   ;;  %s1012_s1 = inlined_call_operand.vmem [shape: bf16[288,64], index: 1, kind: input, shape index: {}]   ;;  %s1013_s0 = inlined_call_operand.vmem [shape: bf16[2,4,16,288], index: 0, kind: input, shape index: {}]   ;;  %s1014_s2 = inlined_call_operand.vmem [shape: f32[1,64], index: 2, kind: input, shape index: {}]   ;;  %s1015_s3 = inlined_call_operand.vmem [shape: bf16[2,16,64], index: 3, kind: output, shape index: {}]  }
   0x1   :  { %v727_v0 = vld [vmem:[%s1012_s1 + $0x38] sm:$0xff]  ;;  %v737_v2 = vld [vmem:[%s1012_s1 + $0x88] sm:$0xff]  ;;  %v726_v3 = vld [vmem:[%s1012_s1 + $0x30] sm:$0xff] }
   0x2   :  { %v735_v1 = vld [vmem:[%s1012_s1 + $0x78] sm:$0xff]  ;;  %336 = vmatpush.bf16.msra.mxu0 %v727_v0  ;;  %738 = vmatpush.bf16.msra.mxu3 %v727_v0  ;;  %v734_v4 = vld [vmem:[%s1012_s1 + $0x70] sm:$0xff]  ;;  %v736_v5 = vld [vmem:[%s1012_s1 + $0x80] sm:$0xff] }
   0x3   :  { %385 = vmatpush.bf16.msra.mxu1 %v735_v1  ;;  %440 = vmatpush.bf16.msra.mxu2 %v737_v2  ;;  %v530_v6 = vld [vmem:[%s1013_s0 + $0x8] sm:$0xf]  ;;  %v698_v7 = vld [vmem:[%s1013_s0 + $0x10] sm:$0xf0]  ;;  %v724_v11 = vld [vmem:[%s1012_s1 + $0x20] sm:$0xff] }
   0x4   :  { %v531_v8 = vor.u32 %v698_v7, %v530_v6  ;;  %v725_v9 = vld [vmem:[%s1012_s1 + $0x28] sm:$0xff]  ;;  %v732_v12 = vld [vmem:[%s1012_s1 + $0x60] sm:$0xff]  ;;  %v723_v13 = vld [vmem:[%s1012_s1 + $0x18] sm:$0xff] }
   0x5   :  { %v733_v10 = vld [vmem:[%s1012_s1 + $0x68] sm:$0xff]  ;;  %v731_v14 = vld [vmem:[%s1012_s1 + $0x58] sm:$0xff]  ;;  %v722_v15 = vld [vmem:[%s1012_s1 + $0x10] sm:$0xff] }
   0x6   :  { %337 = vmatpush.bf16.msra.mxu0 %v726_v3  ;;  %739 = vmatpush.bf16.msra.mxu3 %v726_v3  ;;  %v730_v16 = vld [vmem:[%s1012_s1 + $0x50] sm:$0xff]  ;;  %v542_v17 = vld [vmem:[%s1013_s0 + $0x20] sm:$0xf]  ;;  %v701_v18 = vld [vmem:[%s1013_s0 + $0x28] sm:$0xf0] }
   0x7   :  { %386 = vmatpush.bf16.msra.mxu1 %v734_v4  ;;  %441 = vmatpush.bf16.msra.mxu2 %v736_v5  ;;  %v543_v19 = vor.u32 %v701_v18, %v542_v17  ;;  %v721_v20 = vld [vmem:[%s1012_s1 + $0x8] sm:$0xff]  ;;  %v720_v22 = vld [vmem:[%s1012_s1] sm:$0xff]  ;;  %v594_v26 = vld [vmem:[%s1013_s0 + $0x90] sm:$0xf] }
   0x8   :  { %v729_v21 = vld [vmem:[%s1012_s1 + $0x48] sm:$0xff]  ;;  %v728_v23 = vld [vmem:[%s1012_s1 + $0x40] sm:$0xff]  ;;  %v715_v27 = vld [vmem:[%s1013_s0 + $0x98] sm:$0xf0] }
   0x9   :  { %v522_v24 = vld [vmem:[%s1013_s0] sm:$0xf]  ;;  %v697_v25 = vld [vmem:[%s1013_s0 + $0x8] sm:$0xf0]  ;;  %v696_v28 = vld [vmem:[%s1013_s0 + $0x4] sm:$0xf]  ;;  %v595_v31 = vor.u32 %v715_v27, %v594_v26 }
   0xa   :  { %688 = vmatmul.msk.bf16.vlgmr.msra.gmra.mxu2 %vm311_vm0, %v531_v8  ;;  %338 = vmatpush.bf16.msra.mxu0 %v725_v9  ;;  %v524_v29 = vld [vmem:[%s1013_s0 + $0xc] sm:$0xf0]  ;;  %v523_v30 = vor.u32 %v697_v25, %v522_v24  ;;  %v554_v33 = vld [vmem:[%s1013_s0 + $0x38] sm:$0xf]  ;;  %v704_v34 = vld [vmem:[%s1013_s0 + $0x40] sm:$0xf0] }
   0xb   :  { %740 = vmatpush.bf16.msra.mxu3 %v725_v9  ;;  %387 = vmatpush.bf16.msra.mxu1 %v733_v10  ;;  %v527_v32 = vor.u32 %v696_v28, %v524_v29  ;;  %v555_v35 = vor.u32 %v704_v34, %v554_v33  ;;  %v534_v36 = vld [vmem:[%s1013_s0 + $0x18] sm:$0xf]  ;;  %v700_v37 = vld [vmem:[%s1013_s0 + $0x20] sm:$0xf0]  ;;  %v606_v38 = vld [vmem:[%s1013_s0 + $0xa8] sm:$0xf] }
   0xc   :  { %v718_v39 = vld [vmem:[%s1013_s0 + $0xb0] sm:$0xf0]  ;;  %v699_v40 = vld [vmem:[%s1013_s0 + $0x1c] sm:$0xf]  ;;  %v536_v41 = vld [vmem:[%s1013_s0 + $0x24] sm:$0xf0]  ;;  %v535_v42 = vor.u32 %v700_v37, %v534_v36 }
   0xd   :  { %v607_v43 = vor.u32 %v718_v39, %v606_v38  ;;  %v539_v44 = vor.u32 %v699_v40, %v536_v41  ;;  %v566_v45 = vld [vmem:[%s1013_s0 + $0x50] sm:$0xf]  ;;  %v707_v46 = vld [vmem:[%s1013_s0 + $0x58] sm:$0xf0]  ;;  %v702_v50 = vld [vmem:[%s1013_s0 + $0x34] sm:$0xf] }
   0xe   :  { %339 = vmatpush.bf16.msra.mxu0 %v724_v11  ;;  %v567_v47 = vor.u32 %v707_v46, %v566_v45  ;;  %v546_v48 = vld [vmem:[%s1013_s0 + $0x30] sm:$0xf]  ;;  %v703_v49 = vld [vmem:[%s1013_s0 + $0x38] sm:$0xf0]  ;;  %v548_v51 = vld [vmem:[%s1013_s0 + $0x3c] sm:$0xf0] }
   0xf   :  { %741 = vmatpush.bf16.msra.mxu3 %v724_v11  ;;  %388 = vmatpush.bf16.msra.mxu1 %v732_v12  ;;  %v714_v52 = vld [vmem:[%s1013_s0 + $0x94] sm:$0xf]  ;;  %v596_v53 = vld [vmem:[%s1013_s0 + $0x9c] sm:$0xf0]  ;;  %v547_v54 = vor.u32 %v703_v49, %v546_v48  ;;  %v551_v55 = vor.u32 %v702_v50, %v548_v51  ;;  %v578_v57 = vld [vmem:[%s1013_s0 + $0x68] sm:$0xf] }
  0x10   :  { %v599_v56 = vor.u32 %v714_v52, %v596_v53  ;;  %v710_v58 = vld [vmem:[%s1013_s0 + $0x70] sm:$0xf0]  ;;  %v558_v60 = vld [vmem:[%s1013_s0 + $0x48] sm:$0xf]  ;;  %v705_v62 = vld [vmem:[%s1013_s0 + $0x4c] sm:$0xf] }
  0x11   :  { %v579_v59 = vor.u32 %v710_v58, %v578_v57  ;;  %v706_v61 = vld [vmem:[%s1013_s0 + $0x50] sm:$0xf0]  ;;  %v560_v63 = vld [vmem:[%s1013_s0 + $0x54] sm:$0xf0]  ;;  %v717_v0 = vld [vmem:[%s1013_s0 + $0xac] sm:$0xf] }
  0x12   :  { %340 = vmatpush.bf16.msra.mxu0 %v723_v13  ;;  %v559_v2 = vor.u32 %v706_v61, %v558_v60  ;;  %v563_v3 = vor.u32 %v705_v62, %v560_v63  ;;  %v590_v5 = vld [vmem:[%s1013_s0 + $0x80] sm:$0xf]  ;;  %v713_v6 = vld [vmem:[%s1013_s0 + $0x88] sm:$0xf0]  ;;  %v572_v11 = vld [vmem:[%s1013_s0 + $0x6c] sm:$0xf0] }
  0x13   :  { %742 = vmatpush.bf16.msra.mxu3 %v723_v13  ;;  %389 = vmatpush.bf16.msra.mxu1 %v731_v14  ;;  %v591_v7 = vor.u32 %v713_v6, %v590_v5  ;;  %v570_v8 = vld [vmem:[%s1013_s0 + $0x60] sm:$0xf]  ;;  %v709_v9 = vld [vmem:[%s1013_s0 + $0x68] sm:$0xf0]  ;;  %v582_v17 = vld [vmem:[%s1013_s0 + $0x78] sm:$0xf] }
  0x14   :  { %v712_v18 = vld [vmem:[%s1013_s0 + $0x80] sm:$0xf0]  ;;  %v719_v24 = vld [vmem:[%s1013_s0 + $0xb8] sm:$0xf0]  ;;  %v988_v63 = vld [vmem:[%s1014_s2] ss:$0 sm:$0xff] }
  0x16   :  { %341 = vmatpush.bf16.msra.mxu0 %v722_v15 }
  0x17   :  { %743 = vmatpush.bf16.msra.mxu3 %v722_v15  ;;  %390 = vmatpush.bf16.msra.mxu1 %v730_v16  ;;  %v716_v15 = vld [vmem:[%s1013_s0 + $0xa0] sm:$0xf0] }
  0x1a   :  { %689 = vmatmul.msk.bf16.gmra.mxu2 %vm311_vm0, %v543_v19  ;;  %342 = vmatpush.bf16.msra.mxu0 %v721_v20  ;;  %v711_v19 = vld [vmem:[%s1013_s0 + $0x7c] sm:$0xf] }
  0x1b   :  { %744 = vmatpush.bf16.msra.mxu3 %v721_v20  ;;  %391 = vmatpush.bf16.msra.mxu1 %v729_v21  ;;  %v584_v20 = vld [vmem:[%s1013_s0 + $0x84] sm:$0xf0] }
  0x1e   :  { %343 = vmatpush.bf16.msra.mxu0 %v720_v22 }
  0x1f   :  { %745 = vmatpush.bf16.msra.mxu3 %v720_v22  ;;  %392 = vmatpush.bf16.msra.mxu1 %v728_v23  ;;  %v587_v22 = vor.u32 %v711_v19, %v584_v20 }
  0x21   :  { %344 = vmatmul.bf16.vlgmr.msra.gmra.mxu0 %v523_v30 }
  0x22   :  { %374 = vmatmul.bf16.vlgmr.msra.gmra.mxu3 %v595_v31  ;;  %393 = vmatmul.bf16.vlgmr.msra.gmra.mxu1 %v527_v32 }
  0x23   :  { %746 = vmatpush.bf16.msrb.mxu3 %v735_v1  ;;  %v608_v1 = vld [vmem:[%s1013_s0 + $0xb4] sm:$0xf0] }
  0x27   :  { %747 = vmatpush.bf16.msrb.mxu3 %v734_v4  ;;  %v611_v4 = vor.u32 %v717_v0, %v608_v1 }
  0x2a   :  { %690 = vmatmul.msk.bf16.gmra.mxu2 %vm311_vm0, %v555_v35 }
  0x2b   :  { %748 = vmatpush.bf16.msrb.mxu3 %v733_v10  ;;  %v708_v10 = vld [vmem:[%s1013_s0 + $0x64] sm:$0xf] }
  0x2c   :  { %v575_v13 = vor.u32 %v708_v10, %v572_v11 }
  0x2f   :  { %749 = vmatpush.bf16.msrb.mxu3 %v732_v12  ;;  %v571_v12 = vor.u32 %v709_v9, %v570_v8 }
  0x31   :  { %349 = vmatmul.bf16.gmra.mxu0 %v535_v42 }
  0x32   :  { %379 = vmatmul.bf16.gmra.mxu3 %v607_v43  ;;  %398 = vmatmul.bf16.gmra.mxu1 %v539_v44 }
  0x33   :  { %750 = vmatpush.bf16.msrb.mxu3 %v731_v14  ;;  %v602_v14 = vld [vmem:[%s1013_s0 + $0x98] sm:$0xf] }
  0x37   :  { %751 = vmatpush.bf16.msrb.mxu3 %v730_v16  ;;  %v603_v16 = vor.u32 %v716_v15, %v602_v14 }
  0x3a   :  { %691 = vmatmul.msk.bf16.gmra.mxu2 %vm311_vm0, %v567_v47 }
  0x3b   :  { %752 = vmatpush.bf16.msrb.mxu3 %v729_v21  ;;  %v583_v21 = vor.u32 %v712_v18, %v582_v17 }
  0x3f   :  { %753 = vmatpush.bf16.msrb.mxu3 %v728_v23  ;;  %v614_v23 = vld [vmem:[%s1013_s0 + $0xb0] sm:$0xf] }
  0x40   :  { %v615_v25 = vor.u32 %v719_v24, %v614_v23 }
  0x41   :  { %354 = vmatmul.bf16.gmra.mxu0 %v547_v54 }
  0x42   :  { %403 = vmatmul.bf16.gmra.mxu1 %v551_v55  ;;  %423 = vmatmul.bf16.vlgmr.msrb.gmra.mxu3 %v599_v56 }
  0x4a   :  { %692 = vmatmul.msk.bf16.gmra.mxu2 %vm311_vm0, %v579_v59 }
  0x51   :  { %359 = vmatmul.bf16.gmra.mxu0 %v559_v2 }
  0x52   :  { %408 = vmatmul.bf16.gmra.mxu1 %v563_v3  ;;  %428 = vmatmul.bf16.gmra.mxu3 %v611_v4 }
  0x5a   :  { %693 = vmatmul.msk.bf16.gmra.mxu2 %vm311_vm0, %v591_v7 }
  0x61   :  { %364 = vmatmul.bf16.gmra.mxu0 %v571_v12 }
  0x62   :  { %413 = vmatmul.bf16.gmra.mxu1 %v575_v13 }
  0x6a   :  { %694 = vmatmul.msk.bf16.gmra.mxu2 %vm311_vm0, %v603_v16 }
  0x71   :  { %369 = vmatmul.bf16.gmra.mxu0 %v583_v21 }
  0x72   :  { %418 = vmatmul.bf16.gmra.mxu1 %v587_v22 }
  0x7a   :  { %695 = vmatmul.msk.bf16.gmra.mxu2 %vm311_vm0, %v615_v25 }
  0x8d   :  { %v443_v26 = vpop.f32.mrf.mxu2 }
  0x95   :  { %v445_v27 = vpop.f32.mrf.mxu2 }
  0x9d   :  { %v448_v28 = vpop.f32.mrf.mxu2 }
  0x9e   :  { %v345_v29 = vpop.f32.mrf.mxu0 }
  0x9f   :  { %v394_v30 = vpop.f32.mrf.mxu1 }
  0xa0   :  { %v395_v50 = vadd.f32 %v394_v30, %v345_v29 }
  0xa2   :  { %v444_v57 = vadd.f32 %v443_v26, %v395_v50 }
  0xa5   :  { %v450_v31 = vpop.f32.mrf.mxu2  ;;  %v981_v40 = vpop.f32.mrf.mxu3 }
  0xa6   :  { %v347_v32 = vpop.f32.mrf.mxu0 }
  0xa7   :  { %v396_v33 = vpop.f32.mrf.mxu1 }
  0xa8   :  { %v397_v1 = vadd.f32 %v396_v33, %v347_v32 }
  0xaa   :  { %v446_v10 = vadd.f32 %v445_v27, %v397_v1 }
  0xad   :  { %v453_v34 = vpop.f32.mrf.mxu2  ;;  %v983_v44 = vpop.f32.mrf.mxu3 }
  0xae   :  { %v350_v35 = vpop.f32.mrf.mxu0 }
  0xaf   :  { %v399_v36 = vpop.f32.mrf.mxu1 }
  0xb0   :  { %v400_v48 = vadd.f32 %v399_v36, %v350_v35 }
  0xb2   :  { %v449_v55 = vadd.f32 %v448_v28, %v400_v48 }
  0xb4   :  { %v483_v60 = vmax.f32 %v444_v57, %v449_v55 }
  0xb5   :  { %v455_v37 = vpop.f32.mrf.mxu2  ;;  %v380_v53 = vpop.f32.mrf.mxu3 }
  0xb6   :  { %v352_v38 = vpop.f32.mrf.mxu0 }
  0xb7   :  { %v401_v39 = vpop.f32.mrf.mxu1 }
  0xb8   :  { %v402_v61 = vadd.f32 %v401_v39, %v352_v38 }
  0xba   :  { %v451_v6 = vadd.f32 %v450_v31, %v402_v61 }
  0xbc   :  { %v484_v14 = vmax.f32 %v446_v10, %v451_v6 }
  0xbd   :  { %v458_v41 = vpop.f32.mrf.mxu2  ;;  %v382_v9 = vpop.f32.mrf.mxu3 }
  0xbe   :  { %v355_v42 = vpop.f32.mrf.mxu0 }
  0xbf   :  { %v404_v43 = vpop.f32.mrf.mxu1 }
  0xc0   :  { %v405_v51 = vadd.f32 %v404_v43, %v355_v42 }
  0xc2   :  { %v454_v58 = vadd.f32 %v453_v34, %v405_v51 }
  0xc5   :  { %v460_v45 = vpop.f32.mrf.mxu2  ;;  %v424_v23 = vpop.f32.mrf.mxu3 }
  0xc6   :  { %v357_v46 = vpop.f32.mrf.mxu0  ;;  %v425_v36 = vadd.f32 %v424_v23, %v981_v40 }
  0xc7   :  { %v406_v47 = vpop.f32.mrf.mxu1 }
  0xc8   :  { %v407_v2 = vadd.f32 %v406_v47, %v357_v46 }
  0xca   :  { %v456_v11 = vadd.f32 %v455_v37, %v407_v2 }
  0xcd   :  { %v463_v49 = vpop.f32.mrf.mxu2  ;;  %v426_v28 = vpop.f32.mrf.mxu3 }
  0xce   :  { %v360_v52 = vpop.f32.mrf.mxu0  ;;  %v427_v55 = vadd.f32 %v426_v28, %v983_v44 }
  0xcf   :  { %v409_v54 = vpop.f32.mrf.mxu1 }
  0xd0   :  { %v410_v56 = vadd.f32 %v409_v54, %v360_v52 }
  0xd2   :  { %v459_v59 = vadd.f32 %v458_v41, %v410_v56 }
  0xd4   :  { %v487_v62 = vmax.f32 %v454_v58, %v459_v59 }
  0xd5   :  { %v465_v0 = vpop.f32.mrf.mxu2  ;;  %v429_v33 = vpop.f32.mrf.mxu3 }
  0xd6   :  { %v491_v3 = vmax.f32 %v483_v60, %v487_v62  ;;  %v362_v4 = vpop.f32.mrf.mxu0  ;;  %v430_v37 = vadd.f32 %v429_v33, %v380_v53 }
  0xd7   :  { %v411_v5 = vpop.f32.mrf.mxu1 }
  0xd8   :  { %v499_v7 = vadd.f32 %v988_v63, %v491_v3  ;;  %v412_v8 = vadd.f32 %v411_v5, %v362_v4 }
  0xda   :  { %v503_v12 = vmax.f32 %v499_v7, 0.0  ;;  %v461_v13 = vadd.f32 %v460_v45, %v412_v8 }
  0xdc   :  { %v507_v15 = vpack.c.bf16 %v503_v12, %v503_v12  ;;  %v488_v16 = vmax.f32 %v456_v11, %v461_v13 }
  0xdd   :  { %v468_v17 = vpop.f32.mrf.mxu2  ;;  %v431_v51 = vpop.f32.mrf.mxu3 }
  0xde   :  { %512 = vst.msk [vmem:[%s1015_s3] sm:$0xf] %vm511_vm1, %v507_v15  ;;  %v492_v18 = vmax.f32 %v484_v14, %v488_v16  ;;  %v365_v19 = vpop.f32.mrf.mxu0  ;;  %v432_v56 = vadd.f32 %v431_v51, %v382_v9 }
  0xdf   :  { %v414_v20 = vpop.f32.mrf.mxu1 }
  0xe0   :  { %v500_v21 = vadd.f32 %v988_v63, %v492_v18  ;;  %v415_v35 = vadd.f32 %v414_v20, %v365_v19 }
  0xe2   :  { %v504_v22 = vmax.f32 %v500_v21, 0.0  ;;  %v464_v43 = vadd.f32 %v463_v49, %v415_v35 }
  0xe4   :  { %v508_v24 = vpack.c.bf16 %v504_v22, %v504_v22 }
  0xe5   :  { %v470_v25 = vpop.f32.mrf.mxu2 }
  0xe6   :  { %513 = vst.msk [vmem:[%s1015_s3 + $0x4] sm:$0xf] %vm511_vm1, %v508_v24  ;;  %v367_v26 = vpop.f32.mrf.mxu0 }
  0xe7   :  { %v416_v27 = vpop.f32.mrf.mxu1 }
  0xe8   :  { %v417_v52 = vadd.f32 %v416_v27, %v367_v26 }
  0xea   :  { %v466_v58 = vadd.f32 %v465_v0, %v417_v52 }
  0xed   :  { %v473_v29 = vpop.f32.mrf.mxu2 }
  0xee   :  { %v370_v30 = vpop.f32.mrf.mxu0  ;;  %v474_v45 = vadd.f32 %v473_v29, %v425_v36 }
  0xef   :  { %v419_v31 = vpop.f32.mrf.mxu1 }
  0xf0   :  { %v420_v34 = vadd.f32 %v419_v31, %v370_v30 }
  0xf2   :  { %v469_v38 = vadd.f32 %v468_v17, %v420_v34 }
  0xf4   :  { %v485_v47 = vmax.f32 %v464_v43, %v469_v38 }
  0xf5   :  { %v475_v32 = vpop.f32.mrf.mxu2 }
  0xf6   :  { %v372_v39 = vpop.f32.mrf.mxu0  ;;  %v476_v59 = vadd.f32 %v475_v32, %v427_v55 }
  0xf7   :  { %v421_v41 = vpop.f32.mrf.mxu1 }
  0xf8   :  { %v422_v48 = vadd.f32 %v421_v41, %v372_v39 }
  0xfa   :  { %v471_v57 = vadd.f32 %v470_v25, %v422_v48 }
  0xfc   :  { %v486_v49 = vmax.f32 %v466_v58, %v471_v57 }
  0xfd   :  { %v478_v42 = vpop.f32.mrf.mxu2 }
  0xfe   :  { %v479_v46 = vadd.f32 %v478_v42, %v430_v37 }
 0x100   :  { %v489_v50 = vmax.f32 %v474_v45, %v479_v46 }
 0x102   :  { %v493_v54 = vmax.f32 %v485_v47, %v489_v50 }
 0x104   :  { %v501_v40 = vadd.f32 %v988_v63, %v493_v54 }
 0x105   :  { %v480_v53 = vpop.f32.mrf.mxu2 }
 0x106   :  { %v505_v60 = vmax.f32 %v501_v40, 0.0  ;;  %v481_v61 = vadd.f32 %v480_v53, %v432_v56 }
 0x108   :  { %v509_v62 = vpack.c.bf16 %v505_v60, %v505_v60  ;;  %v490_v1 = vmax.f32 %v476_v59, %v481_v61 }
 0x10a   :  { %514 = vst.msk [vmem:[%s1015_s3 + $0x8] sm:$0xf] %vm511_vm1, %v509_v62  ;;  %v494_v2 = vmax.f32 %v486_v49, %v490_v1 }
 0x10c   :  { %v502_v44 = vadd.f32 %v988_v63, %v494_v2 }
 0x10e   :  { %v506_v3 = vmax.f32 %v502_v44, 0.0 }
 0x110   :  { %v510_v4 = vpack.c.bf16 %v506_v3, %v506_v3 }
 0x112   :  { %515 = vst.msk [vmem:[%s1015_s3 + $0xc] sm:$0xf] %vm511_vm1, %v510_v4 }

// kernel: net_forward.7
= control target key start
LH: loop header
LB: loop body
LE: loop exit
PB: predicated region body
PF: predicated region fallthrough
CT: control target
= control target key end

     0   :  { %s5563_s0 = inlined_call_operand.vmem [shape: bf16[2,1024], index: 0, kind: input, shape index: {}]   ;;  %s5564_s1 = inlined_call_operand.vmem [shape: bf16[1024,512], index: 1, kind: input, shape index: {}]   ;;  %s5565_s2 = inlined_call_operand.vmem [shape: f32[1,512], index: 2, kind: input, shape index: {}]   ;;  %s5566_s3 = inlined_call_operand.vmem [shape: bf16[512,128], index: 3, kind: input, shape index: {}]   ;;  %s5567_s4 = inlined_call_operand.vmem [shape: f32[1,128], index: 4, kind: input, shape index: {}]   ;;  %s5568_s5 = inlined_call_operand.hbm [shape: f32[2,128], index: 5, kind: output, shape index: {}]  }
   0x1   :  { %v2453_v0 = vld [vmem:[%s5564_s1 + $0xe0] sm:$0xf]  ;;  %v3521_v1 = vld [vmem:[%s5564_s1 + $0xec] sm:$0xf0] }
   0x2   :  { %v2581_v2 = vld [vmem:[%s5564_s1 + $0x1e0] sm:$0xf]  ;;  %v2454_v3 = vor.u32 %v3521_v1, %v2453_v0  ;;  %v3553_v4 = vld [vmem:[%s5564_s1 + $0x1ec] sm:$0xf0] }
   0x3   :  { %v2709_v5 = vld [vmem:[%s5564_s1 + $0x2e0] sm:$0xf]  ;;  %v3585_v6 = vld [vmem:[%s5564_s1 + $0x2ec] sm:$0xf0]  ;;  %v2582_v7 = vor.u32 %v3553_v4, %v2581_v2 }
   0x4   :  { %v2710_v8 = vor.u32 %v3585_v6, %v2709_v5  ;;  %v2837_v9 = vld [vmem:[%s5564_s1 + $0x3e0] sm:$0xf]  ;;  %v3617_v10 = vld [vmem:[%s5564_s1 + $0x3ec] sm:$0xf0]  ;;  %1586 = vmatpush.bf16.msra.mxu0 %v2454_v3 }
   0x5   :  { %v2437_v11 = vld [vmem:[%s5564_s1 + $0xc0] sm:$0xf]  ;;  %v2838_v12 = vor.u32 %v3617_v10, %v2837_v9  ;;  %v3517_v13 = vld [vmem:[%s5564_s1 + $0xcc] sm:$0xf0]  ;;  %1599 = vmatpush.bf16.msra.mxu1 %v2582_v7 }
   0x6   :  { %v2565_v14 = vld [vmem:[%s5564_s1 + $0x1c0] sm:$0xf]  ;;  %v3549_v15 = vld [vmem:[%s5564_s1 + $0x1cc] sm:$0xf0]  ;;  %1612 = vmatpush.bf16.msra.mxu2 %v2710_v8  ;;  %v2438_v16 = vor.u32 %v3517_v13, %v2437_v11 }
   0x7   :  { %v2566_v17 = vor.u32 %v3549_v15, %v2565_v14  ;;  %v2693_v18 = vld [vmem:[%s5564_s1 + $0x2c0] sm:$0xf]  ;;  %v3581_v19 = vld [vmem:[%s5564_s1 + $0x2cc] sm:$0xf0]  ;;  %1625 = vmatpush.bf16.msra.mxu3 %v2838_v12 }
   0x8   :  { %v2821_v20 = vld [vmem:[%s5564_s1 + $0x3c0] sm:$0xf]  ;;  %v2694_v21 = vor.u32 %v3581_v19, %v2693_v18  ;;  %v3613_v22 = vld [vmem:[%s5564_s1 + $0x3cc] sm:$0xf0]  ;;  %1587 = vmatpush.bf16.msra.mxu0 %v2438_v16 }
   0x9   :  { %v2421_v23 = vld [vmem:[%s5564_s1 + $0xa0] sm:$0xf]  ;;  %v3513_v24 = vld [vmem:[%s5564_s1 + $0xac] sm:$0xf0]  ;;  %v2822_v25 = vor.u32 %v3613_v22, %v2821_v20  ;;  %1600 = vmatpush.bf16.msra.mxu1 %v2566_v17 }
   0xa   :  { %v2549_v26 = vld [vmem:[%s5564_s1 + $0x1a0] sm:$0xf]  ;;  %v3545_v27 = vld [vmem:[%s5564_s1 + $0x1ac] sm:$0xf0]  ;;  %v2422_v29 = vor.u32 %v3513_v24, %v2421_v23  ;;  %1613 = vmatpush.bf16.msra.mxu2 %v2694_v21 }
   0xb   :  { %v2677_v28 = vld [vmem:[%s5564_s1 + $0x2a0] sm:$0xf]  ;;  %v3577_v30 = vld [vmem:[%s5564_s1 + $0x2ac] sm:$0xf0]  ;;  %v2550_v33 = vor.u32 %v3545_v27, %v2549_v26  ;;  %1626 = vmatpush.bf16.msra.mxu3 %v2822_v25 }
   0xc   :  { %v2805_v31 = vld [vmem:[%s5564_s1 + $0x3a0] sm:$0xf]  ;;  %v3609_v32 = vld [vmem:[%s5564_s1 + $0x3ac] sm:$0xf0]  ;;  %v2678_v34 = vor.u32 %v3577_v30, %v2677_v28  ;;  %1588 = vmatpush.bf16.msra.mxu0 %v2422_v29 }
   0xd   :  { %v2405_v35 = vld [vmem:[%s5564_s1 + $0x80] sm:$0xf]  ;;  %v3509_v36 = vld [vmem:[%s5564_s1 + $0x8c] sm:$0xf0]  ;;  %v2806_v38 = vor.u32 %v3609_v32, %v2805_v31  ;;  %1601 = vmatpush.bf16.msra.mxu1 %v2550_v33 }
   0xe   :  { %v2533_v37 = vld [vmem:[%s5564_s1 + $0x180] sm:$0xf]  ;;  %v3541_v39 = vld [vmem:[%s5564_s1 + $0x18c] sm:$0xf0]  ;;  %v2406_v44 = vor.u32 %v3509_v36, %v2405_v35  ;;  %1614 = vmatpush.bf16.msra.mxu2 %v2678_v34 }
   0xf   :  { %v2661_v40 = vld [vmem:[%s5564_s1 + $0x280] sm:$0xf]  ;;  %v3573_v41 = vld [vmem:[%s5564_s1 + $0x28c] sm:$0xf0]  ;;  %v2534_v45 = vor.u32 %v3541_v39, %v2533_v37  ;;  %1627 = vmatpush.bf16.msra.mxu3 %v2806_v38 }
  0x10   :  { %v2789_v42 = vld [vmem:[%s5564_s1 + $0x380] sm:$0xf]  ;;  %v3605_v43 = vld [vmem:[%s5564_s1 + $0x38c] sm:$0xf0]  ;;  %v2662_v46 = vor.u32 %v3573_v41, %v2661_v40  ;;  %1589 = vmatpush.bf16.msra.mxu0 %v2406_v44 }
  0x11   :  { %v2389_v47 = vld [vmem:[%s5564_s1 + $0x60] sm:$0xf]  ;;  %v3505_v48 = vld [vmem:[%s5564_s1 + $0x6c] sm:$0xf0]  ;;  %v2790_v50 = vor.u32 %v3605_v43, %v2789_v42  ;;  %1602 = vmatpush.bf16.msra.mxu1 %v2534_v45 }
  0x12   :  { %v2517_v49 = vld [vmem:[%s5564_s1 + $0x160] sm:$0xf]  ;;  %v3537_v51 = vld [vmem:[%s5564_s1 + $0x16c] sm:$0xf0]  ;;  %v2390_v56 = vor.u32 %v3505_v48, %v2389_v47  ;;  %1615 = vmatpush.bf16.msra.mxu2 %v2662_v46 }
  0x13   :  { %v2645_v52 = vld [vmem:[%s5564_s1 + $0x260] sm:$0xf]  ;;  %v3569_v53 = vld [vmem:[%s5564_s1 + $0x26c] sm:$0xf0]  ;;  %v2518_v57 = vor.u32 %v3537_v51, %v2517_v49  ;;  %1628 = vmatpush.bf16.msra.mxu3 %v2790_v50 }
  0x14   :  { %v2773_v54 = vld [vmem:[%s5564_s1 + $0x360] sm:$0xf]  ;;  %v3601_v55 = vld [vmem:[%s5564_s1 + $0x36c] sm:$0xf0]  ;;  %v2646_v58 = vor.u32 %v3569_v53, %v2645_v52  ;;  %1590 = vmatpush.bf16.msra.mxu0 %v2390_v56 }
  0x15   :  { %v2373_v59 = vld [vmem:[%s5564_s1 + $0x40] sm:$0xf]  ;;  %v3501_v60 = vld [vmem:[%s5564_s1 + $0x4c] sm:$0xf0]  ;;  %v2774_v62 = vor.u32 %v3601_v55, %v2773_v54  ;;  %1603 = vmatpush.bf16.msra.mxu1 %v2518_v57 }
  0x16   :  { %v2501_v61 = vld [vmem:[%s5564_s1 + $0x140] sm:$0xf]  ;;  %v3533_v63 = vld [vmem:[%s5564_s1 + $0x14c] sm:$0xf0]  ;;  %v2374_v4 = vor.u32 %v3501_v60, %v2373_v59  ;;  %1616 = vmatpush.bf16.msra.mxu2 %v2646_v58 }
  0x17   :  { %v2629_v0 = vld [vmem:[%s5564_s1 + $0x240] sm:$0xf]  ;;  %v3565_v1 = vld [vmem:[%s5564_s1 + $0x24c] sm:$0xf0]  ;;  %v2502_v5 = vor.u32 %v3533_v63, %v2501_v61  ;;  %1629 = vmatpush.bf16.msra.mxu3 %v2774_v62 }
  0x18   :  { %v2757_v2 = vld [vmem:[%s5564_s1 + $0x340] sm:$0xf]  ;;  %v3597_v3 = vld [vmem:[%s5564_s1 + $0x34c] sm:$0xf0]  ;;  %v2630_v6 = vor.u32 %v3565_v1, %v2629_v0  ;;  %1591 = vmatpush.bf16.msra.mxu0 %v2374_v4 }
  0x19   :  { %v2357_v7 = vld [vmem:[%s5564_s1 + $0x20] sm:$0xf]  ;;  %v3497_v8 = vld [vmem:[%s5564_s1 + $0x2c] sm:$0xf0]  ;;  %v2758_v10 = vor.u32 %v3597_v3, %v2757_v2  ;;  %1604 = vmatpush.bf16.msra.mxu1 %v2502_v5 }
  0x1a   :  { %v2485_v9 = vld [vmem:[%s5564_s1 + $0x120] sm:$0xf]  ;;  %v3529_v11 = vld [vmem:[%s5564_s1 + $0x12c] sm:$0xf0]  ;;  %v2358_v16 = vor.u32 %v3497_v8, %v2357_v7  ;;  %1617 = vmatpush.bf16.msra.mxu2 %v2630_v6 }
  0x1b   :  { %v2613_v12 = vld [vmem:[%s5564_s1 + $0x220] sm:$0xf]  ;;  %v3561_v13 = vld [vmem:[%s5564_s1 + $0x22c] sm:$0xf0]  ;;  %v2486_v19 = vor.u32 %v3529_v11, %v2485_v9  ;;  %1630 = vmatpush.bf16.msra.mxu3 %v2758_v10 }
  0x1c   :  { %v2741_v14 = vld [vmem:[%s5564_s1 + $0x320] sm:$0xf]  ;;  %v3593_v15 = vld [vmem:[%s5564_s1 + $0x32c] sm:$0xf0]  ;;  %v2614_v20 = vor.u32 %v3561_v13, %v2613_v12  ;;  %1592 = vmatpush.bf16.msra.mxu0 %v2358_v16 }
  0x1d   :  { %v2341_v17 = vld [vmem:[%s5564_s1] sm:$0xf]  ;;  %v3493_v18 = vld [vmem:[%s5564_s1 + $0xc] sm:$0xf0]  ;;  %v2742_v24 = vor.u32 %v3593_v15, %v2741_v14  ;;  %1605 = vmatpush.bf16.msra.mxu1 %v2486_v19 }
  0x1e   :  { %v2469_v21 = vld [vmem:[%s5564_s1 + $0x100] sm:$0xf]  ;;  %v3525_v22 = vld [vmem:[%s5564_s1 + $0x10c] sm:$0xf0]  ;;  %v2342_v31 = vor.u32 %v3493_v18, %v2341_v17  ;;  %1618 = vmatpush.bf16.msra.mxu2 %v2614_v20 }
  0x1f   :  { %v2597_v23 = vld [vmem:[%s5564_s1 + $0x200] sm:$0xf]  ;;  %v3557_v25 = vld [vmem:[%s5564_s1 + $0x20c] sm:$0xf0]  ;;  %v2470_v35 = vor.u32 %v3525_v22, %v2469_v21  ;;  %1631 = vmatpush.bf16.msra.mxu3 %v2742_v24 }
  0x20   :  { %v2725_v26 = vld [vmem:[%s5564_s1 + $0x300] sm:$0xf]  ;;  %v3589_v27 = vld [vmem:[%s5564_s1 + $0x30c] sm:$0xf0]  ;;  %v2598_v36 = vor.u32 %v3557_v25, %v2597_v23  ;;  %1593 = vmatpush.bf16.msra.mxu0 %v2342_v31 }
  0x21   :  { %v2965_v28 = vld [vmem:[%s5564_s1 + $0x4e0] sm:$0xf]  ;;  %v3649_v29 = vld [vmem:[%s5564_s1 + $0x4ec] sm:$0xf0]  ;;  %v2726_v39 = vor.u32 %v3589_v27, %v2725_v26  ;;  %1606 = vmatpush.bf16.msra.mxu1 %v2470_v35 }
  0x22   :  { %v3093_v30 = vld [vmem:[%s5564_s1 + $0x5e0] sm:$0xf]  ;;  %v3681_v32 = vld [vmem:[%s5564_s1 + $0x5ec] sm:$0xf0]  ;;  %v2966_v40 = vor.u32 %v3649_v29, %v2965_v28  ;;  %1619 = vmatpush.bf16.msra.mxu2 %v2598_v36 }
  0x23   :  { %v3221_v33 = vld [vmem:[%s5564_s1 + $0x6e0] sm:$0xf]  ;;  %v3713_v34 = vld [vmem:[%s5564_s1 + $0x6ec] sm:$0xf0]  ;;  %v3094_v41 = vor.u32 %v3681_v32, %v3093_v30  ;;  %1632 = vmatpush.bf16.msra.mxu3 %v2726_v39 }
  0x24   :  { %v3349_v37 = vld [vmem:[%s5564_s1 + $0x7e0] sm:$0xf]  ;;  %v3745_v38 = vld [vmem:[%s5564_s1 + $0x7ec] sm:$0xf0]  ;;  %v3222_v42 = vor.u32 %v3713_v34, %v3221_v33  ;;  %1638 = vmatpush.bf16.msrb.mxu0 %v2966_v40 }
  0x25   :  { %v2949_v43 = vld [vmem:[%s5564_s1 + $0x4c0] sm:$0xf]  ;;  %v3645_v44 = vld [vmem:[%s5564_s1 + $0x4cc] sm:$0xf0]  ;;  %v3350_v46 = vor.u32 %v3745_v38, %v3349_v37  ;;  %1651 = vmatpush.bf16.msrb.mxu1 %v3094_v41 }
  0x26   :  { %v3077_v45 = vld [vmem:[%s5564_s1 + $0x5c0] sm:$0xf]  ;;  %v3677_v47 = vld [vmem:[%s5564_s1 + $0x5cc] sm:$0xf0]  ;;  %v2950_v52 = vor.u32 %v3645_v44, %v2949_v43  ;;  %1664 = vmatpush.bf16.msrb.mxu2 %v3222_v42 }
  0x27   :  { %v3205_v48 = vld [vmem:[%s5564_s1 + $0x6c0] sm:$0xf]  ;;  %v3709_v49 = vld [vmem:[%s5564_s1 + $0x6cc] sm:$0xf0]  ;;  %v3078_v53 = vor.u32 %v3677_v47, %v3077_v45  ;;  %1677 = vmatpush.bf16.msrb.mxu3 %v3350_v46 }
  0x28   :  { %v3333_v50 = vld [vmem:[%s5564_s1 + $0x7c0] sm:$0xf]  ;;  %v3741_v51 = vld [vmem:[%s5564_s1 + $0x7cc] sm:$0xf0]  ;;  %v3206_v54 = vor.u32 %v3709_v49, %v3205_v48  ;;  %1639 = vmatpush.bf16.msrb.mxu0 %v2950_v52 }
  0x29   :  { %v2933_v55 = vld [vmem:[%s5564_s1 + $0x4a0] sm:$0xf]  ;;  %v3641_v56 = vld [vmem:[%s5564_s1 + $0x4ac] sm:$0xf0]  ;;  %v3334_v58 = vor.u32 %v3741_v51, %v3333_v50  ;;  %1652 = vmatpush.bf16.msrb.mxu1 %v3078_v53 }
  0x2a   :  { %v3061_v57 = vld [vmem:[%s5564_s1 + $0x5a0] sm:$0xf]  ;;  %v3673_v59 = vld [vmem:[%s5564_s1 + $0x5ac] sm:$0xf0]  ;;  %v2934_v0 = vor.u32 %v3641_v56, %v2933_v55  ;;  %1665 = vmatpush.bf16.msrb.mxu2 %v3206_v54 }
  0x2b   :  { %v3189_v60 = vld [vmem:[%s5564_s1 + $0x6a0] sm:$0xf]  ;;  %v3705_v61 = vld [vmem:[%s5564_s1 + $0x6ac] sm:$0xf0]  ;;  %v3062_v3 = vor.u32 %v3673_v59, %v3061_v57  ;;  %1678 = vmatpush.bf16.msrb.mxu3 %v3334_v58 }
  0x2c   :  { %v3317_v62 = vld [vmem:[%s5564_s1 + $0x7a0] sm:$0xf]  ;;  %v3737_v63 = vld [vmem:[%s5564_s1 + $0x7ac] sm:$0xf0]  ;;  %v3190_v4 = vor.u32 %v3705_v61, %v3189_v60  ;;  %1640 = vmatpush.bf16.msrb.mxu0 %v2934_v0 }
  0x2d   :  { %v2917_v1 = vld [vmem:[%s5564_s1 + $0x480] sm:$0xf]  ;;  %v3637_v5 = vld [vmem:[%s5564_s1 + $0x48c] sm:$0xf0]  ;;  %v3318_v7 = vor.u32 %v3737_v63, %v3317_v62  ;;  %1653 = vmatpush.bf16.msrb.mxu1 %v3062_v3  ;;  %v3551_v3 = vld [vmem:[%s5564_s1 + $0x1e4] sm:$0xf] }
  0x2e   :  { %v21_v2 = vld [vmem:[%s5563_s0] sm:$0xff]  ;;  %v3669_v8 = vld [vmem:[%s5564_s1 + $0x58c] sm:$0xf0]  ;;  %v2918_v13 = vor.u32 %v3637_v5, %v2917_v1  ;;  %1666 = vmatpush.bf16.msrb.mxu2 %v3190_v4  ;;  %v2583_v5 = vld [vmem:[%s5564_s1 + $0x1f0] sm:$0xf0] }
  0x2f   :  { %v3045_v6 = vld [vmem:[%s5564_s1 + $0x580] sm:$0xf]  ;;  %289 = vst [vmem:[#allocation1] ss:$9 sm:$0xff] %v21_v2  ;;  %v3701_v10 = vld [vmem:[%s5564_s1 + $0x68c] sm:$0xf0]  ;;  %1679 = vmatpush.bf16.msrb.mxu3 %v3318_v7 }
  0x30   :  { %v3173_v9 = vld [vmem:[%s5564_s1 + $0x680] sm:$0xf]  ;;  %v3733_v12 = vld [vmem:[%s5564_s1 + $0x78c] sm:$0xf0]  ;;  %v3046_v14 = vor.u32 %v3669_v8, %v3045_v6  ;;  %1641 = vmatpush.bf16.msrb.mxu0 %v2918_v13  ;;  %v3519_v1 = vld [vmem:[%s5564_s1 + $0xe4] sm:$0xf] }
  0x31   :  { %v3301_v11 = vld [vmem:[%s5564_s1 + $0x780] sm:$0xf]  ;;  %v3174_v15 = vor.u32 %v3701_v10, %v3173_v9  ;;  %v3633_v17 = vld [vmem:[%s5564_s1 + $0x46c] sm:$0xf0]  ;;  %v2455_v2 = vld [vmem:[%s5564_s1 + $0xf0] sm:$0xf0] }
  0x32   :  { %v2901_v16 = vld [vmem:[%s5564_s1 + $0x460] sm:$0xf]  ;;  %v3302_v19 = vor.u32 %v3733_v12, %v3301_v11  ;;  %v3665_v20 = vld [vmem:[%s5564_s1 + $0x56c] sm:$0xf0]  ;;  %1654 = vmatpush.bf16.msrb.mxu1 %v3046_v14  ;;  %v3583_v6 = vld [vmem:[%s5564_s1 + $0x2e4] sm:$0xf]  ;;  %v2458_v13 = vor.u32 %v3519_v1, %v2455_v2  ;;  %v2586_v14 = vor.u32 %v3551_v3, %v2583_v5 }
  0x33   :  { %v3029_v18 = vld [vmem:[%s5564_s1 + $0x560] sm:$0xf]  ;;  %v3697_v22 = vld [vmem:[%s5564_s1 + $0x66c] sm:$0xf0]  ;;  %v2902_v26 = vor.u32 %v3633_v17, %v2901_v16  ;;  %1667 = vmatpush.bf16.msrb.mxu2 %v3174_v15  ;;  %v2711_v7 = vld [vmem:[%s5564_s1 + $0x2f0] sm:$0xf0] }
  0x34   :  { %v3157_v21 = vld [vmem:[%s5564_s1 + $0x660] sm:$0xf]  ;;  %v3729_v24 = vld [vmem:[%s5564_s1 + $0x76c] sm:$0xf0]  ;;  %v3030_v30 = vor.u32 %v3665_v20, %v3029_v18  ;;  %1680 = vmatpush.bf16.msrb.mxu3 %v3302_v19  ;;  %v3615_v10 = vld [vmem:[%s5564_s1 + $0x3e4] sm:$0xf]  ;;  %v2714_v15 = vor.u32 %v3583_v6, %v2711_v7 }
  0x35   :  { %v3285_v23 = vld [vmem:[%s5564_s1 + $0x760] sm:$0xf]  ;;  %v3158_v31 = vor.u32 %v3697_v22, %v3157_v21  ;;  %v3629_v32 = vld [vmem:[%s5564_s1 + $0x44c] sm:$0xf0]  ;;  %1642 = vmatpush.bf16.msrb.mxu0 %v2902_v26  ;;  %v2839_v11 = vld [vmem:[%s5564_s1 + $0x3f0] sm:$0xf0] }
  0x36   :  { %v2885_v25 = vld [vmem:[%s5564_s1 + $0x440] sm:$0xf]  ;;  %v4164_v27 = vld [vmem:[#allocation1 + $0x12] sm:$0xff]  ;;  %v4176_v34 = vld [vmem:[#allocation1 + $0x9] sm:$0xff]  ;;  %v3286_v35 = vor.u32 %v3729_v24, %v3285_v23  ;;  %1655 = vmatpush.bf16.msrb.mxu1 %v3030_v30  ;;  %v2842_v19 = vor.u32 %v3615_v10, %v2839_v11 }
  0x37   :  { %v4166_v28 = vld [vmem:[#allocation1] sm:$0xff]  ;;  %v3661_v36 = vld [vmem:[%s5564_s1 + $0x54c] sm:$0xf0]  ;;  %1620 = vmatmul.bf16.vlgmr.msra.gmra.mxu2 %v4164_v27  ;;  %v2886_v41 = vor.u32 %v3629_v32, %v2885_v25  ;;  %1607 = vmatmul.bf16.vlgmr.msra.gmra.mxu1 %v4176_v34  ;;  %v2439_v17 = vld [vmem:[%s5564_s1 + $0xd0] sm:$0xf0] }
  0x38   :  { %v4168_v29 = vld [vmem:[#allocation1 + $0x1b] sm:$0xff]  ;;  %v3693_v38 = vld [vmem:[%s5564_s1 + $0x64c] sm:$0xf0]  ;;  %1594 = vmatmul.bf16.vlgmr.msra.gmra.mxu0 %v4166_v28  ;;  %1668 = vmatpush.bf16.msrb.mxu2 %v3158_v31  ;;  %v3515_v16 = vld [vmem:[%s5564_s1 + $0xc4] sm:$0xf] }
  0x39   :  { %v3013_v33 = vld [vmem:[%s5564_s1 + $0x540] sm:$0xf]  ;;  %v3725_v40 = vld [vmem:[%s5564_s1 + $0x74c] sm:$0xf0]  ;;  %1633 = vmatmul.bf16.vlgmr.msra.gmra.mxu3 %v4168_v29  ;;  %1643 = vmatpush.bf16.msrb.mxu0 %v2886_v41  ;;  %v3547_v18 = vld [vmem:[%s5564_s1 + $0x1c4] sm:$0xf]  ;;  %v2442_v26 = vor.u32 %v3515_v16, %v2439_v17 }
  0x3a   :  { %v3141_v37 = vld [vmem:[%s5564_s1 + $0x640] sm:$0xf]  ;;  %v3014_v42 = vor.u32 %v3661_v36, %v3013_v33  ;;  %v3625_v45 = vld [vmem:[%s5564_s1 + $0x42c] sm:$0xf0]  ;;  %1681 = vmatpush.bf16.msrb.mxu3 %v3286_v35  ;;  %v2567_v20 = vld [vmem:[%s5564_s1 + $0x1d0] sm:$0xf0] }
  0x3b   :  { %v3269_v39 = vld [vmem:[%s5564_s1 + $0x740] sm:$0xf]  ;;  %v3142_v43 = vor.u32 %v3693_v38, %v3141_v37  ;;  %v3657_v48 = vld [vmem:[%s5564_s1 + $0x52c] sm:$0xf0]  ;;  %v3579_v21 = vld [vmem:[%s5564_s1 + $0x2c4] sm:$0xf]  ;;  %v2570_v33 = vor.u32 %v3547_v18, %v2567_v20 }
  0x3c   :  { %v2869_v44 = vld [vmem:[%s5564_s1 + $0x420] sm:$0xf]  ;;  %v3270_v47 = vor.u32 %v3725_v40, %v3269_v39  ;;  %v3689_v50 = vld [vmem:[%s5564_s1 + $0x62c] sm:$0xf0]  ;;  %1656 = vmatpush.bf16.msrb.mxu1 %v3014_v42  ;;  %v2695_v22 = vld [vmem:[%s5564_s1 + $0x2d0] sm:$0xf0] }
  0x3d   :  { %v2997_v46 = vld [vmem:[%s5564_s1 + $0x520] sm:$0xf]  ;;  %v3721_v52 = vld [vmem:[%s5564_s1 + $0x72c] sm:$0xf0]  ;;  %v2870_v53 = vor.u32 %v3625_v45, %v2869_v44  ;;  %1669 = vmatpush.bf16.msrb.mxu2 %v3142_v43  ;;  %v3611_v23 = vld [vmem:[%s5564_s1 + $0x3c4] sm:$0xf]  ;;  %v2698_v35 = vor.u32 %v3579_v21, %v2695_v22 }
  0x3e   :  { %v3125_v49 = vld [vmem:[%s5564_s1 + $0x620] sm:$0xf]  ;;  %v3621_v55 = vld [vmem:[%s5564_s1 + $0x40c] sm:$0xf0]  ;;  %v2998_v56 = vor.u32 %v3657_v48, %v2997_v46  ;;  %1682 = vmatpush.bf16.msrb.mxu3 %v3270_v47  ;;  %v2823_v24 = vld [vmem:[%s5564_s1 + $0x3d0] sm:$0xf0] }
  0x3f   :  { %v3253_v51 = vld [vmem:[%s5564_s1 + $0x720] sm:$0xf]  ;;  %v3126_v57 = vor.u32 %v3689_v50, %v3125_v49  ;;  %v3653_v59 = vld [vmem:[%s5564_s1 + $0x50c] sm:$0xf0]  ;;  %1644 = vmatpush.bf16.msrb.mxu0 %v2870_v53  ;;  %v4293_v25 = vld [vmem:[#allocation1 + $0x36] sm:$0xff]  ;;  %v2826_v39 = vor.u32 %v3611_v23, %v2823_v24 }
  0x40   :  { %v2853_v54 = vld [vmem:[%s5564_s1 + $0x400] sm:$0xf]  ;;  %v3254_v61 = vor.u32 %v3721_v52, %v3253_v51  ;;  %v3685_v62 = vld [vmem:[%s5564_s1 + $0x60c] sm:$0xf0]  ;;  %1657 = vmatpush.bf16.msrb.mxu1 %v2998_v56  ;;  %v3511_v30 = vld [vmem:[%s5564_s1 + $0xa4] sm:$0xf] }
  0x41   :  { %v2981_v58 = vld [vmem:[%s5564_s1 + $0x500] sm:$0xf]  ;;  %v3717_v0 = vld [vmem:[%s5564_s1 + $0x70c] sm:$0xf0]  ;;  %v2854_v4 = vor.u32 %v3621_v55, %v2853_v54  ;;  %1670 = vmatpush.bf16.msrb.mxu2 %v3126_v57  ;;  %v4298_v31 = vld [vmem:[#allocation1 + $0x24] sm:$0xff] }
  0x42   :  { %v3109_v60 = vld [vmem:[%s5564_s1 + $0x600] sm:$0xf]  ;;  %v2982_v8 = vor.u32 %v3653_v59, %v2981_v58  ;;  %1683 = vmatpush.bf16.msrb.mxu3 %v3254_v61  ;;  %v2423_v36 = vld [vmem:[%s5564_s1 + $0xb0] sm:$0xf0]  ;;  %v3543_v37 = vld [vmem:[%s5564_s1 + $0x1a4] sm:$0xf] }
  0x43   :  { %v3237_v63 = vld [vmem:[%s5564_s1 + $0x700] sm:$0xf]  ;;  %v3110_v9 = vor.u32 %v3685_v62, %v3109_v60  ;;  %1645 = vmatpush.bf16.msrb.mxu0 %v2854_v4  ;;  %v4308_v38 = vld [vmem:[#allocation1 + $0x2d] sm:$0xff]  ;;  %v3575_v41 = vld [vmem:[%s5564_s1 + $0x2a4] sm:$0xf]  ;;  %v2426_v45 = vor.u32 %v3511_v30, %v2423_v36 }
  0x44   :  { %v3238_v12 = vor.u32 %v3717_v0, %v3237_v63  ;;  %1658 = vmatpush.bf16.msrb.mxu1 %v2982_v8  ;;  %v4300_v32 = vld [vmem:[#allocation1 + $0x3f] sm:$0xff]  ;;  %v2551_v40 = vld [vmem:[%s5564_s1 + $0x1b0] sm:$0xf0] }
  0x45   :  { %1671 = vmatpush.bf16.msrb.mxu2 %v3110_v9  ;;  %v2679_v42 = vld [vmem:[%s5564_s1 + $0x2b0] sm:$0xf0]  ;;  %v3607_v43 = vld [vmem:[%s5564_s1 + $0x3a4] sm:$0xf]  ;;  %v2554_v46 = vor.u32 %v3543_v37, %v2551_v40 }
  0x46   :  { %1684 = vmatpush.bf16.msrb.mxu3 %v3238_v12  ;;  %v2807_v44 = vld [vmem:[%s5564_s1 + $0x3b0] sm:$0xf0]  ;;  %v2682_v47 = vor.u32 %v3575_v41, %v2679_v42  ;;  %v3507_v48 = vld [vmem:[%s5564_s1 + $0x84] sm:$0xf] }
  0x47   :  { %1690 = vmatpush.bf16.msra.mxu0 %v2458_v13  ;;  %1659 = vmatmul.bf16.vlgmr.msrb.gmra.mxu1 %v4308_v38  ;;  %v2407_v49 = vld [vmem:[%s5564_s1 + $0x90] sm:$0xf0]  ;;  %v3539_v50 = vld [vmem:[%s5564_s1 + $0x184] sm:$0xf]  ;;  %v2810_v51 = vor.u32 %v3607_v43, %v2807_v44 }
  0x48   :  { %1703 = vmatpush.bf16.msra.mxu1 %v2586_v14  ;;  %1672 = vmatmul.bf16.vlgmr.msrb.gmra.mxu2 %v4293_v25  ;;  %v2535_v52 = vld [vmem:[%s5564_s1 + $0x190] sm:$0xf0]  ;;  %v3571_v53 = vld [vmem:[%s5564_s1 + $0x284] sm:$0xf]  ;;  %v2410_v57 = vor.u32 %v3507_v48, %v2407_v49 }
  0x49   :  { %1716 = vmatpush.bf16.msra.mxu2 %v2714_v15  ;;  %1646 = vmatmul.bf16.vlgmr.msrb.gmra.mxu0 %v4298_v31  ;;  %v2663_v54 = vld [vmem:[%s5564_s1 + $0x290] sm:$0xf0]  ;;  %v3603_v55 = vld [vmem:[%s5564_s1 + $0x384] sm:$0xf]  ;;  %v2538_v58 = vor.u32 %v3539_v50, %v2535_v52 }
  0x4a   :  { %1729 = vmatpush.bf16.msra.mxu3 %v2842_v19  ;;  %v2791_v56 = vld [vmem:[%s5564_s1 + $0x390] sm:$0xf0]  ;;  %v2666_v59 = vor.u32 %v3571_v53, %v2663_v54  ;;  %v3503_v60 = vld [vmem:[%s5564_s1 + $0x64] sm:$0xf] }
  0x4b   :  { %1685 = vmatmul.bf16.vlgmr.msrb.gmra.mxu3 %v4300_v32  ;;  %1691 = vmatpush.bf16.msra.mxu0 %v2442_v26  ;;  %v2391_v61 = vld [vmem:[%s5564_s1 + $0x70] sm:$0xf0]  ;;  %v3535_v62 = vld [vmem:[%s5564_s1 + $0x164] sm:$0xf]  ;;  %v2794_v63 = vor.u32 %v3603_v55, %v2791_v56 }
  0x4c   :  { %1704 = vmatpush.bf16.msra.mxu1 %v2570_v33  ;;  %v2519_v0 = vld [vmem:[%s5564_s1 + $0x170] sm:$0xf0]  ;;  %v3567_v1 = vld [vmem:[%s5564_s1 + $0x264] sm:$0xf]  ;;  %v2394_v5 = vor.u32 %v3503_v60, %v2391_v61 }
  0x4d   :  { %1717 = vmatpush.bf16.msra.mxu2 %v2698_v35  ;;  %v2647_v2 = vld [vmem:[%s5564_s1 + $0x270] sm:$0xf0]  ;;  %v3599_v3 = vld [vmem:[%s5564_s1 + $0x364] sm:$0xf]  ;;  %v2522_v6 = vor.u32 %v3535_v62, %v2519_v0 }
  0x4e   :  { %1730 = vmatpush.bf16.msra.mxu3 %v2826_v39  ;;  %v2775_v4 = vld [vmem:[%s5564_s1 + $0x370] sm:$0xf0]  ;;  %v2650_v7 = vor.u32 %v3567_v1, %v2647_v2  ;;  %v3499_v8 = vld [vmem:[%s5564_s1 + $0x44] sm:$0xf] }
  0x4f   :  { %1692 = vmatpush.bf16.msra.mxu0 %v2426_v45  ;;  %v2375_v9 = vld [vmem:[%s5564_s1 + $0x50] sm:$0xf0]  ;;  %v3531_v10 = vld [vmem:[%s5564_s1 + $0x144] sm:$0xf]  ;;  %v2778_v11 = vor.u32 %v3599_v3, %v2775_v4 }
  0x50   :  { %1705 = vmatpush.bf16.msra.mxu1 %v2554_v46  ;;  %v2503_v12 = vld [vmem:[%s5564_s1 + $0x150] sm:$0xf0]  ;;  %v3563_v13 = vld [vmem:[%s5564_s1 + $0x244] sm:$0xf]  ;;  %v2378_v17 = vor.u32 %v3499_v8, %v2375_v9 }
  0x51   :  { %1718 = vmatpush.bf16.msra.mxu2 %v2682_v47  ;;  %v2631_v14 = vld [vmem:[%s5564_s1 + $0x250] sm:$0xf0]  ;;  %v3595_v15 = vld [vmem:[%s5564_s1 + $0x344] sm:$0xf]  ;;  %v2506_v18 = vor.u32 %v3531_v10, %v2503_v12 }
  0x52   :  { %1731 = vmatpush.bf16.msra.mxu3 %v2810_v51  ;;  %v2759_v16 = vld [vmem:[%s5564_s1 + $0x350] sm:$0xf0]  ;;  %v2634_v19 = vor.u32 %v3563_v13, %v2631_v14  ;;  %v3495_v20 = vld [vmem:[%s5564_s1 + $0x24] sm:$0xf] }
  0x53   :  { %1693 = vmatpush.bf16.msra.mxu0 %v2410_v57  ;;  %v2359_v21 = vld [vmem:[%s5564_s1 + $0x30] sm:$0xf0]  ;;  %v3527_v22 = vld [vmem:[%s5564_s1 + $0x124] sm:$0xf]  ;;  %v2762_v23 = vor.u32 %v3595_v15, %v2759_v16 }
  0x54   :  { %1706 = vmatpush.bf16.msra.mxu1 %v2538_v58  ;;  %v2487_v24 = vld [vmem:[%s5564_s1 + $0x130] sm:$0xf0]  ;;  %v3559_v26 = vld [vmem:[%s5564_s1 + $0x224] sm:$0xf]  ;;  %v2362_v37 = vor.u32 %v3495_v20, %v2359_v21 }
  0x55   :  { %1719 = vmatpush.bf16.msra.mxu2 %v2666_v59  ;;  %v2615_v30 = vld [vmem:[%s5564_s1 + $0x230] sm:$0xf0]  ;;  %v3591_v33 = vld [vmem:[%s5564_s1 + $0x324] sm:$0xf]  ;;  %v2490_v42 = vor.u32 %v3527_v22, %v2487_v24 }
  0x56   :  { %1732 = vmatpush.bf16.msra.mxu3 %v2794_v63  ;;  %v2743_v35 = vld [vmem:[%s5564_s1 + $0x330] sm:$0xf0]  ;;  %v3491_v36 = vld [vmem:[%s5564_s1 + $0x4] sm:$0xf]  ;;  %v2618_v43 = vor.u32 %v3559_v26, %v2615_v30 }
  0x57   :  { %1694 = vmatpush.bf16.msra.mxu0 %v2394_v5  ;;  %v2343_v39 = vld [vmem:[%s5564_s1 + $0x10] sm:$0xf0]  ;;  %v3523_v40 = vld [vmem:[%s5564_s1 + $0x104] sm:$0xf]  ;;  %v2746_v47 = vor.u32 %v3591_v33, %v2743_v35 }
  0x58   :  { %1707 = vmatpush.bf16.msra.mxu1 %v2522_v6  ;;  %v2471_v41 = vld [vmem:[%s5564_s1 + $0x110] sm:$0xf0]  ;;  %v3555_v44 = vld [vmem:[%s5564_s1 + $0x204] sm:$0xf] }
  0x59   :  { %1720 = vmatpush.bf16.msra.mxu2 %v2650_v7  ;;  %v2599_v45 = vld [vmem:[%s5564_s1 + $0x210] sm:$0xf0]  ;;  %v3587_v46 = vld [vmem:[%s5564_s1 + $0x304] sm:$0xf] }
  0x5a   :  { %1733 = vmatpush.bf16.msra.mxu3 %v2778_v11  ;;  %v2727_v48 = vld [vmem:[%s5564_s1 + $0x310] sm:$0xf0]  ;;  %v3647_v49 = vld [vmem:[%s5564_s1 + $0x4e4] sm:$0xf] }
  0x5b   :  { %1695 = vmatpush.bf16.msra.mxu0 %v2378_v17  ;;  %v2967_v50 = vld [vmem:[%s5564_s1 + $0x4f0] sm:$0xf0]  ;;  %v3679_v51 = vld [vmem:[%s5564_s1 + $0x5e4] sm:$0xf] }
  0x5c   :  { %1708 = vmatpush.bf16.msra.mxu1 %v2506_v18 }
  0x5d   :  { %1721 = vmatpush.bf16.msra.mxu2 %v2634_v19 }
  0x5e   :  { %1734 = vmatpush.bf16.msra.mxu3 %v2762_v23 }
  0x5f   :  { %10 = vsyncpa [#allocation3], 0  ;;  %1696 = vmatpush.bf16.msra.mxu0 %v2362_v37  ;;  %v2346_v52 = vor.u32 %v3491_v36, %v2343_v39  ;;  %v3095_v53 = vld [vmem:[%s5564_s1 + $0x5f0] sm:$0xf0]  ;;  %v3711_v54 = vld [vmem:[%s5564_s1 + $0x6e4] sm:$0xf]  ;;  %v2474_v56 = vor.u32 %v3523_v40, %v2471_v41  ;;  %v2602_v57 = vor.u32 %v3555_v44, %v2599_v45  ;;  %v2730_v60 = vor.u32 %v3587_v46, %v2727_v48 }
  0x60   :  { %v3223_v55 = vld [vmem:[%s5564_s1 + $0x6f0] sm:$0xf0]  ;;  %1709 = vmatpush.bf16.msra.mxu1 %v2490_v42  ;;  %v3743_v58 = vld [vmem:[%s5564_s1 + $0x7e4] sm:$0xf]  ;;  %v2970_v61 = vor.u32 %v3647_v49, %v2967_v50  ;;  %v3098_v62 = vor.u32 %v3679_v51, %v3095_v53  ;;  %s3815_s10 = smov [#allocation2]   ;;  %s2330_s13 = sshll.u32 %s5568_s5, 4  ;;  %s2331_s13 = int_to_ptr.hbm [resolvable:$true] %s2330_s13 }
  0x61   :  { %1722 = vmatpush.bf16.msra.mxu2 %v2618_v43  ;;  %v3351_v59 = vld [vmem:[%s5564_s1 + $0x7f0] sm:$0xf0]  ;;  %v3226_v63 = vor.u32 %v3711_v54, %v3223_v55  ;;  %v3643_v0 = vld [vmem:[%s5564_s1 + $0x4c4] sm:$0xf]  ;;  %s2328_s11 = sshll.u32 %s3815_s10, 4  ;;  %s2329_s11 = int_to_ptr.vmem [resolvable:$true] %s2328_s11 }
  0x62   :  { %1735 = vmatpush.bf16.msra.mxu3 %v2746_v47  ;;  %v2951_v1 = vld [vmem:[%s5564_s1 + $0x4d0] sm:$0xf0]  ;;  %v3675_v2 = vld [vmem:[%s5564_s1 + $0x5c4] sm:$0xf]  ;;  %v3354_v3 = vor.u32 %v3743_v58, %v3351_v59 }
  0x63   :  { %1697 = vmatpush.bf16.msra.mxu0 %v2346_v52  ;;  %v3079_v4 = vld [vmem:[%s5564_s1 + $0x5d0] sm:$0xf0]  ;;  %v3707_v5 = vld [vmem:[%s5564_s1 + $0x6c4] sm:$0xf]  ;;  %v2954_v9 = vor.u32 %v3643_v0, %v2951_v1 }
  0x64   :  { %v3207_v6 = vld [vmem:[%s5564_s1 + $0x6d0] sm:$0xf0]  ;;  %1710 = vmatpush.bf16.msra.mxu1 %v2474_v56  ;;  %v3739_v7 = vld [vmem:[%s5564_s1 + $0x7c4] sm:$0xf]  ;;  %v3082_v10 = vor.u32 %v3675_v2, %v3079_v4 }
  0x65   :  { %1723 = vmatpush.bf16.msra.mxu2 %v2602_v57  ;;  %v3335_v8 = vld [vmem:[%s5564_s1 + $0x7d0] sm:$0xf0]  ;;  %v3210_v11 = vor.u32 %v3707_v5, %v3207_v6  ;;  %v3639_v12 = vld [vmem:[%s5564_s1 + $0x4a4] sm:$0xf] }
  0x66   :  { %1736 = vmatpush.bf16.msra.mxu3 %v2730_v60  ;;  %v2935_v13 = vld [vmem:[%s5564_s1 + $0x4b0] sm:$0xf0]  ;;  %v3671_v14 = vld [vmem:[%s5564_s1 + $0x5a4] sm:$0xf]  ;;  %v3338_v15 = vor.u32 %v3739_v7, %v3335_v8  ;;  %1698 = vmatmul.bf16.vlgmr.msra.gmra.mxu0 %v4166_v28 }
  0x67   :  { %1742 = vmatpush.bf16.msrb.mxu0 %v2970_v61  ;;  %v3063_v16 = vld [vmem:[%s5564_s1 + $0x5b0] sm:$0xf0]  ;;  %v3703_v17 = vld [vmem:[%s5564_s1 + $0x6a4] sm:$0xf]  ;;  %v2938_v21 = vor.u32 %v3639_v12, %v2935_v13  ;;  %1711 = vmatmul.bf16.vlgmr.msra.gmra.mxu1 %v4176_v34 }
  0x68   :  { %1755 = vmatpush.bf16.msrb.mxu1 %v3098_v62  ;;  %v3191_v18 = vld [vmem:[%s5564_s1 + $0x6b0] sm:$0xf0]  ;;  %1724 = vmatmul.bf16.vlgmr.msra.gmra.mxu2 %v4164_v27  ;;  %v3735_v19 = vld [vmem:[%s5564_s1 + $0x7a4] sm:$0xf]  ;;  %v3066_v22 = vor.u32 %v3671_v14, %v3063_v16 }
  0x69   :  { %1768 = vmatpush.bf16.msrb.mxu2 %v3226_v63  ;;  %v3319_v20 = vld [vmem:[%s5564_s1 + $0x7b0] sm:$0xf0]  ;;  %1737 = vmatmul.bf16.vlgmr.msra.gmra.mxu3 %v4168_v29  ;;  %v3194_v23 = vor.u32 %v3703_v17, %v3191_v18  ;;  %v3635_v24 = vld [vmem:[%s5564_s1 + $0x484] sm:$0xf] }
  0x6a   :  { %1781 = vmatpush.bf16.msrb.mxu3 %v3354_v3  ;;  %v2919_v26 = vld [vmem:[%s5564_s1 + $0x490] sm:$0xf0]  ;;  %v3667_v30 = vld [vmem:[%s5564_s1 + $0x584] sm:$0xf]  ;;  %v3322_v33 = vor.u32 %v3735_v19, %v3319_v20 }
  0x6b   :  { %1743 = vmatpush.bf16.msrb.mxu0 %v2954_v9  ;;  %v3047_v35 = vld [vmem:[%s5564_s1 + $0x590] sm:$0xf0]  ;;  %v3699_v36 = vld [vmem:[%s5564_s1 + $0x684] sm:$0xf]  ;;  %v2922_v41 = vor.u32 %v3635_v24, %v2919_v26  ;;  %v2461_v26 = vld [vmem:[%s5564_s1 + $0xe8] sm:$0xf] }
  0x6c   :  { %1756 = vmatpush.bf16.msrb.mxu1 %v3082_v10  ;;  %v3175_v37 = vld [vmem:[%s5564_s1 + $0x690] sm:$0xf0]  ;;  %v3731_v39 = vld [vmem:[%s5564_s1 + $0x784] sm:$0xf]  ;;  %v3050_v42 = vor.u32 %v3667_v30, %v3047_v35  ;;  %v3522_v30 = vld [vmem:[%s5564_s1 + $0xf4] sm:$0xf0] }
  0x6d   :  { %1769 = vmatpush.bf16.msrb.mxu2 %v3210_v11  ;;  %v3303_v40 = vld [vmem:[%s5564_s1 + $0x790] sm:$0xf0]  ;;  %v3178_v43 = vor.u32 %v3699_v36, %v3175_v37  ;;  %v3631_v44 = vld [vmem:[%s5564_s1 + $0x464] sm:$0xf]  ;;  %v3554_v36 = vld [vmem:[%s5564_s1 + $0x1f4] sm:$0xf0] }
  0x6e   :  { %1782 = vmatpush.bf16.msrb.mxu3 %v3338_v15  ;;  %v2903_v45 = vld [vmem:[%s5564_s1 + $0x470] sm:$0xf0]  ;;  %v3663_v46 = vld [vmem:[%s5564_s1 + $0x564] sm:$0xf]  ;;  %v3306_v47 = vor.u32 %v3731_v39, %v3303_v40  ;;  %v2717_v37 = vld [vmem:[%s5564_s1 + $0x2e8] sm:$0xf] }
  0x6f   :  { %1744 = vmatpush.bf16.msrb.mxu0 %v2938_v21  ;;  %v3031_v48 = vld [vmem:[%s5564_s1 + $0x570] sm:$0xf0]  ;;  %v3695_v49 = vld [vmem:[%s5564_s1 + $0x664] sm:$0xf]  ;;  %v2906_v53 = vor.u32 %v3631_v44, %v2903_v45  ;;  %v3586_v39 = vld [vmem:[%s5564_s1 + $0x2f4] sm:$0xf0]  ;;  %v2462_v45 = vor.u32 %v3522_v30, %v2461_v26 }
  0x70   :  { %1757 = vmatpush.bf16.msrb.mxu1 %v3066_v22  ;;  %v3159_v50 = vld [vmem:[%s5564_s1 + $0x670] sm:$0xf0]  ;;  %v3727_v51 = vld [vmem:[%s5564_s1 + $0x764] sm:$0xf]  ;;  %v3034_v54 = vor.u32 %v3663_v46, %v3031_v48  ;;  %v2445_v48 = vld [vmem:[%s5564_s1 + $0xc8] sm:$0xf] }
  0x71   :  { %1770 = vmatpush.bf16.msrb.mxu2 %v3194_v23  ;;  %v3287_v52 = vld [vmem:[%s5564_s1 + $0x770] sm:$0xf0]  ;;  %v3162_v55 = vor.u32 %v3695_v49, %v3159_v50  ;;  %v3627_v56 = vld [vmem:[%s5564_s1 + $0x444] sm:$0xf]  ;;  %v3518_v49 = vld [vmem:[%s5564_s1 + $0xd4] sm:$0xf0] }
  0x72   :  { %1783 = vmatpush.bf16.msrb.mxu3 %v3322_v33  ;;  %v2887_v57 = vld [vmem:[%s5564_s1 + $0x450] sm:$0xf0]  ;;  %v3659_v58 = vld [vmem:[%s5564_s1 + $0x544] sm:$0xf]  ;;  %v3290_v59 = vor.u32 %v3727_v51, %v3287_v52  ;;  %v2589_v33 = vld [vmem:[%s5564_s1 + $0x1e8] sm:$0xf] }
  0x73   :  { %1745 = vmatpush.bf16.msrb.mxu0 %v2922_v41  ;;  %v3015_v60 = vld [vmem:[%s5564_s1 + $0x550] sm:$0xf0]  ;;  %v3691_v61 = vld [vmem:[%s5564_s1 + $0x644] sm:$0xf]  ;;  %v2890_v1 = vor.u32 %v3627_v56, %v2887_v57  ;;  %v2590_v46 = vor.u32 %v3554_v36, %v2589_v33  ;;  %v2573_v50 = vld [vmem:[%s5564_s1 + $0x1c8] sm:$0xf]  ;;  %v2446_v57 = vor.u32 %v3518_v49, %v2445_v48 }
  0x74   :  { %1758 = vmatpush.bf16.msrb.mxu1 %v3050_v42  ;;  %v3143_v62 = vld [vmem:[%s5564_s1 + $0x650] sm:$0xf0]  ;;  %v3723_v63 = vld [vmem:[%s5564_s1 + $0x744] sm:$0xf]  ;;  %v3018_v2 = vor.u32 %v3659_v58, %v3015_v60  ;;  %v2845_v42 = vld [vmem:[%s5564_s1 + $0x3e8] sm:$0xf] }
  0x75   :  { %1771 = vmatpush.bf16.msrb.mxu2 %v3178_v43  ;;  %v3271_v0 = vld [vmem:[%s5564_s1 + $0x750] sm:$0xf0]  ;;  %v3146_v3 = vor.u32 %v3691_v61, %v3143_v62  ;;  %v3623_v4 = vld [vmem:[%s5564_s1 + $0x424] sm:$0xf]  ;;  %v3618_v43 = vld [vmem:[%s5564_s1 + $0x3f4] sm:$0xf0] }
  0x76   :  { %1784 = vmatpush.bf16.msrb.mxu3 %v3306_v47  ;;  %v2871_v5 = vld [vmem:[%s5564_s1 + $0x430] sm:$0xf0]  ;;  %v3655_v6 = vld [vmem:[%s5564_s1 + $0x524] sm:$0xf]  ;;  %v3274_v7 = vor.u32 %v3723_v63, %v3271_v0  ;;  %v2718_v47 = vor.u32 %v3586_v39, %v2717_v37  ;;  %v2846_v51 = vor.u32 %v3618_v43, %v2845_v42  ;;  %v3550_v52 = vld [vmem:[%s5564_s1 + $0x1d4] sm:$0xf0] }
  0x77   :  { %1746 = vmatpush.bf16.msrb.mxu0 %v2906_v53  ;;  %v2999_v8 = vld [vmem:[%s5564_s1 + $0x530] sm:$0xf0]  ;;  %v3687_v9 = vld [vmem:[%s5564_s1 + $0x624] sm:$0xf]  ;;  %v2874_v13 = vor.u32 %v3623_v4, %v2871_v5  ;;  %v2701_v53 = vld [vmem:[%s5564_s1 + $0x2c8] sm:$0xf]  ;;  %v2574_v58 = vor.u32 %v3550_v52, %v2573_v50 }
  0x78   :  { %1759 = vmatpush.bf16.msrb.mxu1 %v3034_v54  ;;  %v3127_v10 = vld [vmem:[%s5564_s1 + $0x630] sm:$0xf0]  ;;  %v3719_v11 = vld [vmem:[%s5564_s1 + $0x724] sm:$0xf]  ;;  %v3002_v16 = vor.u32 %v3655_v6, %v2999_v8  ;;  %v3582_v54 = vld [vmem:[%s5564_s1 + $0x2d4] sm:$0xf0] }
  0x79   :  { %1772 = vmatpush.bf16.msrb.mxu2 %v3162_v55  ;;  %v3255_v12 = vld [vmem:[%s5564_s1 + $0x730] sm:$0xf0]  ;;  %v3619_v14 = vld [vmem:[%s5564_s1 + $0x404] sm:$0xf]  ;;  %v3130_v17 = vor.u32 %v3687_v9, %v3127_v10  ;;  %v2829_v55 = vld [vmem:[%s5564_s1 + $0x3c8] sm:$0xf] }
  0x7a   :  { %1785 = vmatpush.bf16.msrb.mxu3 %v3290_v59  ;;  %v2855_v15 = vld [vmem:[%s5564_s1 + $0x410] sm:$0xf0]  ;;  %v3651_v18 = vld [vmem:[%s5564_s1 + $0x504] sm:$0xf]  ;;  %v3258_v21 = vor.u32 %v3719_v11, %v3255_v12  ;;  %v3614_v56 = vld [vmem:[%s5564_s1 + $0x3d4] sm:$0xf0]  ;;  %v2702_v59 = vor.u32 %v3582_v54, %v2701_v53 }
  0x7b   :  { %1747 = vmatpush.bf16.msrb.mxu0 %v2890_v1  ;;  %v2983_v19 = vld [vmem:[%s5564_s1 + $0x510] sm:$0xf0]  ;;  %v3683_v20 = vld [vmem:[%s5564_s1 + $0x604] sm:$0xf]  ;;  %v2858_v35 = vor.u32 %v3619_v14, %v2855_v15  ;;  %v2429_v60 = vld [vmem:[%s5564_s1 + $0xa8] sm:$0xf]  ;;  %v2830_v63 = vor.u32 %v3614_v56, %v2829_v55 }
  0x7c   :  { %1760 = vmatpush.bf16.msrb.mxu1 %v3018_v2  ;;  %v3111_v22 = vld [vmem:[%s5564_s1 + $0x610] sm:$0xf0]  ;;  %v3715_v23 = vld [vmem:[%s5564_s1 + $0x704] sm:$0xf]  ;;  %v2986_v40 = vor.u32 %v3651_v18, %v2983_v19  ;;  %v3514_v61 = vld [vmem:[%s5564_s1 + $0xb4] sm:$0xf0] }
  0x7d   :  { %1773 = vmatpush.bf16.msrb.mxu2 %v3146_v3  ;;  %v3239_v24 = vld [vmem:[%s5564_s1 + $0x710] sm:$0xf0]  ;;  %v3114_v41 = vor.u32 %v3683_v20, %v3111_v22  ;;  %v2557_v62 = vld [vmem:[%s5564_s1 + $0x1a8] sm:$0xf]  ;;  %v3546_v0 = vld [vmem:[%s5564_s1 + $0x1b4] sm:$0xf0]  ;;  %v2430_v4 = vor.u32 %v3514_v61, %v2429_v60 }
  0x7e   :  { %1786 = vmatpush.bf16.msrb.mxu3 %v3274_v7  ;;  %v3242_v44 = vor.u32 %v3715_v23, %v3239_v24  ;;  %v2685_v1 = vld [vmem:[%s5564_s1 + $0x2a8] sm:$0xf]  ;;  %v3578_v2 = vld [vmem:[%s5564_s1 + $0x2b4] sm:$0xf0]  ;;  %v2558_v5 = vor.u32 %v3546_v0, %v2557_v62 }
  0x7f   :  { %1748 = vmatpush.bf16.msrb.mxu0 %v2874_v13  ;;  %v2813_v3 = vld [vmem:[%s5564_s1 + $0x3a8] sm:$0xf]  ;;  %v2686_v6 = vor.u32 %v3578_v2, %v2685_v1  ;;  %v3510_v8 = vld [vmem:[%s5564_s1 + $0x94] sm:$0xf0] }
  0x80   :  { %1761 = vmatpush.bf16.msrb.mxu1 %v3002_v16  ;;  %v2413_v7 = vld [vmem:[%s5564_s1 + $0x88] sm:$0xf]  ;;  %v3574_v10 = vld [vmem:[%s5564_s1 + $0x294] sm:$0xf0] }
  0x81   :  { %1774 = vmatpush.bf16.msrb.mxu2 %v3130_v17  ;;  %v2669_v9 = vld [vmem:[%s5564_s1 + $0x288] sm:$0xf]  ;;  %v3606_v12 = vld [vmem:[%s5564_s1 + $0x394] sm:$0xf0]  ;;  %v2414_v13 = vor.u32 %v3510_v8, %v2413_v7 }
  0x82   :  { %1787 = vmatpush.bf16.msrb.mxu3 %v3258_v21  ;;  %v2797_v11 = vld [vmem:[%s5564_s1 + $0x388] sm:$0xf]  ;;  %v2670_v15 = vor.u32 %v3574_v10, %v2669_v9  ;;  %v3506_v17 = vld [vmem:[%s5564_s1 + $0x74] sm:$0xf0] }
  0x83   :  { %1749 = vmatpush.bf16.msrb.mxu0 %v2858_v35  ;;  %v2397_v16 = vld [vmem:[%s5564_s1 + $0x68] sm:$0xf]  ;;  %v2798_v19 = vor.u32 %v3606_v12, %v2797_v11  ;;  %v3538_v20 = vld [vmem:[%s5564_s1 + $0x174] sm:$0xf0] }
  0x84   :  { %1762 = vmatpush.bf16.msrb.mxu1 %v2986_v40  ;;  %v2525_v18 = vld [vmem:[%s5564_s1 + $0x168] sm:$0xf]  ;;  %v3570_v22 = vld [vmem:[%s5564_s1 + $0x274] sm:$0xf0]  ;;  %v2398_v26 = vor.u32 %v3506_v17, %v2397_v16 }
  0x85   :  { %1775 = vmatpush.bf16.msrb.mxu2 %v3114_v41  ;;  %v2653_v21 = vld [vmem:[%s5564_s1 + $0x268] sm:$0xf]  ;;  %v3602_v24 = vld [vmem:[%s5564_s1 + $0x374] sm:$0xf0]  ;;  %v2526_v30 = vor.u32 %v3538_v20, %v2525_v18 }
  0x86   :  { %1788 = vmatpush.bf16.msrb.mxu3 %v3242_v44  ;;  %1750 = vmatmul.bf16.vlgmr.msrb.gmra.mxu0 %v4298_v31  ;;  %v2541_v31 = vld [vmem:[%s5564_s1 + $0x188] sm:$0xf]  ;;  %v2654_v33 = vor.u32 %v3570_v22, %v2653_v21  ;;  %v3502_v36 = vld [vmem:[%s5564_s1 + $0x54] sm:$0xf0] }
  0x87   :  { %1794 = vmatpush.bf16.msra.mxu0 %v2462_v45  ;;  %1763 = vmatmul.bf16.vlgmr.msrb.gmra.mxu1 %v4308_v38  ;;  %v3542_v38 = vld [vmem:[%s5564_s1 + $0x194] sm:$0xf0]  ;;  %v2781_v23 = vld [vmem:[%s5564_s1 + $0x368] sm:$0xf] }
  0x88   :  { %1807 = vmatpush.bf16.msra.mxu1 %v2590_v46  ;;  %1776 = vmatmul.bf16.vlgmr.msrb.gmra.mxu2 %v4293_v25  ;;  %v3610_v25 = vld [vmem:[%s5564_s1 + $0x3b4] sm:$0xf0]  ;;  %v2542_v14 = vor.u32 %v3542_v38, %v2541_v31  ;;  %v2381_v35 = vld [vmem:[%s5564_s1 + $0x48] sm:$0xf]  ;;  %v2782_v39 = vor.u32 %v3602_v24, %v2781_v23 }
  0x89   :  { %1820 = vmatpush.bf16.msra.mxu2 %v2718_v47  ;;  %1789 = vmatmul.bf16.vlgmr.msrb.gmra.mxu3 %v4300_v32  ;;  %v2814_v32 = vor.u32 %v3610_v25, %v2813_v3  ;;  %v2509_v37 = vld [vmem:[%s5564_s1 + $0x148] sm:$0xf]  ;;  %v3534_v40 = vld [vmem:[%s5564_s1 + $0x154] sm:$0xf0]  ;;  %v2382_v45 = vor.u32 %v3502_v36, %v2381_v35 }
  0x8a   :  { %1833 = vmatpush.bf16.msra.mxu3 %v2846_v51  ;;  %v2637_v41 = vld [vmem:[%s5564_s1 + $0x248] sm:$0xf]  ;;  %v3566_v42 = vld [vmem:[%s5564_s1 + $0x254] sm:$0xf0]  ;;  %v2510_v46 = vor.u32 %v3534_v40, %v2509_v37 }
  0x8b   :  { %1795 = vmatpush.bf16.msra.mxu0 %v2446_v57  ;;  %v2765_v43 = vld [vmem:[%s5564_s1 + $0x348] sm:$0xf]  ;;  %v3598_v44 = vld [vmem:[%s5564_s1 + $0x354] sm:$0xf0]  ;;  %v2638_v47 = vor.u32 %v3566_v42, %v2637_v41 }
  0x8c   :  { %1808 = vmatpush.bf16.msra.mxu1 %v2574_v58  ;;  %v2365_v48 = vld [vmem:[%s5564_s1 + $0x28] sm:$0xf]  ;;  %v3498_v49 = vld [vmem:[%s5564_s1 + $0x34] sm:$0xf0]  ;;  %v2766_v51 = vor.u32 %v3598_v44, %v2765_v43 }
  0x8d   :  { %1821 = vmatpush.bf16.msra.mxu2 %v2702_v59  ;;  %v2493_v50 = vld [vmem:[%s5564_s1 + $0x128] sm:$0xf]  ;;  %v3530_v52 = vld [vmem:[%s5564_s1 + $0x134] sm:$0xf0]  ;;  %v2366_v57 = vor.u32 %v3498_v49, %v2365_v48 }
  0x8e   :  { %1834 = vmatpush.bf16.msra.mxu3 %v2830_v63  ;;  %v2621_v53 = vld [vmem:[%s5564_s1 + $0x228] sm:$0xf]  ;;  %v3562_v54 = vld [vmem:[%s5564_s1 + $0x234] sm:$0xf0]  ;;  %v2494_v60 = vor.u32 %v3530_v52, %v2493_v50 }
  0x8f   :  { %1796 = vmatpush.bf16.msra.mxu0 %v2430_v4  ;;  %v2749_v55 = vld [vmem:[%s5564_s1 + $0x328] sm:$0xf]  ;;  %v3594_v56 = vld [vmem:[%s5564_s1 + $0x334] sm:$0xf0]  ;;  %v2622_v61 = vor.u32 %v3562_v54, %v2621_v53 }
  0x90   :  { %1809 = vmatpush.bf16.msra.mxu1 %v2558_v5  ;;  %v2349_v58 = vld [vmem:[%s5564_s1 + $0x8] sm:$0xf]  ;;  %v3494_v59 = vld [vmem:[%s5564_s1 + $0x14] sm:$0xf0]  ;;  %v2750_v1 = vor.u32 %v3594_v56, %v2749_v55 }
  0x91   :  { %1822 = vmatpush.bf16.msra.mxu2 %v2686_v6  ;;  %v2477_v62 = vld [vmem:[%s5564_s1 + $0x108] sm:$0xf]  ;;  %v3526_v63 = vld [vmem:[%s5564_s1 + $0x114] sm:$0xf0]  ;;  %v2350_v7 = vor.u32 %v3494_v59, %v2349_v58 }
  0x92   :  { %1835 = vmatpush.bf16.msra.mxu3 %v2814_v32  ;;  %v2605_v0 = vld [vmem:[%s5564_s1 + $0x208] sm:$0xf]  ;;  %v3558_v2 = vld [vmem:[%s5564_s1 + $0x214] sm:$0xf0]  ;;  %v2478_v38 = vor.u32 %v3526_v63, %v2477_v62 }
  0x93   :  { %1797 = vmatpush.bf16.msra.mxu0 %v2414_v13  ;;  %v2733_v3 = vld [vmem:[%s5564_s1 + $0x308] sm:$0xf]  ;;  %v3590_v25 = vld [vmem:[%s5564_s1 + $0x314] sm:$0xf0]  ;;  %v2606_v9 = vor.u32 %v3558_v2, %v2605_v0 }
  0x94   :  { %1810 = vmatpush.bf16.msra.mxu1 %v2542_v14  ;;  %v2973_v4 = vld [vmem:[%s5564_s1 + $0x4e8] sm:$0xf]  ;;  %v3650_v5 = vld [vmem:[%s5564_s1 + $0x4f4] sm:$0xf0]  ;;  %v2734_v12 = vor.u32 %v3590_v25, %v2733_v3 }
  0x95   :  { %1823 = vmatpush.bf16.msra.mxu2 %v2670_v15  ;;  %v3101_v6 = vld [vmem:[%s5564_s1 + $0x5e8] sm:$0xf]  ;;  %v3682_v8 = vld [vmem:[%s5564_s1 + $0x5f4] sm:$0xf0]  ;;  %v2974_v13 = vor.u32 %v3650_v5, %v2973_v4 }
  0x96   :  { %1836 = vmatpush.bf16.msra.mxu3 %v2798_v19  ;;  %v3229_v31 = vld [vmem:[%s5564_s1 + $0x6e8] sm:$0xf]  ;;  %v3714_v32 = vld [vmem:[%s5564_s1 + $0x6f4] sm:$0xf0]  ;;  %v3102_v14 = vor.u32 %v3682_v8, %v3101_v6 }
  0x97   :  { %1798 = vmatpush.bf16.msra.mxu0 %v2398_v26  ;;  %v3357_v10 = vld [vmem:[%s5564_s1 + $0x7e8] sm:$0xf]  ;;  %v3746_v11 = vld [vmem:[%s5564_s1 + $0x7f4] sm:$0xf0]  ;;  %v3230_v15 = vor.u32 %v3714_v32, %v3229_v31  ;;  %v4986_v32 = vld [vmem:[%s5565_s2] sm:$0xf] }
  0x98   :  { %1811 = vmatpush.bf16.msra.mxu1 %v2526_v30  ;;  %v2957_v16 = vld [vmem:[%s5564_s1 + $0x4c8] sm:$0xf]  ;;  %v3646_v17 = vld [vmem:[%s5564_s1 + $0x4d4] sm:$0xf0]  ;;  %v3358_v19 = vor.u32 %v3746_v11, %v3357_v10 }
  0x99   :  { %1824 = vmatpush.bf16.msra.mxu2 %v2654_v33  ;;  %v3085_v18 = vld [vmem:[%s5564_s1 + $0x5c8] sm:$0xf]  ;;  %v3678_v20 = vld [vmem:[%s5564_s1 + $0x5d4] sm:$0xf0]  ;;  %v2958_v26 = vor.u32 %v3646_v17, %v2957_v16  ;;  %v280_v16 = vperm.slane %v4986_v32, 0 }
  0x9a   :  { %1837 = vmatpush.bf16.msra.mxu3 %v2782_v39  ;;  %v3213_v21 = vld [vmem:[%s5564_s1 + $0x6c8] sm:$0xf]  ;;  %v3710_v22 = vld [vmem:[%s5564_s1 + $0x6d4] sm:$0xf0]  ;;  %v3086_v30 = vor.u32 %v3678_v20, %v3085_v18 }
  0x9b   :  { %1799 = vmatpush.bf16.msra.mxu0 %v2382_v45  ;;  %v3341_v23 = vld [vmem:[%s5564_s1 + $0x7c8] sm:$0xf]  ;;  %v3742_v24 = vld [vmem:[%s5564_s1 + $0x7d4] sm:$0xf0]  ;;  %v3214_v33 = vor.u32 %v3710_v22, %v3213_v21 }
  0x9c   :  { %1812 = vmatpush.bf16.msra.mxu1 %v2510_v46  ;;  %v2941_v35 = vld [vmem:[%s5564_s1 + $0x4a8] sm:$0xf]  ;;  %v3642_v36 = vld [vmem:[%s5564_s1 + $0x4b4] sm:$0xf0]  ;;  %v3342_v39 = vor.u32 %v3742_v24, %v3341_v23 }
  0x9d   :  { %1825 = vmatpush.bf16.msra.mxu2 %v2638_v47  ;;  %v3069_v37 = vld [vmem:[%s5564_s1 + $0x5a8] sm:$0xf]  ;;  %v3674_v40 = vld [vmem:[%s5564_s1 + $0x5b4] sm:$0xf0]  ;;  %v2942_v45 = vor.u32 %v3642_v36, %v2941_v35 }
  0x9e   :  { %1838 = vmatpush.bf16.msra.mxu3 %v2766_v51  ;;  %v3197_v41 = vld [vmem:[%s5564_s1 + $0x6a8] sm:$0xf]  ;;  %v3706_v42 = vld [vmem:[%s5564_s1 + $0x6b4] sm:$0xf0]  ;;  %v3070_v46 = vor.u32 %v3674_v40, %v3069_v37 }
  0x9f   :  { %1800 = vmatpush.bf16.msra.mxu0 %v2366_v57  ;;  %v3325_v43 = vld [vmem:[%s5564_s1 + $0x7a8] sm:$0xf]  ;;  %v3738_v44 = vld [vmem:[%s5564_s1 + $0x7b4] sm:$0xf0] }
  0xa0   :  { %1813 = vmatpush.bf16.msra.mxu1 %v2494_v60  ;;  %v2925_v47 = vld [vmem:[%s5564_s1 + $0x488] sm:$0xf]  ;;  %v3638_v48 = vld [vmem:[%s5564_s1 + $0x494] sm:$0xf0] }
  0xa1   :  { %1826 = vmatpush.bf16.msra.mxu2 %v2622_v61  ;;  %v3181_v49 = vld [vmem:[%s5564_s1 + $0x688] sm:$0xf]  ;;  %v3702_v50 = vld [vmem:[%s5564_s1 + $0x694] sm:$0xf0]  ;;  %v2926_v53 = vor.u32 %v3638_v48, %v2925_v47  ;;  %v3552_v47 = vld [vmem:[%s5564_s1 + $0x1ec] sm:$0xf] }
  0xa2   :  { %1839 = vmatpush.bf16.msra.mxu3 %v2750_v1  ;;  %v3309_v51 = vld [vmem:[%s5564_s1 + $0x788] sm:$0xf]  ;;  %v3734_v52 = vld [vmem:[%s5564_s1 + $0x794] sm:$0xf0]  ;;  %v3182_v55 = vor.u32 %v3702_v50, %v3181_v49  ;;  %v2719_v49 = vld [vmem:[%s5564_s1 + $0x2f8] sm:$0xf0] }
  0xa3   :  { %1801 = vmatpush.bf16.msra.mxu0 %v2350_v7  ;;  %v2909_v56 = vld [vmem:[%s5564_s1 + $0x468] sm:$0xf]  ;;  %v3634_v57 = vld [vmem:[%s5564_s1 + $0x474] sm:$0xf0]  ;;  %v3310_v59 = vor.u32 %v3734_v52, %v3309_v51  ;;  %v3616_v52 = vld [vmem:[%s5564_s1 + $0x3ec] sm:$0xf] }
  0xa4   :  { %1814 = vmatpush.bf16.msra.mxu1 %v2478_v38  ;;  %v3037_v58 = vld [vmem:[%s5564_s1 + $0x568] sm:$0xf]  ;;  %v3666_v60 = vld [vmem:[%s5564_s1 + $0x574] sm:$0xf0]  ;;  %v2910_v1 = vor.u32 %v3634_v57, %v2909_v56 }
  0xa5   :  { %1827 = vmatpush.bf16.msra.mxu2 %v2606_v9  ;;  %v3165_v61 = vld [vmem:[%s5564_s1 + $0x668] sm:$0xf]  ;;  %v3698_v62 = vld [vmem:[%s5564_s1 + $0x674] sm:$0xf0]  ;;  %v3038_v3 = vor.u32 %v3666_v60, %v3037_v58 }
  0xa6   :  { %1840 = vmatpush.bf16.msra.mxu3 %v2734_v12  ;;  %1802 = vmatmul.bf16.vlgmr.msra.gmra.mxu0 %v4166_v28  ;;  %v3053_v28 = vld [vmem:[%s5564_s1 + $0x588] sm:$0xf]  ;;  %v3730_v0 = vld [vmem:[%s5564_s1 + $0x774] sm:$0xf0]  ;;  %v3166_v25 = vor.u32 %v3698_v62, %v3165_v61  ;;  %v3516_v61 = vld [vmem:[%s5564_s1 + $0xcc] sm:$0xf] }
  0xa7   :  { %1846 = vmatpush.bf16.msrb.mxu0 %v2974_v13  ;;  %1815 = vmatmul.bf16.vlgmr.msra.gmra.mxu1 %v4176_v34  ;;  %v3670_v34 = vld [vmem:[%s5564_s1 + $0x594] sm:$0xf0]  ;;  %v3293_v63 = vld [vmem:[%s5564_s1 + $0x768] sm:$0xf]  ;;  %v2447_v62 = vld [vmem:[%s5564_s1 + $0xd8] sm:$0xf0] }
  0xa8   :  { %1859 = vmatpush.bf16.msrb.mxu1 %v3102_v14  ;;  %1828 = vmatmul.bf16.vlgmr.msra.gmra.mxu2 %v4164_v27  ;;  %v3198_v27 = vor.u32 %v3706_v42, %v3197_v41  ;;  %v3054_v54 = vor.u32 %v3670_v34, %v3053_v28  ;;  %v2893_v2 = vld [vmem:[%s5564_s1 + $0x448] sm:$0xf]  ;;  %v3630_v4 = vld [vmem:[%s5564_s1 + $0x454] sm:$0xf0]  ;;  %v3294_v7 = vor.u32 %v3730_v0, %v3293_v63  ;;  %v3584_v34 = vld [vmem:[%s5564_s1 + $0x2ec] sm:$0xf] }
  0xa9   :  { %1872 = vmatpush.bf16.msrb.mxu2 %v3230_v15  ;;  %1841 = vmatmul.bf16.vlgmr.msra.gmra.mxu3 %v4168_v29  ;;  %v3326_v29 = vor.u32 %v3738_v44, %v3325_v43  ;;  %v3021_v5 = vld [vmem:[%s5564_s1 + $0x548] sm:$0xf]  ;;  %v3662_v6 = vld [vmem:[%s5564_s1 + $0x554] sm:$0xf0]  ;;  %v2894_v10 = vor.u32 %v3630_v4, %v2893_v2  ;;  %v2722_v60 = vor.u32 %v3584_v34, %v2719_v49  ;;  %v3548_v63 = vld [vmem:[%s5564_s1 + $0x1cc] sm:$0xf] }
  0xaa   :  { %1885 = vmatpush.bf16.msrb.mxu3 %v3358_v19  ;;  %v3149_v8 = vld [vmem:[%s5564_s1 + $0x648] sm:$0xf]  ;;  %v3694_v31 = vld [vmem:[%s5564_s1 + $0x654] sm:$0xf0]  ;;  %v3022_v12 = vor.u32 %v3662_v6, %v3021_v5  ;;  %v3580_v2 = vld [vmem:[%s5564_s1 + $0x2cc] sm:$0xf] }
  0xab   :  { %1847 = vmatpush.bf16.msrb.mxu0 %v2958_v26  ;;  %v3277_v38 = vld [vmem:[%s5564_s1 + $0x748] sm:$0xf]  ;;  %v3726_v9 = vld [vmem:[%s5564_s1 + $0x754] sm:$0xf0]  ;;  %v3150_v13 = vor.u32 %v3694_v31, %v3149_v8  ;;  %v3612_v5 = vld [vmem:[%s5564_s1 + $0x3cc] sm:$0xf]  ;;  %v2450_v8 = vor.u32 %v3516_v61, %v2447_v62 }
  0xac   :  { %1860 = vmatpush.bf16.msrb.mxu1 %v3086_v30  ;;  %v2877_v11 = vld [vmem:[%s5564_s1 + $0x428] sm:$0xf]  ;;  %v3626_v14 = vld [vmem:[%s5564_s1 + $0x434] sm:$0xf0]  ;;  %v3278_v17 = vor.u32 %v3726_v9, %v3277_v38  ;;  %v2831_v6 = vld [vmem:[%s5564_s1 + $0x3d8] sm:$0xf0] }
  0xad   :  { %1873 = vmatpush.bf16.msrb.mxu2 %v3214_v33  ;;  %v3005_v15 = vld [vmem:[%s5564_s1 + $0x528] sm:$0xf]  ;;  %v3658_v18 = vld [vmem:[%s5564_s1 + $0x534] sm:$0xf0]  ;;  %v2878_v23 = vor.u32 %v3626_v14, %v2877_v11  ;;  %v3512_v9 = vld [vmem:[%s5564_s1 + $0xac] sm:$0xf] }
  0xae   :  { %1886 = vmatpush.bf16.msrb.mxu3 %v3342_v39  ;;  %v3133_v19 = vld [vmem:[%s5564_s1 + $0x628] sm:$0xf]  ;;  %v3690_v20 = vld [vmem:[%s5564_s1 + $0x634] sm:$0xf0]  ;;  %v3006_v33 = vor.u32 %v3658_v18, %v3005_v15  ;;  %v3544_v11 = vld [vmem:[%s5564_s1 + $0x1ac] sm:$0xf] }
  0xaf   :  { %1848 = vmatpush.bf16.msrb.mxu0 %v2942_v45  ;;  %v3261_v21 = vld [vmem:[%s5564_s1 + $0x728] sm:$0xf]  ;;  %v3722_v22 = vld [vmem:[%s5564_s1 + $0x734] sm:$0xf0]  ;;  %v3134_v35 = vor.u32 %v3690_v20, %v3133_v19  ;;  %v2559_v14 = vld [vmem:[%s5564_s1 + $0x1b8] sm:$0xf0] }
  0xb0   :  { %1861 = vmatpush.bf16.msrb.mxu1 %v3070_v46  ;;  %v2861_v24 = vld [vmem:[%s5564_s1 + $0x408] sm:$0xf]  ;;  %v3622_v26 = vld [vmem:[%s5564_s1 + $0x414] sm:$0xf0]  ;;  %v3262_v42 = vor.u32 %v3722_v22, %v3261_v21  ;;  %v3520_v46 = vld [vmem:[%s5564_s1 + $0xec] sm:$0xf] }
  0xb1   :  { %1874 = vmatpush.bf16.msrb.mxu2 %v3198_v27  ;;  %v2989_v36 = vld [vmem:[%s5564_s1 + $0x508] sm:$0xf]  ;;  %v3654_v37 = vld [vmem:[%s5564_s1 + $0x514] sm:$0xf0]  ;;  %v2463_v27 = vld [vmem:[%s5564_s1 + $0xf8] sm:$0xf0]  ;;  %v2862_v28 = vor.u32 %v3622_v26, %v2861_v24  ;;  %v2562_v26 = vor.u32 %v3544_v11, %v2559_v14 }
  0xb2   :  { %1887 = vmatpush.bf16.msrb.mxu3 %v3326_v29  ;;  %v3117_v39 = vld [vmem:[%s5564_s1 + $0x608] sm:$0xf]  ;;  %v3686_v43 = vld [vmem:[%s5564_s1 + $0x614] sm:$0xf0]  ;;  %v2591_v29 = vld [vmem:[%s5564_s1 + $0x1f8] sm:$0xf0]  ;;  %v2990_v50 = vor.u32 %v3654_v37, %v2989_v36  ;;  %v2466_v56 = vor.u32 %v3520_v46, %v2463_v27 }
  0xb3   :  { %1849 = vmatpush.bf16.msrb.mxu0 %v2926_v53  ;;  %v3245_v44 = vld [vmem:[%s5564_s1 + $0x708] sm:$0xf]  ;;  %v3718_v45 = vld [vmem:[%s5564_s1 + $0x714] sm:$0xf0]  ;;  %v3118_v51 = vor.u32 %v3686_v43, %v3117_v39  ;;  %v2847_v53 = vld [vmem:[%s5564_s1 + $0x3f8] sm:$0xf0] }
  0xb4   :  { %1862 = vmatpush.bf16.msrb.mxu1 %v3054_v54  ;;  %v1608_v41 = vpop.f32.mrf.mxu1  ;;  %v2850_v0 = vor.u32 %v3616_v52, %v2847_v53  ;;  %v3576_v15 = vld [vmem:[%s5564_s1 + $0x2ac] sm:$0xf]  ;;  %v5115_v18 = vld [vmem:[#allocation1 + $0x3f] sm:$0xff] }
  0xb5   :  { %1875 = vmatpush.bf16.msrb.mxu2 %v3182_v55  ;;  %v1595_v30 = vpop.f32.mrf.mxu0  ;;  %v3246_v55 = vor.u32 %v3718_v45, %v3245_v44  ;;  %v3608_v19 = vld [vmem:[%s5564_s1 + $0x3ac] sm:$0xf]  ;;  %v2815_v20 = vld [vmem:[%s5564_s1 + $0x3b8] sm:$0xf0] }
  0xb6   :  { %1888 = vmatpush.bf16.msrb.mxu3 %v3310_v59  ;;  %v1596_v40 = vadd.f32 %v1595_v30, %v280_v16  ;;  %v2594_v59 = vor.u32 %v3552_v47, %v2591_v29  ;;  %v2687_v16 = vld [vmem:[%s5564_s1 + $0x2b8] sm:$0xf0]  ;;  %v5124_v22 = vld [vmem:[#allocation1 + $0x2d] sm:$0xff]  ;;  %v2818_v37 = vor.u32 %v3608_v19, %v2815_v20 }
  0xb7   :  { %1850 = vmatpush.bf16.msrb.mxu0 %v2910_v1  ;;  %v2575_v1 = vld [vmem:[%s5564_s1 + $0x1d8] sm:$0xf0]  ;;  %v2690_v30 = vor.u32 %v3576_v15, %v2687_v16  ;;  %v3540_v36 = vld [vmem:[%s5564_s1 + $0x18c] sm:$0xf] }
  0xb8   :  { %1863 = vmatpush.bf16.msrb.mxu1 %v3038_v3  ;;  %v1609_v48 = vadd.f32 %v1608_v41, %v1596_v40  ;;  %v2703_v3 = vld [vmem:[%s5564_s1 + $0x2d8] sm:$0xf0]  ;;  %v2578_v31 = vor.u32 %v3548_v63, %v2575_v1  ;;  %v3572_v40 = vld [vmem:[%s5564_s1 + $0x28c] sm:$0xf] }
  0xb9   :  { %1876 = vmatpush.bf16.msrb.mxu2 %v3166_v25  ;;  %v2706_v38 = vor.u32 %v3580_v2, %v2703_v3  ;;  %v2543_v39 = vld [vmem:[%s5564_s1 + $0x198] sm:$0xf0]  ;;  %v3504_v47 = vld [vmem:[%s5564_s1 + $0x6c] sm:$0xf] }
  0xba   :  { %1889 = vmatpush.bf16.msrb.mxu3 %v3294_v7  ;;  %v1621_v54 = vpop.f32.mrf.mxu2  ;;  %v2671_v41 = vld [vmem:[%s5564_s1 + $0x298] sm:$0xf0]  ;;  %v2546_v46 = vor.u32 %v3540_v36, %v2543_v39  ;;  %v3600_v53 = vld [vmem:[%s5564_s1 + $0x36c] sm:$0xf] }
  0xbb   :  { %1851 = vmatpush.bf16.msrb.mxu0 %v2894_v10  ;;  %v1622_v57 = vadd.f32 %v1621_v54, %v1609_v48  ;;  %v2431_v10 = vld [vmem:[%s5564_s1 + $0xb8] sm:$0xf0]  ;;  %v2674_v27 = vor.u32 %v3572_v40, %v2671_v41  ;;  %v3532_v61 = vld [vmem:[%s5564_s1 + $0x14c] sm:$0xf] }
  0xbc   :  { %1864 = vmatpush.bf16.msrb.mxu1 %v3022_v12  ;;  %v1634_v58 = vpop.f32.mrf.mxu3  ;;  %v1610_v7 = vpop.f32.mrf.mxu1  ;;  %v5100_v12 = vld [vmem:[#allocation1 + $0x36] sm:$0xff]  ;;  %v3564_v1 = vld [vmem:[%s5564_s1 + $0x24c] sm:$0xf] }
  0xbd   :  { %1877 = vmatpush.bf16.msrb.mxu2 %v3150_v13  ;;  %v1635_v25 = vadd.f32 %v1634_v58, %v1622_v57  ;;  %v1597_v4 = vpop.f32.mrf.mxu0  ;;  %v2834_v13 = vor.u32 %v3612_v5, %v2831_v6  ;;  %v2799_v43 = vld [vmem:[%s5564_s1 + $0x398] sm:$0xf0]  ;;  %v3528_v11 = vld [vmem:[%s5564_s1 + $0x12c] sm:$0xf] }
  0xbe   :  { %1890 = vmatpush.bf16.msrb.mxu3 %v3278_v17  ;;  %v5112_v17 = vld [vmem:[#allocation1 + $0x24] sm:$0xff]  ;;  %v2399_v48 = vld [vmem:[%s5564_s1 + $0x78] sm:$0xf0]  ;;  %v3596_v4 = vld [vmem:[%s5564_s1 + $0x34c] sm:$0xf] }
  0xbf   :  { %1852 = vmatpush.bf16.msrb.mxu0 %v2878_v23  ;;  %v2434_v23 = vor.u32 %v3512_v9, %v2431_v10  ;;  %v2655_v52 = vld [vmem:[%s5564_s1 + $0x278] sm:$0xf0]  ;;  %v3496_v9 = vld [vmem:[%s5564_s1 + $0x2c] sm:$0xf] }
  0xc0   :  { %1865 = vmatpush.bf16.msrb.mxu1 %v3006_v33  ;;  %v3508_v33 = vld [vmem:[%s5564_s1 + $0x8c] sm:$0xf]  ;;  %v2783_v54 = vld [vmem:[%s5564_s1 + $0x378] sm:$0xf0] }
  0xc1   :  { %1878 = vmatpush.bf16.msrb.mxu2 %v3134_v35  ;;  %v2415_v35 = vld [vmem:[%s5564_s1 + $0x98] sm:$0xf0]  ;;  %v2786_v63 = vor.u32 %v3600_v53, %v2783_v54  ;;  %v3560_v16 = vld [vmem:[%s5564_s1 + $0x22c] sm:$0xf] }
  0xc2   :  { %1891 = vmatpush.bf16.msrb.mxu3 %v3262_v42  ;;  %v1623_v21 = vpop.f32.mrf.mxu2  ;;  %v3604_v42 = vld [vmem:[%s5564_s1 + $0x38c] sm:$0xf]  ;;  %v2418_v44 = vor.u32 %v3508_v33, %v2415_v35  ;;  %v2639_v2 = vld [vmem:[%s5564_s1 + $0x258] sm:$0xf0] }
  0xc3   :  { %1853 = vmatpush.bf16.msrb.mxu0 %v2862_v28  ;;  %v3536_v28 = vld [vmem:[%s5564_s1 + $0x16c] sm:$0xf]  ;;  %v2802_v49 = vor.u32 %v3604_v42, %v2799_v43  ;;  %v2767_v5 = vld [vmem:[%s5564_s1 + $0x358] sm:$0xf0] }
  0xc4   :  { %1866 = vmatpush.bf16.msrb.mxu1 %v2990_v50  ;;  %v1636_v24 = vpop.f32.mrf.mxu3  ;;  %v1660_v34 = vpop.f32.mrf.mxu1  ;;  %v2527_v50 = vld [vmem:[%s5564_s1 + $0x178] sm:$0xf0]  ;;  %v2770_v14 = vor.u32 %v3596_v4, %v2767_v5  ;;  %v3592_v20 = vld [vmem:[%s5564_s1 + $0x32c] sm:$0xf] }
  0xc5   :  { %1879 = vmatpush.bf16.msrb.mxu2 %v3118_v51  ;;  %v3568_v51 = vld [vmem:[%s5564_s1 + $0x26c] sm:$0xf]  ;;  %v2530_v57 = vor.u32 %v3536_v28, %v2527_v50  ;;  %v2367_v10 = vld [vmem:[%s5564_s1 + $0x38] sm:$0xf0] }
  0xc6   :  { %1892 = vmatpush.bf16.msrb.mxu3 %v3246_v55  ;;  %1854 = vmatmul.bf16.vlgmr.msrb.gmra.mxu0 %v5112_v17  ;;  %v1647_v45 = vpop.f32.mrf.mxu0  ;;  %v2658_v58 = vor.u32 %v3568_v51, %v2655_v52  ;;  %v2495_v15 = vld [vmem:[%s5564_s1 + $0x138] sm:$0xf0]  ;;  %v3492_v24 = vld [vmem:[%s5564_s1 + $0xc] sm:$0xf] }
  0xc7   :  { %1898 = vmatpush.bf16.msra.mxu0 %v2466_v56  ;;  %1867 = vmatmul.bf16.vlgmr.msrb.gmra.mxu1 %v5124_v22  ;;  %v1648_v29 = vadd.f32 %v1647_v45, %v1635_v25  ;;  %v2402_v56 = vor.u32 %v3504_v47, %v2399_v48  ;;  %v2623_v19 = vld [vmem:[%s5564_s1 + $0x238] sm:$0xf0]  ;;  %v3524_v35 = vld [vmem:[%s5564_s1 + $0x10c] sm:$0xf] }
  0xc8   :  { %1911 = vmatpush.bf16.msra.mxu1 %v2594_v59  ;;  %1880 = vmatmul.bf16.vlgmr.msrb.gmra.mxu2 %v5100_v12  ;;  %v3500_v59 = vld [vmem:[%s5564_s1 + $0x4c] sm:$0xf]  ;;  %v2751_v21 = vld [vmem:[%s5564_s1 + $0x338] sm:$0xf0]  ;;  %v2626_v33 = vor.u32 %v3560_v16, %v2623_v19 }
  0xc9   :  { %1924 = vmatpush.bf16.msra.mxu2 %v2722_v60  ;;  %1893 = vmatmul.bf16.vlgmr.msrb.gmra.mxu3 %v5115_v18  ;;  %v1661_v55 = vadd.f32 %v1660_v34, %v1648_v29  ;;  %v2383_v60 = vld [vmem:[%s5564_s1 + $0x58] sm:$0xf0]  ;;  %v2754_v40 = vor.u32 %v3592_v20, %v2751_v21  ;;  %v3588_v42 = vld [vmem:[%s5564_s1 + $0x30c] sm:$0xf] }
  0xca   :  { %1937 = vmatpush.bf16.msra.mxu3 %v2850_v0  ;;  %v2511_v0 = vld [vmem:[%s5564_s1 + $0x158] sm:$0xf0]  ;;  %v2386_v6 = vor.u32 %v3500_v59, %v2383_v60  ;;  %v3648_v45 = vld [vmem:[%s5564_s1 + $0x4ec] sm:$0xf] }
  0xcb   :  { %1899 = vmatpush.bf16.msra.mxu0 %v2450_v8  ;;  %v1673_v62 = vpop.f32.mrf.mxu2  ;;  %v2479_v36 = vld [vmem:[%s5564_s1 + $0x118] sm:$0xf0]  ;;  %v3712_v28 = vld [vmem:[%s5564_s1 + $0x6ec] sm:$0xf] }
  0xcc   :  { %1912 = vmatpush.bf16.msra.mxu1 %v2578_v31  ;;  %v1674_v3 = vadd.f32 %v1673_v62, %v1661_v55  ;;  %v2514_v31 = vor.u32 %v3532_v61, %v2511_v0  ;;  %v2607_v41 = vld [vmem:[%s5564_s1 + $0x218] sm:$0xf0]  ;;  %v2482_v34 = vor.u32 %v3524_v35, %v2479_v36  ;;  %v3744_v50 = vld [vmem:[%s5564_s1 + $0x7ec] sm:$0xf] }
  0xcd   :  { %1925 = vmatpush.bf16.msra.mxu2 %v2706_v38  ;;  %v2642_v38 = vor.u32 %v3564_v1, %v2639_v2  ;;  %v2735_v43 = vld [vmem:[%s5564_s1 + $0x318] sm:$0xf0]  ;;  %v3708_v61 = vld [vmem:[%s5564_s1 + $0x6cc] sm:$0xf] }
  0xce   :  { %1938 = vmatpush.bf16.msra.mxu3 %v2834_v13  ;;  %v1686_v25 = vpop.f32.mrf.mxu3  ;;  %v1649_v8 = vpop.f32.mrf.mxu0  ;;  %v3103_v48 = vld [vmem:[%s5564_s1 + $0x5f8] sm:$0xf0]  ;;  %v2738_v52 = vor.u32 %v3588_v42, %v2735_v43  ;;  %v3672_v5 = vld [vmem:[%s5564_s1 + $0x5ac] sm:$0xf] }
  0xcf   :  { %1900 = vmatpush.bf16.msra.mxu0 %v2434_v23  ;;  %v5199_v7 = vadd.f32 %v1686_v25, %v1674_v3  ;;  %v1662_v13 = vpop.f32.mrf.mxu1  ;;  %v2370_v23 = vor.u32 %v3496_v9, %v2367_v10  ;;  %v3231_v29 = vld [vmem:[%s5564_s1 + $0x6f8] sm:$0xf0]  ;;  %v3640_v25 = vld [vmem:[%s5564_s1 + $0x4ac] sm:$0xf]  ;;  %v3785_v8 = vld [vmem:[#allocation1 + $0x12] sm:$0xff] }
  0xd0   :  { %1913 = vmatpush.bf16.msra.mxu1 %v2562_v26  ;;  %v2351_v26 = vld [vmem:[%s5564_s1 + $0x18] sm:$0xf0]  ;;  %v3234_v55 = vor.u32 %v3712_v28, %v3231_v29  ;;  %v3736_v10 = vld [vmem:[%s5564_s1 + $0x7ac] sm:$0xf]  ;;  %v3786_v13 = vld [vmem:[#allocation1] sm:$0xff] }
  0xd1   :  { %1926 = vmatpush.bf16.msra.mxu2 %v2690_v30  ;;  %v2498_v30 = vor.u32 %v3528_v11, %v2495_v15  ;;  %v2354_v47 = vor.u32 %v3492_v24, %v2351_v26  ;;  %v3359_v51 = vld [vmem:[%s5564_s1 + $0x7f8] sm:$0xf0]  ;;  %v3788_v16 = vld [vmem:[#allocation1 + $0x9] sm:$0xff] }
  0xd2   :  { %1939 = vmatpush.bf16.msra.mxu3 %v2818_v37  ;;  %v3556_v37 = vld [vmem:[%s5564_s1 + $0x20c] sm:$0xf]  ;;  %v3362_v59 = vor.u32 %v3744_v50, %v3359_v51  ;;  %v3087_v60 = vld [vmem:[%s5564_s1 + $0x5d8] sm:$0xf0] }
  0xd3   :  { %1901 = vmatpush.bf16.msra.mxu0 %v2418_v44  ;;  %v1675_v39 = vpop.f32.mrf.mxu2  ;;  %v3215_v62 = vld [vmem:[%s5564_s1 + $0x6d8] sm:$0xf0]  ;;  %v3636_v21 = vld [vmem:[%s5564_s1 + $0x48c] sm:$0xf] }
  0xd4   :  { %1914 = vmatpush.bf16.msra.mxu1 %v2546_v46  ;;  %v2975_v46 = vld [vmem:[%s5564_s1 + $0x4f8] sm:$0xf0]  ;;  %v3218_v3 = vor.u32 %v3708_v61, %v3215_v62  ;;  %v3668_v24 = vld [vmem:[%s5564_s1 + $0x58c] sm:$0xf] }
  0xd5   :  { %1927 = vmatpush.bf16.msra.mxu2 %v2674_v27  ;;  %v3680_v27 = vld [vmem:[%s5564_s1 + $0x5ec] sm:$0xf]  ;;  %v2978_v53 = vor.u32 %v3648_v45, %v2975_v46  ;;  %v3343_v0 = vld [vmem:[%s5564_s1 + $0x7d8] sm:$0xf0] }
  0xd6   :  { %1940 = vmatpush.bf16.msra.mxu3 %v2802_v49  ;;  %v1688_v44 = vpop.f32.mrf.mxu3  ;;  %v2610_v49 = vor.u32 %v3556_v37, %v2607_v41  ;;  %v3106_v54 = vor.u32 %v3680_v27, %v3103_v48  ;;  %v2943_v4 = vld [vmem:[%s5564_s1 + $0x4b8] sm:$0xf0]  ;;  %v3732_v36 = vld [vmem:[%s5564_s1 + $0x78c] sm:$0xf] }
  0xd7   :  { %1902 = vmatpush.bf16.msra.mxu0 %v2402_v56  ;;  %v3644_v56 = vld [vmem:[%s5564_s1 + $0x4cc] sm:$0xf]  ;;  %v3199_v9 = vld [vmem:[%s5564_s1 + $0x6b8] sm:$0xf0]  ;;  %v2946_v15 = vor.u32 %v3640_v25, %v2943_v4 }
  0xd8   :  { %1915 = vmatpush.bf16.msra.mxu1 %v2530_v57  ;;  %v2959_v57 = vld [vmem:[%s5564_s1 + $0x4d8] sm:$0xf0]  ;;  %v3632_v43 = vld [vmem:[%s5564_s1 + $0x46c] sm:$0xf] }
  0xd9   :  { %1928 = vmatpush.bf16.msra.mxu2 %v2658_v58  ;;  %v3676_v58 = vld [vmem:[%s5564_s1 + $0x5cc] sm:$0xf]  ;;  %v2962_v1 = vor.u32 %v3644_v56, %v2959_v57  ;;  %v3327_v11 = vld [vmem:[%s5564_s1 + $0x7b8] sm:$0xf0] }
  0xda   :  { %1941 = vmatpush.bf16.msra.mxu3 %v2786_v63  ;;  %v3740_v63 = vld [vmem:[%s5564_s1 + $0x7cc] sm:$0xf]  ;;  %v3090_v2 = vor.u32 %v3676_v58, %v3087_v60  ;;  %v3330_v26 = vor.u32 %v3736_v10, %v3327_v11  ;;  %v3183_v35 = vld [vmem:[%s5564_s1 + $0x698] sm:$0xf0]  ;;  %v281_v11 = vperm.slane %v4986_v32, 1 }
  0xdb   :  { %1903 = vmatpush.bf16.msra.mxu0 %v2386_v6  ;;  %v3346_v6 = vor.u32 %v3740_v63, %v3343_v0  ;;  %v3311_v37 = vld [vmem:[%s5564_s1 + $0x798] sm:$0xf0]  ;;  %v3664_v45 = vld [vmem:[%s5564_s1 + $0x56c] sm:$0xf] }
  0xdc   :  { %1916 = vmatpush.bf16.msra.mxu1 %v2514_v31  ;;  %v3071_v31 = vld [vmem:[%s5564_s1 + $0x5b8] sm:$0xf0]  ;;  %v3314_v27 = vor.u32 %v3732_v36, %v3311_v37  ;;  %v3696_v48 = vld [vmem:[%s5564_s1 + $0x66c] sm:$0xf] }
  0xdd   :  { %1929 = vmatpush.bf16.msra.mxu2 %v2642_v38  ;;  %v3704_v38 = vld [vmem:[%s5564_s1 + $0x6ac] sm:$0xf]  ;;  %v3074_v19 = vor.u32 %v3672_v5, %v3071_v31  ;;  %v2911_v44 = vld [vmem:[%s5564_s1 + $0x478] sm:$0xf0] }
  0xde   :  { %1942 = vmatpush.bf16.msra.mxu3 %v2770_v14  ;;  %v3787_v14 = vld [vmem:[#allocation1 + $0x1b] sm:$0xff]  ;;  %v3202_v20 = vor.u32 %v3704_v38, %v3199_v9  ;;  %v3728_v29 = vld [vmem:[%s5564_s1 + $0x76c] sm:$0xf] }
  0xdf   :  { %1904 = vmatpush.bf16.msra.mxu0 %v2370_v23  ;;  %v2927_v23 = vld [vmem:[%s5564_s1 + $0x498] sm:$0xf0]  ;;  %v3692_v58 = vld [vmem:[%s5564_s1 + $0x64c] sm:$0xf] }
  0xe0   :  { %1917 = vmatpush.bf16.msra.mxu1 %v2498_v30  ;;  %v3055_v30 = vld [vmem:[%s5564_s1 + $0x598] sm:$0xf0]  ;;  %v2930_v39 = vor.u32 %v3636_v21, %v2927_v23  ;;  %v3724_v61 = vld [vmem:[%s5564_s1 + $0x74c] sm:$0xf] }
  0xe1   :  { %1930 = vmatpush.bf16.msra.mxu2 %v2626_v33  ;;  %v3700_v33 = vld [vmem:[%s5564_s1 + $0x68c] sm:$0xf]  ;;  %v3058_v41 = vor.u32 %v3668_v24, %v3055_v30  ;;  %v3167_v28 = vld [vmem:[%s5564_s1 + $0x678] sm:$0xf0] }
  0xe2   :  { %1943 = vmatpush.bf16.msra.mxu3 %v2754_v40  ;;  %v3186_v42 = vor.u32 %v3700_v33, %v3183_v35  ;;  %v3170_v51 = vor.u32 %v3696_v48, %v3167_v28  ;;  %v3023_v57 = vld [vmem:[%s5564_s1 + $0x558] sm:$0xf0]  ;;  %v3656_v4 = vld [vmem:[%s5564_s1 + $0x52c] sm:$0xf] }
  0xe3   :  { %1905 = vmatpush.bf16.msra.mxu0 %v2354_v47  ;;  %v5345_v40 = vpop.f32.mrf.mxu0  ;;  %v3039_v47 = vld [vmem:[%s5564_s1 + $0x578] sm:$0xf0]  ;;  %v3688_v31 = vld [vmem:[%s5564_s1 + $0x62c] sm:$0xf] }
  0xe4   :  { %1918 = vmatpush.bf16.msra.mxu1 %v2482_v34  ;;  %v5356_v46 = vpop.f32.mrf.mxu1  ;;  %v3295_v34 = vld [vmem:[%s5564_s1 + $0x778] sm:$0xf0]  ;;  %v3042_v50 = vor.u32 %v3664_v45, %v3039_v47  ;;  %v3720_v9 = vld [vmem:[%s5564_s1 + $0x72c] sm:$0xf]  ;;  %v1700_v37 = vadd.f32 %v5345_v40, %v281_v11  ;;  %v3753_v40 = vld [vmem:[%s5566_s3 + $0x30] sm:$0xff] }
  0xe5   :  { %1931 = vmatpush.bf16.msra.mxu2 %v2610_v49  ;;  %v2914_v49 = vor.u32 %v3632_v43, %v2911_v44  ;;  %v3298_v56 = vor.u32 %v3728_v29, %v3295_v34  ;;  %v3279_v62 = vld [vmem:[%s5564_s1 + $0x758] sm:$0xf0]  ;;  %v3716_v35 = vld [vmem:[%s5564_s1 + $0x70c] sm:$0xf]  ;;  %v3765_v11 = vld [vmem:[%s5566_s3 + $0x90] sm:$0xff] }
  0xe6   :  { %1944 = vmatpush.bf16.msra.mxu3 %v2738_v52  ;;  %1906 = vmatmul.bf16.vlgmr.msra.gmra.mxu0 %v3786_v13  ;;  %v3628_v52 = vld [vmem:[%s5564_s1 + $0x44c] sm:$0xf]  ;;  %v2879_v25 = vld [vmem:[%s5564_s1 + $0x438] sm:$0xf0] }
  0xe7   :  { %1950 = vmatpush.bf16.msrb.mxu0 %v2978_v53  ;;  %1919 = vmatmul.bf16.vlgmr.msra.gmra.mxu1 %v3788_v16  ;;  %v2895_v53 = vld [vmem:[%s5564_s1 + $0x458] sm:$0xf0]  ;;  %v3620_v16 = vld [vmem:[%s5564_s1 + $0x40c] sm:$0xf] }
  0xe8   :  { %1963 = vmatpush.bf16.msrb.mxu1 %v3106_v54  ;;  %1932 = vmatmul.bf16.vlgmr.msra.gmra.mxu2 %v3785_v8  ;;  %v3660_v54 = vld [vmem:[%s5564_s1 + $0x54c] sm:$0xf]  ;;  %v2898_v63 = vor.u32 %v3628_v52, %v2895_v53  ;;  %v3007_v8 = vld [vmem:[%s5564_s1 + $0x538] sm:$0xf0] }
  0xe9   :  { %1976 = vmatpush.bf16.msrb.mxu2 %v3234_v55  ;;  %1945 = vmatmul.bf16.vlgmr.msra.gmra.mxu3 %v3787_v14  ;;  %v3135_v38 = vld [vmem:[%s5564_s1 + $0x638] sm:$0xf0]  ;;  %v3010_v14 = vor.u32 %v3656_v4, %v3007_v8  ;;  %v3752_v28 = vld [vmem:[%s5566_s3 + $0x28] sm:$0xff]  ;;  %v3755_v8 = vld [vmem:[%s5566_s3 + $0x40] sm:$0xff] }
  0xea   :  { %1989 = vmatpush.bf16.msrb.mxu3 %v3362_v59  ;;  %v3151_v59 = vld [vmem:[%s5564_s1 + $0x658] sm:$0xf0]  ;;  %v3760_v29 = vld [vmem:[%s5566_s3 + $0x68] sm:$0xff] }
  0xeb   :  { %1951 = vmatpush.bf16.msrb.mxu0 %v2962_v1  ;;  %v5382_v55 = vpop.f32.mrf.mxu2  ;;  %v1701_v0 = vpop.f32.mrf.mxu0  ;;  %v3026_v1 = vor.u32 %v3660_v54, %v3023_v57  ;;  %v3263_v10 = vld [vmem:[%s5564_s1 + $0x738] sm:$0xf0]  ;;  %v3749_v57 = vld [vmem:[%s5566_s3 + $0x10] sm:$0xff] }
  0xec   :  { %1964 = vmatpush.bf16.msrb.mxu1 %v3090_v2  ;;  %v5393_v60 = vpop.f32.mrf.mxu3  ;;  %v3154_v2 = vor.u32 %v3692_v58, %v3151_v59  ;;  %v1714_v5 = vpop.f32.mrf.mxu1  ;;  %v3266_v23 = vor.u32 %v3720_v9, %v3263_v10  ;;  %v2991_v24 = vld [vmem:[%s5564_s1 + $0x518] sm:$0xf0]  ;;  %v3748_v0 = vld [vmem:[%s5566_s3 + $0x8] sm:$0xff] }
  0xed   :  { %1977 = vmatpush.bf16.msrb.mxu2 %v3218_v3  ;;  %v3624_v3 = vld [vmem:[%s5564_s1 + $0x42c] sm:$0xf]  ;;  %v3119_v30 = vld [vmem:[%s5564_s1 + $0x618] sm:$0xf0]  ;;  %v3747_v5 = vld [vmem:[%s5566_s3] sm:$0xff] }
  0xee   :  { %1990 = vmatpush.bf16.msrb.mxu3 %v3346_v6  ;;  %v3282_v6 = vor.u32 %v3724_v61, %v3279_v62  ;;  %v2882_v13 = vor.u32 %v3624_v3, %v2879_v25  ;;  %v3247_v36 = vld [vmem:[%s5564_s1 + $0x718] sm:$0xf0]  ;;  %v3757_v61 = vld [vmem:[%s5566_s3 + $0x50] sm:$0xff] }
  0xef   :  { %1952 = vmatpush.bf16.msrb.mxu0 %v2946_v15  ;;  %v3138_v15 = vor.u32 %v3688_v31, %v3135_v38  ;;  %v3250_v43 = vor.u32 %v3716_v35, %v3247_v36  ;;  %v3754_v44 = vld [vmem:[%s5566_s3 + $0x38] sm:$0xff] }
  0xf0   :  { %1965 = vmatpush.bf16.msrb.mxu1 %v3074_v19  ;;  %v2863_v19 = vld [vmem:[%s5564_s1 + $0x418] sm:$0xf0] }
  0xf1   :  { %1978 = vmatpush.bf16.msrb.mxu2 %v3202_v20  ;;  %v3652_v20 = vld [vmem:[%s5564_s1 + $0x50c] sm:$0xf]  ;;  %v3762_v45 = vld [vmem:[%s5566_s3 + $0x78] sm:$0xff] }
  0xf2   :  { %1991 = vmatpush.bf16.msrb.mxu3 %v3330_v26  ;;  %v3684_v26 = vld [vmem:[%s5564_s1 + $0x60c] sm:$0xf]  ;;  %v3770_v47 = vld [vmem:[%s5566_s3 + $0xb8] sm:$0xff] }
  0xf3   :  { %1953 = vmatpush.bf16.msrb.mxu0 %v2930_v39  ;;  %v1727_v21 = vpop.f32.mrf.mxu2  ;;  %v2866_v39 = vor.u32 %v3620_v16, %v2863_v19  ;;  %v3758_v53 = vld [vmem:[%s5566_s3 + $0x58] sm:$0xff]  ;;  %v3763_v19 = vld [vmem:[%s5566_s3 + $0x80] sm:$0xff] }
  0xf4   :  { %1966 = vmatpush.bf16.msrb.mxu1 %v3058_v41  ;;  %v1740_v33 = vpop.f32.mrf.mxu3  ;;  %v2994_v41 = vor.u32 %v3652_v20, %v2991_v24  ;;  %v282_v20 = vperm.slane %v4986_v32, 2 }
  0xf5   :  { %1979 = vmatpush.bf16.msrb.mxu2 %v3186_v42  ;;  %v3122_v42 = vor.u32 %v3684_v26, %v3119_v30 }
  0xf6   :  { %1992 = vmatpush.bf16.msrb.mxu3 %v3314_v27  ;;  %v1713_v27 = vadd.f32 %v5356_v46, %v1700_v37  ;;  %v3761_v46 = vld [vmem:[%s5566_s3 + $0x70] sm:$0xff] }
  0xf7   :  { %1954 = vmatpush.bf16.msrb.mxu0 %v2914_v49 }
  0xf8   :  { %1967 = vmatpush.bf16.msrb.mxu1 %v3042_v50  ;;  %v1726_v48 = vadd.f32 %v5382_v55, %v1713_v27  ;;  %v3769_v50 = vld [vmem:[%s5566_s3 + $0xb0] sm:$0xff] }
  0xf9   :  { %1980 = vmatpush.bf16.msrb.mxu2 %v3170_v51  ;;  %v3750_v51 = vld [vmem:[%s5566_s3 + $0x18] sm:$0xff] }
  0xfa   :  { %1993 = vmatpush.bf16.msrb.mxu3 %v3298_v56  ;;  %v3768_v56 = vld [vmem:[%s5566_s3 + $0xa8] sm:$0xff] }
  0xfb   :  { %1955 = vmatpush.bf16.msrb.mxu0 %v2898_v63 }
  0xfc   :  { %1968 = vmatpush.bf16.msrb.mxu1 %v3026_v1  ;;  %v3766_v1 = vld [vmem:[%s5566_s3 + $0x98] sm:$0xff] }
  0xfd   :  { %1981 = vmatpush.bf16.msrb.mxu2 %v3154_v2  ;;  %v3756_v2 = vld [vmem:[%s5566_s3 + $0x48] sm:$0xff] }
  0xfe   :  { %1994 = vmatpush.bf16.msrb.mxu3 %v3282_v6  ;;  %v2002_v6 = vmax.f32 %v5199_v7, 0.0 }
  0xff   :  { %1956 = vmatpush.bf16.msrb.mxu0 %v2882_v13 }
 0x100   :  { %1969 = vmatpush.bf16.msrb.mxu1 %v3010_v14  ;;  %v2006_v38 = vpack.c.bf16 %v2002_v6, %v2002_v6  ;;  %v3764_v14 = vld [vmem:[%s5566_s3 + $0x88] sm:$0xff] }
 0x101   :  { %1982 = vmatpush.bf16.msrb.mxu2 %v3138_v15 }
 0x102   :  { %1995 = vmatpush.bf16.msrb.mxu3 %v3266_v23 }
 0x103   :  { %1957 = vmatpush.bf16.msrb.mxu0 %v2866_v39 }
 0x104   :  { %1970 = vmatpush.bf16.msrb.mxu1 %v2994_v41  ;;  %v1764_v49 = vpop.f32.mrf.mxu1 }
 0x105   :  { %1983 = vmatpush.bf16.msrb.mxu2 %v3122_v42 }
 0x106   :  { %1996 = vmatpush.bf16.msrb.mxu3 %v3250_v43  ;;  %1958 = vmatmul.bf16.vlgmr.msrb.gmra.mxu0 %v5112_v17  ;;  %v1739_v17 = vadd.f32 %v5393_v60, %v1726_v48  ;;  %v3767_v60 = vld [vmem:[%s5566_s3 + $0xa0] sm:$0xff] }
 0x107   :  { %2270 = vmatpush.bf16.msra.mxu0 %v3754_v44  ;;  %1971 = vmatmul.bf16.vlgmr.msrb.gmra.mxu1 %v5124_v22  ;;  %v1751_v22 = vpop.f32.mrf.mxu0  ;;  %v3778_v44 = vld [vmem:[%s5566_s3 + $0xf8] sm:$0xff] }
 0x108   :  { %2283 = vmatpush.bf16.msra.mxu1 %v3762_v45  ;;  %1984 = vmatmul.bf16.vlgmr.msrb.gmra.mxu2 %v5100_v12  ;;  %v3751_v12 = vld [vmem:[%s5566_s3 + $0x20] sm:$0xff]  ;;  %v1752_v34 = vadd.f32 %v1751_v22, %v1739_v17  ;;  %v3774_v22 = vld [vmem:[%s5566_s3 + $0xd8] sm:$0xff] }
 0x109   :  { %1997 = vmatmul.bf16.vlgmr.msrb.gmra.mxu3 %v5115_v18  ;;  %2296 = vmatpush.bf16.msra.mxu2 %v3770_v47  ;;  %v3759_v18 = vld [vmem:[%s5566_s3 + $0x60] sm:$0xff] }
 0x10a   :  { %v1765_v52 = vadd.f32 %v1764_v49, %v1752_v34  ;;  %2309 = vmatpush.bf16.msra.mxu3 %v3778_v44 }
 0x10b   :  { %2271 = vmatpush.bf16.msra.mxu0 %v3753_v40  ;;  %v1777_v54 = vpop.f32.mrf.mxu2  ;;  %v3777_v40 = vld [vmem:[%s5566_s3 + $0xf0] sm:$0xff] }
 0x10c   :  { %2284 = vmatpush.bf16.msra.mxu1 %v3761_v46  ;;  %v1790_v55 = vpop.f32.mrf.mxu3  ;;  %v1778_v58 = vadd.f32 %v1777_v54, %v1765_v52  ;;  %v1766_v62 = vpop.f32.mrf.mxu1  ;;  %v3771_v54 = vld [vmem:[%s5566_s3 + $0xc0] sm:$0xff] }
 0x10d   :  { %2297 = vmatpush.bf16.msra.mxu2 %v3769_v50  ;;  %v3772_v50 = vld [vmem:[%s5566_s3 + $0xc8] sm:$0xff] }
 0x10e   :  { %v1791_v63 = vadd.f32 %v1790_v55, %v1778_v58  ;;  %2310 = vmatpush.bf16.msra.mxu3 %v3777_v40 }
 0x10f   :  { %2272 = vmatpush.bf16.msra.mxu0 %v3752_v28  ;;  %v1753_v59 = vpop.f32.mrf.mxu0  ;;  %v3776_v28 = vld [vmem:[%s5566_s3 + $0xe8] sm:$0xff] }
 0x110   :  { %2285 = vmatpush.bf16.msra.mxu1 %v3760_v29  ;;  %v2003_v4 = vmax.f32 %v1791_v63, 0.0 }
 0x111   :  { %2298 = vmatpush.bf16.msra.mxu2 %v3768_v56  ;;  %v283_v56 = vperm.slane %v4986_v32, 3 }
 0x112   :  { %v2007_v31 = vpack.c.bf16 %v2003_v4, %v2003_v4  ;;  %2311 = vmatpush.bf16.msra.mxu3 %v3776_v28 }
 0x113   :  { %2273 = vmatpush.bf16.msra.mxu0 %v3751_v12  ;;  %v1779_v3 = vpop.f32.mrf.mxu2  ;;  %v3775_v12 = vld [vmem:[%s5566_s3 + $0xe0] sm:$0xff] }
 0x114   :  { %2286 = vmatpush.bf16.msra.mxu1 %v3759_v18  ;;  %v1792_v25 = vpop.f32.mrf.mxu3  ;;  %v3773_v18 = vld [vmem:[%s5566_s3 + $0xd0] sm:$0xff] }
 0x115   :  { %2299 = vmatpush.bf16.msra.mxu2 %v3767_v60 }
 0x116   :  { %2312 = vmatpush.bf16.msra.mxu3 %v3775_v12 }
 0x117   :  { %2274 = vmatpush.bf16.msra.mxu0 %v3750_v51 }
 0x118   :  { %2287 = vmatpush.bf16.msra.mxu1 %v3758_v53 }
 0x119   :  { %2300 = vmatpush.bf16.msra.mxu2 %v3766_v1 }
 0x11a   :  { %2313 = vmatpush.bf16.msra.mxu3 %v3774_v22 }
 0x11b   :  { %2275 = vmatpush.bf16.msra.mxu0 %v3749_v57 }
 0x11c   :  { %2288 = vmatpush.bf16.msra.mxu1 %v3757_v61 }
 0x11d   :  { %2301 = vmatpush.bf16.msra.mxu2 %v3765_v11 }
 0x11e   :  { %2314 = vmatpush.bf16.msra.mxu3 %v3773_v18 }
 0x11f   :  { %2276 = vmatpush.bf16.msra.mxu0 %v3748_v0 }
 0x120   :  { %2289 = vmatpush.bf16.msra.mxu1 %v3756_v2 }
 0x121   :  { %2302 = vmatpush.bf16.msra.mxu2 %v3764_v14 }
 0x122   :  { %2315 = vmatpush.bf16.msra.mxu3 %v3772_v50 }
 0x123   :  { %2277 = vmatpush.bf16.msra.mxu0 %v3747_v5  ;;  %v1803_v9 = vpop.f32.mrf.mxu0 }
 0x124   :  { %2290 = vmatpush.bf16.msra.mxu1 %v3755_v8  ;;  %v1816_v10 = vpop.f32.mrf.mxu1  ;;  %v1804_v24 = vadd.f32 %v1803_v9, %v282_v20 }
 0x125   :  { %2303 = vmatpush.bf16.msra.mxu2 %v3763_v19 }
 0x126   :  { %2278 = vmatmul.bf16.vlgmr.msra.gmra.mxu0 %v2006_v38  ;;  %v1817_v26 = vadd.f32 %v1816_v10, %v1804_v24  ;;  %2316 = vmatpush.bf16.msra.mxu3 %v3771_v54  ;;  %v3780_v10 = vld [vmem:[%s5567_s4] ss:$0 sm:$0xff] }
 0x127   :  { %2291 = vmatmul.bf16.vlgmr.msra.gmra.mxu1 %v2007_v31 }
 0x12b   :  { %v1829_v13 = vpop.f32.mrf.mxu2  ;;  %v1805_v15 = vpop.f32.mrf.mxu0 }
 0x12c   :  { %v1842_v7 = vpop.f32.mrf.mxu3  ;;  %v1818_v16 = vpop.f32.mrf.mxu1  ;;  %v1830_v30 = vadd.f32 %v1829_v13, %v1817_v26 }
 0x12e   :  { %v1843_v33 = vadd.f32 %v1842_v7, %v1830_v30 }
 0x133   :  { %v1831_v21 = vpop.f32.mrf.mxu2 }
 0x134   :  { %v1844_v23 = vpop.f32.mrf.mxu3 }
 0x143   :  { %v1855_v35 = vpop.f32.mrf.mxu0 }
 0x144   :  { %v1856_v36 = vadd.f32 %v1855_v35, %v1843_v33  ;;  %v1868_v37 = vpop.f32.mrf.mxu1 }
 0x146   :  { %v1869_v39 = vadd.f32 %v1868_v37, %v1856_v36 }
 0x14b   :  { %v1881_v41 = vpop.f32.mrf.mxu2  ;;  %v1857_v27 = vpop.f32.mrf.mxu0 }
 0x14c   :  { %v1882_v42 = vadd.f32 %v1881_v41, %v1869_v39  ;;  %v1894_v43 = vpop.f32.mrf.mxu3  ;;  %v1870_v47 = vpop.f32.mrf.mxu1 }
 0x14e   :  { %v1895_v45 = vadd.f32 %v1894_v43, %v1882_v42 }
 0x150   :  { %v2004_v46 = vmax.f32 %v1895_v45, 0.0 }
 0x152   :  { %v2008_v48 = vpack.c.bf16 %v2004_v46, %v2004_v46 }
 0x153   :  { %v1883_v17 = vpop.f32.mrf.mxu2 }
 0x154   :  { %2304 = vmatmul.bf16.vlgmr.msra.gmra.mxu2 %v2008_v48  ;;  %v1896_v29 = vpop.f32.mrf.mxu3 }
 0x163   :  { %v1907_v34 = vpop.f32.mrf.mxu0 }
 0x164   :  { %v1920_v49 = vpop.f32.mrf.mxu1  ;;  %v1908_v59 = vadd.f32 %v1907_v34, %v283_v56 }
 0x166   :  { %v1921_v60 = vadd.f32 %v1920_v49, %v1908_v59 }
 0x16b   :  { %v1933_v51 = vpop.f32.mrf.mxu2  ;;  %v1909_v53 = vpop.f32.mrf.mxu0 }
 0x16c   :  { %v1946_v52 = vpop.f32.mrf.mxu3  ;;  %v1922_v55 = vpop.f32.mrf.mxu1  ;;  %v1934_v61 = vadd.f32 %v1933_v51, %v1921_v60 }
 0x16e   :  { %v1947_v62 = vadd.f32 %v1946_v52, %v1934_v61 }
 0x173   :  { %v1935_v57 = vpop.f32.mrf.mxu2 }
 0x174   :  { %v1948_v58 = vpop.f32.mrf.mxu3 }
 0x183   :  { %v1959_v63 = vpop.f32.mrf.mxu0 }
 0x184   :  { %v1972_v0 = vpop.f32.mrf.mxu1  ;;  %v1960_v1 = vadd.f32 %v1959_v63, %v1947_v62 }
 0x186   :  { %v1973_v2 = vadd.f32 %v1972_v0, %v1960_v1 }
 0x18b   :  { %v1985_v3 = vpop.f32.mrf.mxu2  ;;  %v1961_v5 = vpop.f32.mrf.mxu0 }
 0x18c   :  { %v1986_v25 = vadd.f32 %v1985_v3, %v1973_v2  ;;  %v1998_v4 = vpop.f32.mrf.mxu3  ;;  %v1974_v6 = vpop.f32.mrf.mxu1 }
 0x18e   :  { %v1999_v8 = vadd.f32 %v1998_v4, %v1986_v25 }
 0x190   :  { %v2005_v31 = vmax.f32 %v1999_v8, 0.0 }
 0x192   :  { %v2009_v38 = vpack.c.bf16 %v2005_v31, %v2005_v31 }
 0x193   :  { %v1987_v9 = vpop.f32.mrf.mxu2 }
 0x194   :  { %v2000_v32 = vpop.f32.mrf.mxu3  ;;  %2317 = vmatmul.bf16.vlgmr.msra.gmra.mxu3 %v2009_v38 }
 0x1a3   :  { %v2279_v11 = vpop.f32.mrf.mxu0 }
 0x1a4   :  { %v2280_v13 = vadd.f32 %v3780_v10, %v2279_v11  ;;  %v2292_v7 = vpop.f32.mrf.mxu1 }
 0x1a6   :  { %v2293_v14 = vadd.f32 %v2292_v7, %v2280_v13 }
 0x1ab   :  { %v2281_v15 = vpop.f32.mrf.mxu0 }
 0x1ac   :  { %v2294_v16 = vpop.f32.mrf.mxu1 }
 0x1d7   :  { %v2305_v19 = vpop.f32.mrf.mxu2 }
 0x1d8   :  { %v2306_v21 = vadd.f32 %v2305_v19, %v2293_v14 }
 0x1df   :  { %v2307_v20 = vpop.f32.mrf.mxu2 }
 0x217   :  { %v2318_v23 = vpop.f32.mrf.mxu3 }
 0x218   :  { %v2319_v24 = vadd.f32 %v2318_v23, %v2306_v21 }
 0x21a   :  { %2322 = vst [vmem:[#allocation2] sm:$0x3] %v2319_v24 }
 0x21b   :  { %2333 = dma.vmem_to_hbm [thread:$0]  %s2329_s11, 32, %s2331_s13, [#allocation3]  }
 0x21f   :  { %v2320_v26 = vpop.f32.mrf.mxu3 }
 0x220   :  { %3813 = dma.done.wait [#allocation3], 32  }
 0x221   :  { %3814 = vsyncadd [#allocation3], 4294967264 }
 0x222   :  { %2338 = vsyncpa [#allocation3], 1 }

</bundles_post_ra>
